<compile_context>
chip_gen: v7x
topology: tpu7x:2x2x1
jax: 0.10.0
libtpu: 0.0.40
codegen_flags: <defaults>
</compile_context>

<pallas_src>
import functools

import jax
import jax.numpy as jnp
from jax import lax
from jax.experimental import pallas as pl
from jax.experimental.pallas import tpu as pltpu


# ----------------------------------------------------------------------------
# Kernel
# ----------------------------------------------------------------------------
def _fused_net_kernel(xcol_ref, w1_ref, b1_ref, w2_ref, b2_ref,
                      w3_ref, b3_ref, w4_ref, b4_ref, o_ref,
                      pool1_ref, p1_ref, pool2_ref, *, batch):
    B = batch

    # ---- Conv2d(3->32, k=3), valid, 32x32 -> 30x30 : ONE matmul --------------
    # xcol rows (per image): q = h*32 + w  (h in [0,30), w in [0,32); w>=30 are
    # zero-feature pad rows).  Lanes: (tap, cin) -> 27, zero-padded to 32.
    lhs1 = xcol_ref[...].reshape(B * 960, 32)                         # bf16, lane-dense
    acc1 = jnp.dot(lhs1, w1_ref[...], preferred_element_type=jnp.float32)
    acc1 = acc1 + b1_ref[...]                                         # (B*960, 32) f32

    # ---- MaxPool2d(2,2): 30x30 -> 15x15 --------------------------------------
    r1 = acc1.reshape(B * 15, 64, 32)                                 # pair h rows
    yh = jnp.maximum(r1[:, 0:32, :], r1[:, 32:64, :])                 # (B*15, 32, 32)
    pool1_ref[...] = yh.reshape(B * 480, 32)                          # rows h1*32 + w
    p1 = jnp.maximum(pool1_ref[pl.ds(0, B * 240, stride=2), :],
                     pool1_ref[pl.ds(1, B * 240, stride=2), :])       # rows h1*16 + w1
    p1_ref[0:B * 240, :] = p1.astype(jnp.bfloat16)                    # cast ONCE
    p1_ref[B * 240:B * 240 + 16, :] = jnp.zeros((16, 32), jnp.bfloat16)  # safe tail

    # ---- Conv2d(32->64, k=5), valid, 15x15 -> 11x11 : ONE matmul, K=800 ------
    lhs2_rows = []
    for b in range(B):
        base = b * 240
        wins = [p1_ref[base + i * 16 + j: base + i * 16 + j + 176, :]
                for i in range(5) for j in range(5)]                  # 25 x (176, 32)
        lhs2_rows.append(jnp.concatenate(wins, axis=1))               # (176, 800) bf16
    lhs2 = jnp.concatenate(lhs2_rows, axis=0) if B > 1 else lhs2_rows[0]
    acc2 = jnp.dot(lhs2, w2_ref[...], preferred_element_type=jnp.float32)
    acc2 = acc2 + b2_ref[...]                                         # (B*176, 64) f32

    # ---- MaxPool2d(2,2): 11x11 -> 5x5 (floor) + AdaptiveMaxPool2d((1,1)) -----
    # Dropout2d(p=0.1): eval-mode identity.
    # TODO(synk): training-mode channel dropout (mask + 1/(1-p) scaling) not implemented.
    fmin = jnp.finfo(jnp.float32).min
    ridx = lax.broadcasted_iota(jnp.int32, (40, 64), 0)
    wvalid = jnp.bitwise_and(ridx, 7) < 5                             # keep w3 in [0,5)
    feats = []
    for b in range(B):
        a2 = acc2[b * 176: b * 176 + 160, :]                          # h2 in [0,10)
        r2 = a2.reshape(5, 32, 64)
        y2 = jnp.maximum(r2[:, 0:16, :], r2[:, 16:32, :])             # pool h2 pairs
        pool2_ref[b * 80:(b + 1) * 80, :] = y2.reshape(80, 64)        # rows h3*16 + w2
        p2 = jnp.maximum(pool2_ref[pl.ds(b * 80, 40, stride=2), :],
                         pool2_ref[pl.ds(b * 80 + 1, 40, stride=2), :])  # rows h3*8+w3
        feats.append(jnp.max(jnp.where(wvalid, p2, fmin), axis=0, keepdims=True))
    feat = jnp.concatenate(feats, axis=0) if B > 1 else feats[0]      # (B, 64) f32

    # ---- Flatten -> Linear(64,32) -> ReLU -> Linear(32,1) -> Sigmoid ---------
    h = jnp.dot(feat, w3_ref[...], preferred_element_type=jnp.float32) + b3_ref[...]
    h = jnp.maximum(h, 0.0)
    z = jnp.dot(h, w4_ref[...], preferred_element_type=jnp.float32) + b4_ref[...]
    o_ref[...] = jax.nn.sigmoid(z).reshape(1, 1, B)                   # lane-dense store


# ----------------------------------------------------------------------------
# Parameters (torch layouts) + packing into kernel-friendly layouts
# ----------------------------------------------------------------------------
def init_raw_params(key):
    ks = jax.random.split(key, 8)
    s = 0.1
    w1 = s * jax.random.normal(ks[0], (32, 3, 3, 3), jnp.float32)     # (O, C, kh, kw)
    b1 = s * jax.random.normal(ks[1], (32,), jnp.float32)
    w2 = s * jax.random.normal(ks[2], (64, 32, 5, 5), jnp.float32)
    b2 = s * jax.random.normal(ks[3], (64,), jnp.float32)
    w3 = s * jax.random.normal(ks[4], (32, 64), jnp.float32)          # Linear(64,32)
    b3 = s * jax.random.normal(ks[5], (32,), jnp.float32)
    w4 = s * jax.random.normal(ks[6], (1, 32), jnp.float32)           # Linear(32,1)
    b4 = s * jax.random.normal(ks[7], (1,), jnp.float32)
    return (w1, b1, w2, b2, w3, b3, w4, b4)


def pack_params(raw):
    w1, b1, w2, b2, w3, b3, w4, b4 = raw
    # w1col[(i*3+j)*3 + c, o] = w1[o, c, i, j]; K padded 27 -> 32 with zeros.
    w1col = jnp.transpose(w1, (2, 3, 1, 0)).reshape(27, 32)
    w1col = jnp.pad(w1col, ((0, 5), (0, 0))).astype(jnp.bfloat16)     # (32, 32)
    # w2col[(i*5+j)*32 + c, o] = w2[o, c, i, j]  ->  fused K = 800.
    w2col = jnp.transpose(w2, (2, 3, 1, 0)).reshape(800, 64).astype(jnp.bfloat16)
    return dict(w1col=w1col, b1=b1.reshape(1, 32),
                w2col=w2col, b2=b2.reshape(1, 64),
                w3m=w3.T, b3=b3.reshape(1, 32),
                w4m=w4.T, b4=b4.reshape(1, 1))


# ----------------------------------------------------------------------------
# Wrapper
# ----------------------------------------------------------------------------
def _pick_block_batch(n, max_b=8):
    """Largest divisor of n that keeps >=2 grid steps (feeds both v7x TCs)."""
    if n <= 1:
        return 1
    cap = min(max_b, n // 2)
    for b in range(cap, 0, -1):
        if n % b == 0:
            return b
    return 1


def net_forward(x_nchw, params):
    n = x_nchw.shape[0]
    B = _pick_block_batch(n)
    steps = n // B

    # --- one-time glue: NCHW -> NHWC, conv1 im2col, lane-dense bf16 -----------
    x = jnp.transpose(x_nchw, (0, 2, 3, 1)).astype(jnp.float32)       # (N, 32, 32, 3)
    cols = [x[:, i:i + 30, j:j + 30, :] for i in range(3) for j in range(3)]
    xcol = jnp.concatenate(cols, axis=-1)                             # (N, 30, 30, 27)
    xcol = jnp.pad(xcol, ((0, 0), (0, 0), (0, 2), (0, 5)))            # (N, 30, 32, 32)
    xcol = xcol.reshape(n, 960, 32).astype(jnp.bfloat16)

    grid_spec = pltpu.PrefetchScalarGridSpec(
        num_scalar_prefetch=0,
        grid=(steps,),
        in_specs=[
            pl.BlockSpec((B, 960, 32), lambda s: (s, 0, 0)),          # B images / step
            pl.BlockSpec((32, 32), lambda s: (0, 0)),                 # weights resident
            pl.BlockSpec((1, 32), lambda s: (0, 0)),
            pl.BlockSpec((800, 64), lambda s: (0, 0)),
            pl.BlockSpec((1, 64), lambda s: (0, 0)),
            pl.BlockSpec((64, 32), lambda s: (0, 0)),
            pl.BlockSpec((1, 32), lambda s: (0, 0)),
            pl.BlockSpec((32, 1), lambda s: (0, 0)),
            pl.BlockSpec((1, 1), lambda s: (0, 0)),
        ],
        out_specs=pl.BlockSpec((1, 1, B), lambda s: (s, 0, 0)),
        scratch_shapes=[
            pltpu.VMEM((B * 480, 32), jnp.float32),      # H-pooled conv1
            pltpu.VMEM((B * 240 + 16, 32), jnp.bfloat16),  # 2x2-pooled conv1 (conv2 in)
            pltpu.VMEM((B * 80, 64), jnp.float32),       # H-pooled conv2
        ],
    )

    cost = pl.CostEstimate(
        flops=2 * n * (960 * 32 * 32 + 176 * 800 * 64 + 64 * 32 + 32),
        transcendentals=n,
        bytes_accessed=n * 960 * 32 * 2 + (32 * 32 + 800 * 64) * 2 + n * 4,
    )

    out = pl.pallas_call(
        functools.partial(_fused_net_kernel, batch=B),
        out_shape=jax.ShapeDtypeStruct((steps, 1, B), jnp.float32),
        grid_spec=grid_spec,
        compiler_params=pltpu.CompilerParams(
            dimension_semantics=("parallel",),            # batch steps split across TCs
            vmem_limit_bytes=32 * 1024 * 1024),           # v5e default (16 MiB) is low
        cost_estimate=cost,
    )(xcol, params["w1col"], params["b1"], params["w2col"], params["b2"],
      params["w3m"], params["b3"], params["w4m"], params["b4"])
    return out.reshape(n, 1)


# ----------------------------------------------------------------------------
# Pure-JAX reference (eval-mode semantics of the PyTorch module)
# ----------------------------------------------------------------------------
def net_reference(x_nchw, raw):
    w1, b1, w2, b2, w3, b3, w4, b4 = raw
    dn = ('NCHW', 'OIHW', 'NCHW')
    y = lax.conv_general_dilated(x_nchw, w1, (1, 1), 'VALID', dimension_numbers=dn)
    y = y + b1[None, :, None, None]
    y = lax.reduce_window(y, -jnp.inf, lax.max, (1, 1, 2, 2), (1, 1, 2, 2), 'VALID')
    y = lax.conv_general_dilated(y, w2, (1, 1), 'VALID', dimension_numbers=dn)
    y = y + b2[None, :, None, None]
    y = lax.reduce_window(y, -jnp.inf, lax.max, (1, 1, 2, 2), (1, 1, 2, 2), 'VALID')
    f = jnp.max(y, axis=(2, 3))                                       # adaptive max (1,1)
    h = jnp.maximum(f @ w3.T + b3, 0.0)
    z = h @ w4.T + b4
    return jax.nn.sigmoid(z)


if __name__ == "__main__":
    key = jax.random.PRNGKey(0)
    k_in, k_par = jax.random.split(key)
    x = jax.random.normal(k_in, (2, 3, 32, 32), jnp.float32)          # NCHW like PyTorch
    raw = init_raw_params(k_par)
    params = pack_params(raw)

    y = jax.jit(net_forward)(x, params)
    jax.block_until_ready(y)

    assert y.shape == (2, 1)
    assert bool(jnp.all(jnp.isfinite(y)))

    y_ref = net_reference(x, raw)
    max_err = float(jnp.max(jnp.abs(y - y_ref)))
    # bf16 MXU operands (f32 accumulation) vs f32 reference -> small tolerance.
    assert max_err < 5e-2, f"mismatch vs reference: {max_err}"

    print("KERNEL_OK")
</pallas_src>

<mosaic_0001>
module attributes {stable_mosaic.version = 11 : i64} {
  func.func @_fused_net_kernel(%arg0: i32, %arg1: memref<1x960x32xbf16, #tpu.memory_space<vmem>>, %arg2: memref<32x32xbf16, #tpu.memory_space<vmem>>, %arg3: memref<1x32xf32, #tpu.memory_space<vmem>>, %arg4: memref<800x64xbf16, #tpu.memory_space<vmem>>, %arg5: memref<1x64xf32, #tpu.memory_space<vmem>>, %arg6: memref<64x32xf32, #tpu.memory_space<vmem>>, %arg7: memref<1x32xf32, #tpu.memory_space<vmem>>, %arg8: memref<32x1xf32, #tpu.memory_space<vmem>>, %arg9: memref<1x1xf32, #tpu.memory_space<vmem>>, %arg10: memref<1x1x1xf32, #tpu.memory_space<vmem>>, %arg11: memref<480x32xf32, #tpu.memory_space<vmem>>, %arg12: memref<256x32xbf16, #tpu.memory_space<vmem>>, %arg13: memref<80x64xf32, #tpu.memory_space<vmem>>) attributes {dimension_semantics = [#tpu.dimension_semantics<parallel>], iteration_bounds = array<i64: 2>, scalar_prefetch = 0 : i64, scratch_operands = 3 : i64, tpu.core_type = #tpu.core_type<tc>, window_params = [{transform_indices = @transform_0, window_bounds = array<i64: 1, 960, 32>}, {pipeline_mode = #tpu.pipeline_mode<synchronous>, transform_indices = @transform_1, window_bounds = array<i64: 32, 32>}, {pipeline_mode = #tpu.pipeline_mode<synchronous>, transform_indices = @transform_2, window_bounds = array<i64: 1, 32>}, {pipeline_mode = #tpu.pipeline_mode<synchronous>, transform_indices = @transform_3, window_bounds = array<i64: 800, 64>}, {pipeline_mode = #tpu.pipeline_mode<synchronous>, transform_indices = @transform_4, window_bounds = array<i64: 1, 64>}, {pipeline_mode = #tpu.pipeline_mode<synchronous>, transform_indices = @transform_5, window_bounds = array<i64: 64, 32>}, {pipeline_mode = #tpu.pipeline_mode<synchronous>, transform_indices = @transform_6, window_bounds = array<i64: 1, 32>}, {pipeline_mode = #tpu.pipeline_mode<synchronous>, transform_indices = @transform_7, window_bounds = array<i64: 32, 1>}, {pipeline_mode = #tpu.pipeline_mode<synchronous>, transform_indices = @transform_8, window_bounds = array<i64: 1, 1>}, {transform_indices = @transform_9, window_bounds = array<i64: 1, 1, 1>}]} {
    %c0 = arith.constant 0 : index
    %c0_0 = arith.constant 0 : index
    %c0_1 = arith.constant 0 : index
    %0 = vector.load %arg1[%c0, %c0_0, %c0_1] : memref<1x960x32xbf16, #tpu.memory_space<vmem>>, vector<1x960x32xbf16>
    %1 = vector.shape_cast %0 : vector<1x960x32xbf16> to vector<960x32xbf16>
    %c0_2 = arith.constant 0 : index
    %c0_3 = arith.constant 0 : index
    %2 = vector.load %arg2[%c0_2, %c0_3] : memref<32x32xbf16, #tpu.memory_space<vmem>>, vector<32x32xbf16>
    %cst = arith.constant dense<0.000000e+00> : vector<960x32xf32>
    %3 = tpu.matmul %1, %2, %cst {dimension_numbers = #tpu.dot_dimension_numbers<[1], [0], [0], [1], [0, 0, 1, 1], [], []>} : vector<960x32xbf16>, vector<32x32xbf16>, vector<960x32xf32> -> vector<960x32xf32>
    %c0_4 = arith.constant 0 : index
    %c0_5 = arith.constant 0 : index
    %4 = vector.load %arg3[%c0_4, %c0_5] : memref<1x32xf32, #tpu.memory_space<vmem>>, vector<1x32xf32>
    %5 = vector.broadcast %4 : vector<1x32xf32> to vector<960x32xf32>
    %6 = arith.addf %3, %5 : vector<960x32xf32>
    %7 = vector.shape_cast %6 : vector<960x32xf32> to vector<15x64x32xf32>
    %8 = vector.extract_strided_slice %7 {offsets = [0, 0, 0], sizes = [15, 32, 32], strides = [1, 1, 1]} : vector<15x64x32xf32> to vector<15x32x32xf32>
    %9 = vector.extract_strided_slice %7 {offsets = [0, 32, 0], sizes = [15, 32, 32], strides = [1, 1, 1]} : vector<15x64x32xf32> to vector<15x32x32xf32>
    %10 = arith.maximumf %8, %9 : vector<15x32x32xf32>
    %11 = vector.shape_cast %10 : vector<15x32x32xf32> to vector<480x32xf32>
    %c0_6 = arith.constant 0 : index
    %c0_7 = arith.constant 0 : index
    %12 = vector.load %arg11[%c0_6, %c0_7] : memref<480x32xf32, #tpu.memory_space<vmem>>, vector<480x32xf32>
    tpu.vector_store %arg11[%c0_6, %c0_7], %11 {strides = array<i32>} : memref<480x32xf32, #tpu.memory_space<vmem>>, vector<480x32xf32>,
    %c0_8 = arith.constant 0 : index
    %c0_9 = arith.constant 0 : index
    %13 = tpu.strided_load %arg11[%c0_8, %c0_9] {strides = array<i32: 2, 1>} : memref<480x32xf32, #tpu.memory_space<vmem>>, vector<240x32xf32>
    %c1 = arith.constant 1 : index
    %c0_10 = arith.constant 0 : index
    %14 = tpu.strided_load %arg11[%c1, %c0_10] {strides = array<i32: 2, 1>} : memref<480x32xf32, #tpu.memory_space<vmem>>, vector<240x32xf32>
    %15 = arith.maximumf %13, %14 : vector<240x32xf32>
    %16 = arith.truncf %15 : vector<240x32xf32> to vector<240x32xbf16>
    %c0_11 = arith.constant 0 : index
    %c0_12 = arith.constant 0 : index
    %17 = vector.load %arg12[%c0_11, %c0_12] : memref<256x32xbf16, #tpu.memory_space<vmem>>, vector<240x32xbf16>
    tpu.vector_store %arg12[%c0_11, %c0_12], %16 {strides = array<i32>} : memref<256x32xbf16, #tpu.memory_space<vmem>>, vector<240x32xbf16>,
    %cst_13 = arith.constant 0.000000e+00 : bf16
    %18 = vector.broadcast %cst_13 : bf16 to vector<16x32xbf16>
    %c240 = arith.constant 240 : index
    %c0_14 = arith.constant 0 : index
    %19 = vector.load %arg12[%c240, %c0_14] : memref<256x32xbf16, #tpu.memory_space<vmem>>, vector<16x32xbf16>
    tpu.vector_store %arg12[%c240, %c0_14], %18 {strides = array<i32>} : memref<256x32xbf16, #tpu.memory_space<vmem>>, vector<16x32xbf16>,
    %c0_15 = arith.constant 0 : index
    %c0_16 = arith.constant 0 : index
    %20 = vector.load %arg12[%c0_15, %c0_16] : memref<256x32xbf16, #tpu.memory_space<vmem>>, vector<176x32xbf16>
    %c1_17 = arith.constant 1 : index
    %c0_18 = arith.constant 0 : index
    %21 = vector.load %arg12[%c1_17, %c0_18] : memref<256x32xbf16, #tpu.memory_space<vmem>>, vector<176x32xbf16>
    %c2 = arith.constant 2 : index
    %c0_19 = arith.constant 0 : index
    %22 = vector.load %arg12[%c2, %c0_19] : memref<256x32xbf16, #tpu.memory_space<vmem>>, vector<176x32xbf16>
    %c3 = arith.constant 3 : index
    %c0_20 = arith.constant 0 : index
    %23 = vector.load %arg12[%c3, %c0_20] : memref<256x32xbf16, #tpu.memory_space<vmem>>, vector<176x32xbf16>
    %c4 = arith.constant 4 : index
    %c0_21 = arith.constant 0 : index
    %24 = vector.load %arg12[%c4, %c0_21] : memref<256x32xbf16, #tpu.memory_space<vmem>>, vector<176x32xbf16>
    %c16 = arith.constant 16 : index
    %c0_22 = arith.constant 0 : index
    %25 = vector.load %arg12[%c16, %c0_22] : memref<256x32xbf16, #tpu.memory_space<vmem>>, vector<176x32xbf16>
    %c17 = arith.constant 17 : index
    %c0_23 = arith.constant 0 : index
    %26 = vector.load %arg12[%c17, %c0_23] : memref<256x32xbf16, #tpu.memory_space<vmem>>, vector<176x32xbf16>
    %c18 = arith.constant 18 : index
    %c0_24 = arith.constant 0 : index
    %27 = vector.load %arg12[%c18, %c0_24] : memref<256x32xbf16, #tpu.memory_space<vmem>>, vector<176x32xbf16>
    %c19 = arith.constant 19 : index
    %c0_25 = arith.constant 0 : index
    %28 = vector.load %arg12[%c19, %c0_25] : memref<256x32xbf16, #tpu.memory_space<vmem>>, vector<176x32xbf16>
    %c20 = arith.constant 20 : index
    %c0_26 = arith.constant 0 : index
    %29 = vector.load %arg12[%c20, %c0_26] : memref<256x32xbf16, #tpu.memory_space<vmem>>, vector<176x32xbf16>
    %c32 = arith.constant 32 : index
    %c0_27 = arith.constant 0 : index
    %30 = vector.load %arg12[%c32, %c0_27] : memref<256x32xbf16, #tpu.memory_space<vmem>>, vector<176x32xbf16>
    %c33 = arith.constant 33 : index
    %c0_28 = arith.constant 0 : index
    %31 = vector.load %arg12[%c33, %c0_28] : memref<256x32xbf16, #tpu.memory_space<vmem>>, vector<176x32xbf16>
    %c34 = arith.constant 34 : index
    %c0_29 = arith.constant 0 : index
    %32 = vector.load %arg12[%c34, %c0_29] : memref<256x32xbf16, #tpu.memory_space<vmem>>, vector<176x32xbf16>
    %c35 = arith.constant 35 : index
    %c0_30 = arith.constant 0 : index
    %33 = vector.load %arg12[%c35, %c0_30] : memref<256x32xbf16, #tpu.memory_space<vmem>>, vector<176x32xbf16>
    %c36 = arith.constant 36 : index
    %c0_31 = arith.constant 0 : index
    %34 = vector.load %arg12[%c36, %c0_31] : memref<256x32xbf16, #tpu.memory_space<vmem>>, vector<176x32xbf16>
    %c48 = arith.constant 48 : index
    %c0_32 = arith.constant 0 : index
    %35 = vector.load %arg12[%c48, %c0_32] : memref<256x32xbf16, #tpu.memory_space<vmem>>, vector<176x32xbf16>
    %c49 = arith.constant 49 : index
    %c0_33 = arith.constant 0 : index
    %36 = vector.load %arg12[%c49, %c0_33] : memref<256x32xbf16, #tpu.memory_space<vmem>>, vector<176x32xbf16>
    %c50 = arith.constant 50 : index
    %c0_34 = arith.constant 0 : index
    %37 = vector.load %arg12[%c50, %c0_34] : memref<256x32xbf16, #tpu.memory_space<vmem>>, vector<176x32xbf16>
    %c51 = arith.constant 51 : index
    %c0_35 = arith.constant 0 : index
    %38 = vector.load %arg12[%c51, %c0_35] : memref<256x32xbf16, #tpu.memory_space<vmem>>, vector<176x32xbf16>
    %c52 = arith.constant 52 : index
    %c0_36 = arith.constant 0 : index
    %39 = vector.load %arg12[%c52, %c0_36] : memref<256x32xbf16, #tpu.memory_space<vmem>>, vector<176x32xbf16>
    %c64 = arith.constant 64 : index
    %c0_37 = arith.constant 0 : index
    %40 = vector.load %arg12[%c64, %c0_37] : memref<256x32xbf16, #tpu.memory_space<vmem>>, vector<176x32xbf16>
    %c65 = arith.constant 65 : index
    %c0_38 = arith.constant 0 : index
    %41 = vector.load %arg12[%c65, %c0_38] : memref<256x32xbf16, #tpu.memory_space<vmem>>, vector<176x32xbf16>
    %c66 = arith.constant 66 : index
    %c0_39 = arith.constant 0 : index
    %42 = vector.load %arg12[%c66, %c0_39] : memref<256x32xbf16, #tpu.memory_space<vmem>>, vector<176x32xbf16>
    %c67 = arith.constant 67 : index
    %c0_40 = arith.constant 0 : index
    %43 = vector.load %arg12[%c67, %c0_40] : memref<256x32xbf16, #tpu.memory_space<vmem>>, vector<176x32xbf16>
    %c68 = arith.constant 68 : index
    %c0_41 = arith.constant 0 : index
    %44 = vector.load %arg12[%c68, %c0_41] : memref<256x32xbf16, #tpu.memory_space<vmem>>, vector<176x32xbf16>
    %45 = tpu.concatenate %20, %21, %22, %23, %24, %25, %26, %27, %28, %29, %30, %31, %32, %33, %34, %35 in 1 : vector<176x32xbf16>, vector<176x32xbf16>, vector<176x32xbf16>, vector<176x32xbf16>, vector<176x32xbf16>, vector<176x32xbf16>, vector<176x32xbf16>, vector<176x32xbf16>, vector<176x32xbf16>, vector<176x32xbf16>, vector<176x32xbf16>, vector<176x32xbf16>, vector<176x32xbf16>, vector<176x32xbf16>, vector<176x32xbf16>, vector<176x32xbf16> -> vector<176x512xbf16>
    %46 = tpu.concatenate %36, %37, %38, %39, %40, %41, %42, %43, %44 in 1 : vector<176x32xbf16>, vector<176x32xbf16>, vector<176x32xbf16>, vector<176x32xbf16>, vector<176x32xbf16>, vector<176x32xbf16>, vector<176x32xbf16>, vector<176x32xbf16>, vector<176x32xbf16> -> vector<176x288xbf16>
    %47 = tpu.concatenate %45, %46 in 1 : vector<176x512xbf16>, vector<176x288xbf16> -> vector<176x800xbf16>
    %c0_42 = arith.constant 0 : index
    %c0_43 = arith.constant 0 : index
    %48 = vector.load %arg4[%c0_42, %c0_43] : memref<800x64xbf16, #tpu.memory_space<vmem>>, vector<800x64xbf16>
    %cst_44 = arith.constant dense<0.000000e+00> : vector<176x64xf32>
    %49 = tpu.matmul %47, %48, %cst_44 {dimension_numbers = #tpu.dot_dimension_numbers<[1], [0], [0], [1], [0, 0, 1, 1], [], []>} : vector<176x800xbf16>, vector<800x64xbf16>, vector<176x64xf32> -> vector<176x64xf32>
    %c0_45 = arith.constant 0 : index
    %c0_46 = arith.constant 0 : index
    %50 = vector.load %arg5[%c0_45, %c0_46] : memref<1x64xf32, #tpu.memory_space<vmem>>, vector<1x64xf32>
    %51 = vector.broadcast %50 : vector<1x64xf32> to vector<176x64xf32>
    %52 = arith.addf %49, %51 : vector<176x64xf32>
    %53 = tpu.iota {dimensions = array<i32: 0>} : vector<40x64xi32>
    %c7_i32 = arith.constant 7 : i32
    %54 = vector.broadcast %c7_i32 : i32 to vector<40x64xi32>
    %55 = arith.andi %53, %54 : vector<40x64xi32>
    %c5_i32 = arith.constant 5 : i32
    %56 = vector.broadcast %c5_i32 : i32 to vector<40x64xi32>
    %57 = arith.cmpi slt, %55, %56 : vector<40x64xi32>
    %58 = vector.extract_strided_slice %52 {offsets = [0, 0], sizes = [160, 64], strides = [1, 1]} : vector<176x64xf32> to vector<160x64xf32>
    %59 = vector.shape_cast %58 : vector<160x64xf32> to vector<5x32x64xf32>
    %60 = vector.extract_strided_slice %59 {offsets = [0, 0, 0], sizes = [5, 16, 64], strides = [1, 1, 1]} : vector<5x32x64xf32> to vector<5x16x64xf32>
    %61 = vector.extract_strided_slice %59 {offsets = [0, 16, 0], sizes = [5, 16, 64], strides = [1, 1, 1]} : vector<5x32x64xf32> to vector<5x16x64xf32>
    %62 = arith.maximumf %60, %61 : vector<5x16x64xf32>
    %63 = vector.shape_cast %62 : vector<5x16x64xf32> to vector<80x64xf32>
    %c0_47 = arith.constant 0 : index
    %c0_48 = arith.constant 0 : index
    %64 = vector.load %arg13[%c0_47, %c0_48] : memref<80x64xf32, #tpu.memory_space<vmem>>, vector<80x64xf32>
    tpu.vector_store %arg13[%c0_47, %c0_48], %63 {strides = array<i32>} : memref<80x64xf32, #tpu.memory_space<vmem>>, vector<80x64xf32>,
    %c0_49 = arith.constant 0 : index
    %c0_50 = arith.constant 0 : index
    %65 = tpu.strided_load %arg13[%c0_49, %c0_50] {strides = array<i32: 2, 1>} : memref<80x64xf32, #tpu.memory_space<vmem>>, vector<40x64xf32>
    %c1_51 = arith.constant 1 : index
    %c0_52 = arith.constant 0 : index
    %66 = tpu.strided_load %arg13[%c1_51, %c0_52] {strides = array<i32: 2, 1>} : memref<80x64xf32, #tpu.memory_space<vmem>>, vector<40x64xf32>
    %67 = arith.maximumf %65, %66 : vector<40x64xf32>
    %cst_53 = arith.constant -3.40282347E+38 : f32
    %68 = vector.broadcast %cst_53 : f32 to vector<40x64xf32>
    %69 = arith.select %57, %67, %68 : vector<40x64xi1>, vector<40x64xf32>
    %cst_54 = arith.constant dense<0xFF800000> : vector<64xf32>
    %70 = vector.multi_reduction <maximumf>, %69, %cst_54 [0] : vector<40x64xf32> to vector<64xf32>
    %71 = vector.shape_cast %70 : vector<64xf32> to vector<1x64xf32>
    %c0_55 = arith.constant 0 : index
    %c0_56 = arith.constant 0 : index
    %72 = vector.load %arg6[%c0_55, %c0_56] : memref<64x32xf32, #tpu.memory_space<vmem>>, vector<64x32xf32>
    %cst_57 = arith.constant dense<0.000000e+00> : vector<1x32xf32>
    %73 = tpu.matmul %71, %72, %cst_57 {dimension_numbers = #tpu.dot_dimension_numbers<[1], [0], [0], [1], [0, 0, 1, 1], [], []>} : vector<1x64xf32>, vector<64x32xf32>, vector<1x32xf32> -> vector<1x32xf32>
    %c0_58 = arith.constant 0 : index
    %c0_59 = arith.constant 0 : index
    %74 = vector.load %arg7[%c0_58, %c0_59] : memref<1x32xf32, #tpu.memory_space<vmem>>, vector<1x32xf32>
    %75 = arith.addf %73, %74 : vector<1x32xf32>
    %cst_60 = arith.constant 0.000000e+00 : f32
    %76 = vector.broadcast %cst_60 : f32 to vector<1x32xf32>
    %77 = arith.maximumf %75, %76 : vector<1x32xf32>
    %c0_61 = arith.constant 0 : index
    %c0_62 = arith.constant 0 : index
    %78 = vector.load %arg8[%c0_61, %c0_62] : memref<32x1xf32, #tpu.memory_space<vmem>>, vector<32x1xf32>
    %cst_63 = arith.constant dense<0.000000e+00> : vector<1x1xf32>
    %79 = tpu.matmul %77, %78, %cst_63 {dimension_numbers = #tpu.dot_dimension_numbers<[1], [0], [0], [1], [0, 0, 1, 1], [], []>} : vector<1x32xf32>, vector<32x1xf32>, vector<1x1xf32> -> vector<1x1xf32>
    %c0_64 = arith.constant 0 : index
    %c0_65 = arith.constant 0 : index
    %80 = vector.load %arg9[%c0_64, %c0_65] : memref<1x1xf32, #tpu.memory_space<vmem>>, vector<1x1xf32>
    %81 = arith.addf %79, %80 : vector<1x1xf32>
    %82 = arith.negf %81 : vector<1x1xf32>
    %83 = math.exp %82 : vector<1x1xf32>
    %cst_66 = arith.constant 1.000000e+00 : f32
    %84 = vector.broadcast %cst_66 : f32 to vector<1x1xf32>
    %85 = arith.addf %84, %83 : vector<1x1xf32>
    %86 = arith.divf %84, %85 : vector<1x1xf32>
    %87 = vector.shape_cast %86 : vector<1x1xf32> to vector<1x1x1xf32>
    %c0_67 = arith.constant 0 : index
    %c0_68 = arith.constant 0 : index
    %c0_69 = arith.constant 0 : index
    %88 = vector.load %arg10[%c0_67, %c0_68, %c0_69] : memref<1x1x1xf32, #tpu.memory_space<vmem>>, vector<1x1x1xf32>
    tpu.vector_store %arg10[%c0_67, %c0_68, %c0_69], %87 {strides = array<i32>} : memref<1x1x1xf32, #tpu.memory_space<vmem>>, vector<1x1x1xf32>,
    return
  }
  func.func @transform_0(%arg0: i32) -> (i32, i32, i32) {
    %c0_i32 = arith.constant 0 : i32
    %c0_i32_0 = arith.constant 0 : i32
    %c0_i32_1 = arith.constant 0 : i32
    return %arg0, %c0_i32, %c0_i32_0 : i32, i32, i32
  }
  func.func @transform_1(%arg0: i32) -> (i32, i32) {
    %c0_i32 = arith.constant 0 : i32
    %c0_i32_0 = arith.constant 0 : i32
    %c0_i32_1 = arith.constant 0 : i32
    return %c0_i32, %c0_i32_0 : i32, i32
  }
  func.func @transform_2(%arg0: i32) -> (i32, i32) {
    %c0_i32 = arith.constant 0 : i32
    %c0_i32_0 = arith.constant 0 : i32
    %c0_i32_1 = arith.constant 0 : i32
    return %c0_i32, %c0_i32_0 : i32, i32
  }
  func.func @transform_3(%arg0: i32) -> (i32, i32) {
    %c0_i32 = arith.constant 0 : i32
    %c0_i32_0 = arith.constant 0 : i32
    %c0_i32_1 = arith.constant 0 : i32
    return %c0_i32, %c0_i32_0 : i32, i32
  }
  func.func @transform_4(%arg0: i32) -> (i32, i32) {
    %c0_i32 = arith.constant 0 : i32
    %c0_i32_0 = arith.constant 0 : i32
    %c0_i32_1 = arith.constant 0 : i32
    return %c0_i32, %c0_i32_0 : i32, i32
  }
  func.func @transform_5(%arg0: i32) -> (i32, i32) {
    %c0_i32 = arith.constant 0 : i32
    %c0_i32_0 = arith.constant 0 : i32
    %c0_i32_1 = arith.constant 0 : i32
    return %c0_i32, %c0_i32_0 : i32, i32
  }
  func.func @transform_6(%arg0: i32) -> (i32, i32) {
    %c0_i32 = arith.constant 0 : i32
    %c0_i32_0 = arith.constant 0 : i32
    %c0_i32_1 = arith.constant 0 : i32
    return %c0_i32, %c0_i32_0 : i32, i32
  }
  func.func @transform_7(%arg0: i32) -> (i32, i32) {
    %c0_i32 = arith.constant 0 : i32
    %c0_i32_0 = arith.constant 0 : i32
    %c0_i32_1 = arith.constant 0 : i32
    return %c0_i32, %c0_i32_0 : i32, i32
  }
  func.func @transform_8(%arg0: i32) -> (i32, i32) {
    %c0_i32 = arith.constant 0 : i32
    %c0_i32_0 = arith.constant 0 : i32
    %c0_i32_1 = arith.constant 0 : i32
    return %c0_i32, %c0_i32_0 : i32, i32
  }
  func.func @transform_9(%arg0: i32) -> (i32, i32, i32) {
    %c0_i32 = arith.constant 0 : i32
    %c0_i32_0 = arith.constant 0 : i32
    %c0_i32_1 = arith.constant 0 : i32
    return %arg0, %c0_i32, %c0_i32_0 : i32, i32, i32
  }
}

</mosaic_0001>

<bundles_post_ra>
// kernel: net_forward.1
= control target key start
LH: loop header
LB: loop body
LE: loop exit
PB: predicated region body
PF: predicated region fallthrough
CT: control target
= control target key end

     0   :  { %s5485_s11 = smov 0   ;;  %s7921_s0 = inlined_call_operand.vmem [shape: bf16[2,960,32], index: 0, kind: input, shape index: {}]   ;;  %s7922_s1 = inlined_call_operand.vmem [shape: bf16[32,32], index: 1, kind: input, shape index: {}]   ;;  %s7923_s2 = inlined_call_operand.vmem [shape: f32[1,32], index: 2, kind: input, shape index: {}]   ;;  %s7924_s3 = inlined_call_operand.vmem [shape: bf16[800,64], index: 3, kind: input, shape index: {}]   ;;  %s7925_s4 = inlined_call_operand.vmem [shape: f32[1,64], index: 4, kind: input, shape index: {}]   ;;  %s7926_s5 = inlined_call_operand.vmem [shape: f32[64,32], index: 5, kind: input, shape index: {}]   ;;  %s7927_s6 = inlined_call_operand.vmem [shape: f32[1,32], index: 6, kind: input, shape index: {}]   ;;  %s7928_s7 = inlined_call_operand.vmem [shape: f32[32,1], index: 7, kind: input, shape index: {}]   ;;  %s7929_s8 = inlined_call_operand.<no memory space> [shape: f32[1,1], index: 8, kind: input, shape index: {}]   ;;  %s7930_s9 = inlined_call_operand.vmem [shape: f32[2,1,1], index: 9, kind: output, shape index: {}]  }
   0x1   :  { %v14_v0 = vstv %s7929_s8 }
   0x2   :  { %15 = vst [vmem:[#allocation5] sm:$0x1] %v14_v0 }
   0x3 LB: > { %s4518_s12 = sadd.s32 4294967295, %s5423_s11   ;;  %p4522_p0 = scmp.ge.s32.totalorder %s5423_s11, 1  ;;  %s5423_s11 = sphi %s5485_s11, %s21_s11  }
   0x4   : > { %p289_p1 = scmp.lt.s32.totalorder %s5423_s11, 3 }
   0x6   : > { %p290_p2 = pnand %p4522_p0, %p289_p1 }
   0x8   : > { %293 = sbr.rel (%p290_p2) target bundleno = 1482 (0x5ca), region = 56 }
   0xf   : > { %v5285_v1 = vld [vmem:[%s7922_s1] sm:$0xff]   ;;  %p323_p3 = scmp.lt.s32.totalorder %s4518_s12, 1  ;;  %v5286_v2 = vld [vmem:[%s7922_s1 + $0x8] sm:$0xff]   ;;  %vm775_vm0 = vcmask 261120   ;;  %vm5426_vm1 = vmmov 0   ;;  %vm1931_vm2 = vcmask 1046528  }
  0x10   : > { %5049 = vmatprep.subr.bf16.mxu0 %v5285_v1  ;;  %v5623_v0 = vld [vmem:[%s7923_s2] ss:$0 sm:$0xff]  ;;  %s5427_s18 = smov 32   ;;  %vm1804_vm3 = vsmask.f32 7424  ;;  %s5428_s23 = smov 64  }
  0x11   : > { %s8113_s12 = smov (!%p323_p3, %s4518_s12), 1  ;;  %5050 = vmatpush3.bf16.msra.mxu0 %v5285_v1  ;;  %vm1977_vm4 = vsmask.f32 6400  ;;  %s5429_s30 = smov 96   ;;  %vm2059_vm5 = vcmask 1045504   ;;  %vm2408_vm7 = vcmask 523264  }
  0x12   : > { %5051 = vmatprep.subr.bf16.mxu0 %v5286_v2  ;;  %s5269_s16 = smul.u32 480, %s8113_s12  ;;  %vm2818_vm6 = vsmask.f32 256  ;;  %vm2431_vm8 = vcmask 785408   ;;  %vm4469_vm14 = vcmask 0  }
  0x14   : > { %s5505_s19 = scalar_lea.vmem %s7921_s0, %s5269_s16 }
  0x15   : > { %5052 = vmatpush3.bf16.msra.mxu0 %v5286_v2  ;;  %v5287_v3 = vld [vmem:[%s5505_s19] sm:$0xff]   ;;  %v5288_v4 = vld [vmem:[%s5505_s19 + $0x8] sm:$0xff]   ;;  %v5289_v5 = vld [vmem:[%s5505_s19 + $0x10] sm:$0xff]  }
  0x16   : > { %5053 = vmatprep.mubr.msk.bf16.mxu0 %vm775_vm0, %v5287_v3  ;;  %v5290_v6 = vld [vmem:[%s5505_s19 + $0x18] sm:$0xff]   ;;  %v5291_v7 = vld [vmem:[%s5505_s19 + $0x20] sm:$0xff]   ;;  %v5292_v8 = vld [vmem:[%s5505_s19 + $0x28] sm:$0xff]  }
  0x17   : > { %v5293_v9 = vld [vmem:[%s5505_s19 + $0x30] sm:$0xff]   ;;  %v5294_v10 = vld [vmem:[%s5505_s19 + $0x38] sm:$0xff]   ;;  %v5295_v11 = vld [vmem:[%s5505_s19 + $0x40] sm:$0xff]  }
  0x18   : > { %5054 = vmatmul.mubr.msk.bf16.vlgmr.msra.gmra.mrb[0].mxu0 %vm775_vm0, %v5288_v4  ;;  %v5296_v12 = vld [vmem:[%s5505_s19 + $0x48] sm:$0xff]   ;;  %v5297_v13 = vld [vmem:[%s5505_s19 + $0x50] sm:$0xff]   ;;  %v5298_v14 = vld [vmem:[%s5505_s19 + $0x58] sm:$0xff]  }
  0x19   : > { %5057 = vmatprep.mubr.msk.bf16.mxu0 %vm775_vm0, %v5289_v5  ;;  %v5299_v15 = vld [vmem:[%s5505_s19 + $0x60] sm:$0xff]   ;;  %v5300_v16 = vld [vmem:[%s5505_s19 + $0x68] sm:$0xff]   ;;  %v5301_v17 = vld [vmem:[%s5505_s19 + $0x70] sm:$0xff]  }
  0x1a   : > { %v5302_v18 = vld [vmem:[%s5505_s19 + $0x78] sm:$0xff]   ;;  %v5303_v19 = vld [vmem:[%s5505_s19 + $0x80] sm:$0xff]   ;;  %v5304_v20 = vld [vmem:[%s5505_s19 + $0x88] sm:$0xff]  }
  0x1b   : > { %v5305_v21 = vld [vmem:[%s5505_s19 + $0x90] sm:$0xff]   ;;  %v5306_v22 = vld [vmem:[%s5505_s19 + $0x98] sm:$0xff]   ;;  %v5307_v23 = vld [vmem:[%s5505_s19 + $0xa0] sm:$0xff]  }
  0x1c   : > { %v5308_v24 = vld [vmem:[%s5505_s19 + $0xa8] sm:$0xff]   ;;  %v5309_v25 = vld [vmem:[%s5505_s19 + $0xb0] sm:$0xff]   ;;  %v5310_v26 = vld [vmem:[%s5505_s19 + $0xb8] sm:$0xff]  }
  0x1d   : > { %v5311_v27 = vld [vmem:[%s5505_s19 + $0xc0] sm:$0xff]   ;;  %v5312_v28 = vld [vmem:[%s5505_s19 + $0xc8] sm:$0xff]   ;;  %v5313_v29 = vld [vmem:[%s5505_s19 + $0xd0] sm:$0xff]  }
  0x1e   : > { %v5314_v30 = vld [vmem:[%s5505_s19 + $0xd8] sm:$0xff]   ;;  %v5315_v31 = vld [vmem:[%s5505_s19 + $0xe0] sm:$0xff]   ;;  %v5316_v32 = vld [vmem:[%s5505_s19 + $0xe8] sm:$0xff]  }
  0x1f   : > { %v5317_v33 = vld [vmem:[%s5505_s19 + $0xf0] sm:$0xff]   ;;  %v5318_v34 = vld [vmem:[%s5505_s19 + $0xf8] sm:$0xff]   ;;  %v5319_v35 = vld [vmem:[%s5505_s19 + $0x100] sm:$0xff]  }
  0x20   : > { %5058 = vmatmul.mubr.msk.bf16.gmra.mrb[4].mxu0 %vm775_vm0, %v5290_v6  ;;  %v5320_v36 = vld [vmem:[%s5505_s19 + $0x108] sm:$0xff]   ;;  %v5321_v37 = vld [vmem:[%s5505_s19 + $0x110] sm:$0xff]   ;;  %v5322_v38 = vld [vmem:[%s5505_s19 + $0x118] sm:$0xff]  }
  0x21   : > { %5061 = vmatprep.mubr.msk.bf16.mxu0 %vm775_vm0, %v5291_v7  ;;  %v5323_v39 = vld [vmem:[%s5505_s19 + $0x120] sm:$0xff]   ;;  %v5324_v40 = vld [vmem:[%s5505_s19 + $0x128] sm:$0xff]   ;;  %v5325_v41 = vld [vmem:[%s5505_s19 + $0x130] sm:$0xff]  }
  0x22   : > { %v5326_v42 = vld [vmem:[%s5505_s19 + $0x138] sm:$0xff]   ;;  %v5327_v43 = vld [vmem:[%s5505_s19 + $0x140] sm:$0xff]   ;;  %v5328_v44 = vld [vmem:[%s5505_s19 + $0x148] sm:$0xff]  }
  0x23   : > { %v5329_v45 = vld [vmem:[%s5505_s19 + $0x150] sm:$0xff]   ;;  %v5330_v46 = vld [vmem:[%s5505_s19 + $0x158] sm:$0xff]   ;;  %v5331_v47 = vld [vmem:[%s5505_s19 + $0x160] sm:$0xff]  }
  0x24   : > { %v5332_v48 = vld [vmem:[%s5505_s19 + $0x168] sm:$0xff]   ;;  %v5333_v49 = vld [vmem:[%s5505_s19 + $0x170] sm:$0xff]   ;;  %v5334_v50 = vld [vmem:[%s5505_s19 + $0x178] sm:$0xff]  }
  0x25   : > { %v5335_v51 = vld [vmem:[%s5505_s19 + $0x180] sm:$0xff]   ;;  %v5336_v52 = vld [vmem:[%s5505_s19 + $0x188] sm:$0xff]   ;;  %v5337_v53 = vld [vmem:[%s5505_s19 + $0x190] sm:$0xff]  }
  0x26   : > { %v5338_v54 = vld [vmem:[%s5505_s19 + $0x198] sm:$0xff]   ;;  %v5339_v55 = vld [vmem:[%s5505_s19 + $0x1a0] sm:$0xff]   ;;  %v5340_v56 = vld [vmem:[%s5505_s19 + $0x1a8] sm:$0xff]  }
  0x27   : > { %v5341_v57 = vld [vmem:[%s5505_s19 + $0x1b0] sm:$0xff]   ;;  %v5342_v60 = vld [vmem:[%s5505_s19 + $0x1b8] sm:$0xff]   ;;  %v5343_v62 = vld [vmem:[%s5505_s19 + $0x1c0] sm:$0xff]  }
  0x28   : > { %5062 = vmatmul.mubr.msk.bf16.gmra.mrb[8].mxu0 %vm775_vm0, %v5292_v8  ;;  %v5344_v5 = vld [vmem:[%s5505_s19 + $0x1c8] sm:$0xff]  }
  0x29   : > { %5065 = vmatprep.mubr.msk.bf16.mxu0 %vm775_vm0, %v5293_v9  ;;  %v5345_v9 = vld [vmem:[%s5505_s19 + $0x1d0] sm:$0xff]  }
  0x30   : > { %5066 = vmatmul.mubr.msk.bf16.gmra.mrb[12].mxu0 %vm775_vm0, %v5294_v10  ;;  %v5347_v10 = vld [vmem:[%s7924_s3 + $0x180] sm:$0xff]  }
  0x31   : > { %5069 = vmatprep.mubr.msk.bf16.mxu0 %vm775_vm0, %v5295_v11 }
  0x38   : > { %5070 = vmatmul.mubr.msk.bf16.gmra.mrb[16].mxu0 %vm775_vm0, %v5296_v12 }
  0x39   : > { %5073 = vmatprep.mubr.msk.bf16.mxu0 %vm775_vm0, %v5297_v13 }
  0x40   : > { %5074 = vmatmul.mubr.msk.bf16.gmra.mrb[20].mxu0 %vm775_vm0, %v5298_v14 }
  0x41   : > { %5077 = vmatprep.mubr.msk.bf16.mxu0 %vm775_vm0, %v5299_v15  ;;  %v7932_v15 = vmov 0.0  }
  0x42   : > { %5173 = vmatprep.subr.bf16.mxu0 %v7932_v15 }
  0x43   : > { %5174 = vmatpush3.bf16.msra.mxu0 %v5347_v10 }
  0x44   : > { %5175 = vmatprep.subr.bf16.mxu0 %v7932_v15 }
  0x48   : > { %5078 = vmatmul.mubr.msk.bf16.gmra.mrb[24].mxu0 %vm775_vm0, %v5300_v16 }
  0x49   : > { %5081 = vmatprep.mubr.msk.bf16.mxu0 %vm775_vm0, %v5301_v17 }
  0x50   : > { %5082 = vmatmul.mubr.msk.bf16.gmra.mrb[28].mxu0 %vm775_vm0, %v5302_v18 }
  0x51   : > { %5085 = vmatprep.mubr.msk.bf16.mxu0 %vm775_vm0, %v5303_v19 }
  0x58   : > { %5086 = vmatmul.mubr.msk.bf16.gmra.mrb[32].mxu0 %vm775_vm0, %v5304_v20 }
  0x59   : > { %5089 = vmatprep.mubr.msk.bf16.mxu0 %vm775_vm0, %v5305_v21  ;;  %v5348_v21 = vld [vmem:[%s7924_s3 + $0x188] sm:$0xff]  }
  0x5a   : > { %5176 = vmatpush3.bf16.msra.mxu0 %v5348_v21 }
  0x60   : > { %5090 = vmatmul.mubr.msk.bf16.gmra.mrb[36].mxu0 %vm775_vm0, %v5306_v22 }
  0x61   : > { %5093 = vmatprep.mubr.msk.bf16.mxu0 %vm775_vm0, %v5307_v23 }
  0x68   : > { %5094 = vmatmul.mubr.msk.bf16.gmra.mrb[40].mxu0 %vm775_vm0, %v5308_v24  ;;  %v5346_v24 = vld [vmem:[%s5505_s19 + $0x1d8] sm:$0xff]  }
  0x69   : > { %5097 = vmatprep.mubr.msk.bf16.mxu0 %vm775_vm0, %v5309_v25 }
  0x70   : > { %5098 = vmatmul.mubr.msk.bf16.gmra.mrb[44].mxu0 %vm775_vm0, %v5310_v26 }
  0x71   : > { %5101 = vmatprep.mubr.msk.bf16.mxu0 %vm775_vm0, %v5311_v27 }
  0x78   : > { %5102 = vmatmul.mubr.msk.bf16.gmra.mrb[48].mxu0 %vm775_vm0, %v5312_v28 }
  0x79   : > { %5105 = vmatprep.mubr.msk.bf16.mxu0 %vm775_vm0, %v5313_v29 }
  0x80   : > { %5106 = vmatmul.mubr.msk.bf16.gmra.mrb[52].mxu0 %vm775_vm0, %v5314_v30 }
  0x81   : > { %5109 = vmatprep.mubr.msk.bf16.mxu0 %vm775_vm0, %v5315_v31 }
  0x88   : > { %5110 = vmatmul.mubr.msk.bf16.gmra.mrb[56].mxu0 %vm775_vm0, %v5316_v32 }
  0x89   : > { %5113 = vmatprep.mubr.msk.bf16.mxu0 %vm775_vm0, %v5317_v33 }
  0x90   : > { %5114 = vmatmul.mubr.msk.bf16.gmra.mrb[60].mxu0 %vm775_vm0, %v5318_v34 }
  0x91   : > { %5117 = vmatprep.mubr.msk.bf16.mxu0 %vm775_vm0, %v5319_v35 }
  0x98   : > { %5118 = vmatmul.mubr.msk.bf16.gmra.mrb[64].mxu0 %vm775_vm0, %v5320_v36 }
  0x99   : > { %5121 = vmatprep.mubr.msk.bf16.mxu0 %vm775_vm0, %v5321_v37 }
  0xa0   : > { %5122 = vmatmul.mubr.msk.bf16.gmra.mrb[68].mxu0 %vm775_vm0, %v5322_v38 }
  0xa1   : > { %5125 = vmatprep.mubr.msk.bf16.mxu0 %vm775_vm0, %v5323_v39 }
  0xa8   : > { %5126 = vmatmul.mubr.msk.bf16.gmra.mrb[72].mxu0 %vm775_vm0, %v5324_v40 }
  0xa9   : > { %5129 = vmatprep.mubr.msk.bf16.mxu0 %vm775_vm0, %v5325_v41 }
  0xb0   : > { %5130 = vmatmul.mubr.msk.bf16.gmra.mrb[76].mxu0 %vm775_vm0, %v5326_v42 }
  0xb1   : > { %5133 = vmatprep.mubr.msk.bf16.mxu0 %vm775_vm0, %v5327_v43 }
  0xb8   : > { %5134 = vmatmul.mubr.msk.bf16.gmra.mrb[80].mxu0 %vm775_vm0, %v5328_v44 }
  0xb9   : > { %5137 = vmatprep.mubr.msk.bf16.mxu0 %vm775_vm0, %v5329_v45 }
  0xc0   : > { %5138 = vmatmul.mubr.msk.bf16.gmra.mrb[84].mxu0 %vm775_vm0, %v5330_v46 }
  0xc1   : > { %5141 = vmatprep.mubr.msk.bf16.mxu0 %vm775_vm0, %v5331_v47 }
  0xc8   : > { %5142 = vmatmul.mubr.msk.bf16.gmra.mrb[88].mxu0 %vm775_vm0, %v5332_v48 }
  0xc9   : > { %5145 = vmatprep.mubr.msk.bf16.mxu0 %vm775_vm0, %v5333_v49 }
  0xd0   : > { %5146 = vmatmul.mubr.msk.bf16.gmra.mrb[92].mxu0 %vm775_vm0, %v5334_v50 }
  0xd1   : > { %5149 = vmatprep.mubr.msk.bf16.mxu0 %vm775_vm0, %v5335_v51 }
  0xd8   : > { %5150 = vmatmul.mubr.msk.bf16.gmra.mrb[96].mxu0 %vm775_vm0, %v5336_v52 }
  0xd9   : > { %5153 = vmatprep.mubr.msk.bf16.mxu0 %vm775_vm0, %v5337_v53 }
  0xe0   : > { %5154 = vmatmul.mubr.msk.bf16.gmra.mrb[100].mxu0 %vm775_vm0, %v5338_v54 }
  0xe1   : > { %5157 = vmatprep.mubr.msk.bf16.mxu0 %vm775_vm0, %v5339_v55 }
  0xe8   : > { %5158 = vmatmul.mubr.msk.bf16.gmra.mrb[104].mxu0 %vm775_vm0, %v5340_v56 }
  0xe9   : > { %5161 = vmatprep.mubr.msk.bf16.mxu0 %vm775_vm0, %v5341_v57 }
  0xeb   : > { %v5055_v58 = vpop.f32.mrb[0].mxu0 }
  0xec   : > { %v990_v59 = vpop.f32.mrb[1].mxu0  ;;  %v999_v2 = vadd.f32 %v5055_v58, %v5623_v0 }
  0xed   : > { %v5056_v61 = vpop.f32.mrb[2].mxu0  ;;  %v991_v6 = vadd.f32 %v5623_v0, %v990_v59 }
  0xee   : > { %v993_v63 = vpop.f32.mrb[3].mxu0  ;;  %v1002_v11 = vadd.f32 %v5056_v61, %v5623_v0  ;;  %v5349_v61 = vld [vmem:[%s7924_s3 + $0x40] sm:$0xff]  }
  0xef   : > { %v994_v16 = vadd.f32 %v5623_v0, %v993_v63  ;;  %4776 = vmatprep.subr.bf16.mxu1 %v5349_v61 }
  0xf0   : > { %5162 = vmatmul.mubr.msk.bf16.gmra.mrb[108].mxu0 %vm775_vm0, %v5342_v60 }
  0xf1   : > { %5165 = vmatprep.mubr.msk.bf16.mxu0 %vm775_vm0, %v5343_v62  ;;  %v5350_v62 = vld [vmem:[%s7924_s3] sm:$0xff]  }
  0xf2   : > { %4777 = vmatpush3.bf16.msra.mxu1 %v5350_v62 }
  0xf3   : > { %v5059_v1 = vpop.f32.mrb[4].mxu0 }
  0xf4   : > { %v1015_v3 = vadd.f32 %v5059_v1, %v5623_v0  ;;  %v1006_v4 = vpop.f32.mrb[5].mxu0 }
  0xf5   : > { %v1007_v7 = vadd.f32 %v5623_v0, %v1006_v4  ;;  %v5060_v8 = vpop.f32.mrb[6].mxu0 }
  0xf6   : > { %v1471_v12 = vmax.f32 %v999_v2, %v1015_v3  ;;  %v1018_v13 = vadd.f32 %v5060_v8, %v5623_v0  ;;  %v1009_v14 = vpop.f32.mrb[7].mxu0 }
  0xf7   : > { %v1469_v17 = vmax.f32 %v991_v6, %v1007_v7  ;;  %v1010_v18 = vadd.f32 %v5623_v0, %v1009_v14 }
  0xf8   : > { %1531 = vst.msk [vmem:[#allocation2 + $0x10] sm:$0xff] %vm775_vm0, %v1471_v12  ;;  %v1472_v19 = vmax.f32 %v1002_v11, %v1018_v13  ;;  %5166 = vmatmul.mubr.msk.bf16.gmra.mrb[112].mxu0 %vm775_vm0, %v5344_v5  ;;  %v5351_v12 = vld [vmem:[%s7924_s3 + $0x48] sm:$0xff]  }
  0xf9   : > { %1529 = vst.msk [vmem:[#allocation2] sm:$0xff] %vm775_vm0, %v1469_v17  ;;  %v1470_v20 = vmax.f32 %v994_v16, %v1010_v18  ;;  %5169 = vmatprep.mubr.msk.bf16.mxu0 %vm775_vm0, %v5345_v9  ;;  %v5352_v17 = vld [vmem:[%s7924_s3 + $0x8] sm:$0xff]   ;;  %4778 = vmatprep.subr.bf16.mxu1 %v5351_v12 }
  0xfa   : > { %1532 = vst.msk [vmem:[#allocation2 + $0x18] sm:$0xff] %vm775_vm0, %v1472_v19  ;;  %4779 = vmatpush3.bf16.msra.mxu1 %v5352_v17 }
  0xfb   : > { %1530 = vst.msk [vmem:[#allocation2 + $0x8] sm:$0xff] %vm775_vm0, %v1470_v20  ;;  %v5063_v22 = vpop.f32.mrb[8].mxu0 }
  0xfc   : > { %v1022_v23 = vpop.f32.mrb[9].mxu0  ;;  %v1031_v34 = vadd.f32 %v5063_v22, %v5623_v0  ;;  %v5353_v22 = vld [vmem:[%s7924_s3 + $0x50] sm:$0xff]  }
  0xfd   : > { %v5064_v25 = vpop.f32.mrb[10].mxu0  ;;  %v1023_v38 = vadd.f32 %v5623_v0, %v1022_v23  ;;  %4780 = vmatprep.subr.bf16.mxu1 %v5353_v22 }
  0xfe   : > { %v1025_v26 = vpop.f32.mrb[11].mxu0  ;;  %v1034_v41 = vadd.f32 %v5064_v25, %v5623_v0 }
  0xff   : > { %v1026_v45 = vadd.f32 %v5623_v0, %v1025_v26 }
 0x100   : > { %5170 = vmatmul.mubr.msk.bf16.gmra.mrb[116].mxu0 %vm775_vm0, %v5346_v24  ;;  %v5354_v24 = vld [vmem:[%s7924_s3 + $0x10] sm:$0xff]  }
 0x101   : > { %v1591_v27 = vld [vmem:[#allocation2 + $0x10] ss:$2 sm:$0xff]  ;;  %v1651_v28 = vld [vmem:[#allocation2 + $0x11] ss:$2 sm:$0xff]  ;;  %5177 = vmatprep.mubr.msk.bf16.mxu0 %vm5426_vm1, %v7932_v15  ;;  %4781 = vmatpush3.bf16.msra.mxu1 %v5354_v24 }
 0x102   : > { %v1709_v29 = vmax.f32 %v1591_v27, %v1651_v28  ;;  %v1589_v30 = vld [vmem:[#allocation2] ss:$2 sm:$0xff]  ;;  %v1649_v31 = vld [vmem:[#allocation2 + $0x1] ss:$2 sm:$0xff] }
 0x103   : > { %v1708_v32 = vmax.f32 %v1589_v30, %v1649_v31  ;;  %v5067_v33 = vpop.f32.mrb[12].mxu0 }
 0x104   : > { %v1047_v35 = vadd.f32 %v5067_v33, %v5623_v0  ;;  %v1038_v36 = vpop.f32.mrb[13].mxu0 }
 0x105   : > { %v1738_v37 = vpack.c.bf16 %v1709_v29, %v1708_v32  ;;  %v1039_v39 = vadd.f32 %v5623_v0, %v1038_v36  ;;  %v5068_v40 = vpop.f32.mrb[14].mxu0 }
 0x106   : > { %v1475_v42 = vmax.f32 %v1031_v34, %v1047_v35  ;;  %v1050_v43 = vadd.f32 %v5068_v40, %v5623_v0  ;;  %v1041_v44 = vpop.f32.mrb[15].mxu0 }
 0x107   : > { %1753 = vst.msk [vmem:[#allocation3] sm:$0xff] %vm775_vm0, %v1738_v37  ;;  %v1473_v46 = vmax.f32 %v1023_v38, %v1039_v39  ;;  %v1042_v47 = vadd.f32 %v5623_v0, %v1041_v44  ;;  %v5355_v37 = vld [vmem:[%s7924_s3 + $0x58] sm:$0xff]  }
 0x108   : > { %1535 = vst.msk [vmem:[#allocation2 + $0x30] sm:$0xff] %vm775_vm0, %v1475_v42  ;;  %v1476_v48 = vmax.f32 %v1034_v41, %v1050_v43  ;;  %v5356_v38 = vld [vmem:[%s7924_s3 + $0x18] sm:$0xff]   ;;  %4782 = vmatprep.subr.bf16.mxu1 %v5355_v37 }
 0x109   : > { %1533 = vst.msk [vmem:[#allocation2 + $0x20] sm:$0xff] %vm775_vm0, %v1473_v46  ;;  %v1474_v49 = vmax.f32 %v1026_v45, %v1042_v47  ;;  %4783 = vmatpush3.bf16.msra.mxu1 %v5356_v38 }
 0x10a   : > { %1536 = vst.msk [vmem:[#allocation2 + $0x38] sm:$0xff] %vm775_vm0, %v1476_v48 }
 0x10b   : > { %1534 = vst.msk [vmem:[#allocation2 + $0x28] sm:$0xff] %vm775_vm0, %v1474_v49  ;;  %v5071_v50 = vpop.f32.mrb[16].mxu0 }
 0x10c   : > { %v1054_v51 = vpop.f32.mrb[17].mxu0  ;;  %v1063_v63 = vadd.f32 %v5071_v50, %v5623_v0 }
 0x10d   : > { %v5072_v52 = vpop.f32.mrb[18].mxu0  ;;  %v1055_v4 = vadd.f32 %v5623_v0, %v1054_v51 }
 0x10e   : > { %v1057_v53 = vpop.f32.mrb[19].mxu0  ;;  %v1066_v7 = vadd.f32 %v5072_v52, %v5623_v0  ;;  %v1769_v11 = vld [vmem:[#allocation3] sm:$0xff] }
 0x10f   : > { %v1058_v13 = vadd.f32 %v5623_v0, %v1057_v53  ;;  %v1781_v20 = vld [vmem:[#allocation3] sm:$0xfe]  ;;  %v1808_v21 = vshll.u32 %v1769_v11, 16  ;;  %v1806_v34 = vshrl.u32 %v1769_v11, 16  ;;  %v5360_v11 = vld [vmem:[%s7924_s3 + $0x28] sm:$0xff]  }
 0x110   : > { %v1979_v26 = vshrl.u32 %v1781_v20, 16  ;;  %v1982_v27 = vshll.u32 %v1781_v20, 16  ;;  %v1932_v32 = vrot.slane %v1781_v20, 1 }
 0x111   : > { %v1595_v54 = vld [vmem:[#allocation2 + $0x30] ss:$2 sm:$0xff]  ;;  %v1655_v55 = vld [vmem:[#allocation2 + $0x31] ss:$2 sm:$0xff]  ;;  %v1810_v29 = vrot.slane %v1808_v21, 1 }
 0x112   : > { %v1711_v56 = vmax.f32 %v1595_v54, %v1655_v55  ;;  %v1593_v57 = vld [vmem:[#allocation2 + $0x20] ss:$2 sm:$0xff]  ;;  %v1653_v58 = vld [vmem:[#allocation2 + $0x21] ss:$2 sm:$0xff]  ;;  %v1981_v39 = vrot.slane %v1979_v26, 1  ;;  %v1984_v40 = vrot.slane %v1982_v27, 2 }
 0x113   : > { %v1710_v59 = vmax.f32 %v1593_v57, %v1653_v58  ;;  %v5075_v60 = vpop.f32.mrb[20].mxu0  ;;  %v1811_v44 = vor.u32 %v1810_v29, %v1806_v34  ;;  %v5357_v54 = vld [vmem:[%s7924_s3 + $0x60] sm:$0xff]   ;;  %v5364_v29 = vld [vmem:[%s7924_s3 + $0x38] sm:$0xff]  }
 0x114   : > { %v1079_v1 = vadd.f32 %v5075_v60, %v5623_v0  ;;  %v1070_v2 = vpop.f32.mrb[21].mxu0  ;;  %v5358_v55 = vld [vmem:[%s7924_s3 + $0x20] sm:$0xff]   ;;  %4784 = vmatprep.subr.bf16.mxu1 %v5357_v54 }
 0x115   : > { %v1739_v3 = vpack.c.bf16 %v1711_v56, %v1710_v59  ;;  %v1071_v5 = vadd.f32 %v5623_v0, %v1070_v2  ;;  %v5076_v6 = vpop.f32.mrb[22].mxu0  ;;  %v1985_v59 = vor.u32 %v1984_v40, %v1981_v39  ;;  %4785 = vmatpush3.bf16.msra.mxu1 %v5358_v55 }
 0x116   : > { %v1479_v8 = vmax.f32 %v1063_v63, %v1079_v1  ;;  %v1082_v9 = vadd.f32 %v5076_v6, %v5623_v0  ;;  %v1073_v10 = vpop.f32.mrb[23].mxu0 }
 0x117   : > { %1754 = vst.msk [vmem:[#allocation3 + $0x8] sm:$0xff] %vm775_vm0, %v1739_v3  ;;  %v1477_v14 = vmax.f32 %v1055_v4, %v1071_v5  ;;  %v1074_v16 = vadd.f32 %v5623_v0, %v1073_v10 }
 0x118   : > { %1539 = vst.msk [vmem:[#allocation2 + $0x50] sm:$0xff] %vm775_vm0, %v1479_v8  ;;  %v1480_v18 = vmax.f32 %v1066_v7, %v1082_v9  ;;  %v5359_v7 = vld [vmem:[%s7924_s3 + $0x68] sm:$0xff]  }
 0x119   : > { %1537 = vst.msk [vmem:[#allocation2 + $0x40] sm:$0xff] %vm775_vm0, %v1477_v14  ;;  %v1478_v19 = vmax.f32 %v1058_v13, %v1074_v16  ;;  %4786 = vmatprep.subr.bf16.mxu1 %v5359_v7  ;;  %v5361_v16 = vld [vmem:[%s7924_s3 + $0x70] sm:$0xff]  }
 0x11a   : > { %1540 = vst.msk [vmem:[#allocation2 + $0x58] sm:$0xff] %vm775_vm0, %v1480_v18  ;;  %4787 = vmatpush3.bf16.msra.mxu1 %v5360_v11  ;;  %v5362_v18 = vld [vmem:[%s7924_s3 + $0x30] sm:$0xff]  }
 0x11b   : > { %1538 = vst.msk [vmem:[#allocation2 + $0x48] sm:$0xff] %vm775_vm0, %v1478_v19  ;;  %v5079_v23 = vpop.f32.mrb[24].mxu0  ;;  %4788 = vmatprep.subr.bf16.mxu1 %v5361_v16 }
 0x11c   : > { %v1086_v25 = vpop.f32.mrb[25].mxu0  ;;  %v1095_v56 = vadd.f32 %v5079_v23, %v5623_v0 }
 0x11d   : > { %v5080_v28 = vpop.f32.mrb[26].mxu0  ;;  %v1087_v62 = vadd.f32 %v5623_v0, %v1086_v25 }
 0x11e   : > { %v1089_v30 = vpop.f32.mrb[27].mxu0  ;;  %v5698_v31 = vld [vmem:[#allocation3 + $0x8] sm:$0xff]  ;;  %v1098_v2 = vadd.f32 %v5080_v28, %v5623_v0  ;;  %4789 = vmatpush3.bf16.msra.mxu1 %v5362_v18  ;;  %v5363_v28 = vld [vmem:[%s7924_s3 + $0x78] sm:$0xff]  }
 0x11f   : > { %2084 = vrot.lane.b32.xlu0 %v5698_v31, %s5427_s18  ;;  %v1933_v33 = vrot.slane %v5698_v31, 1  ;;  %v1813_v35 = vshll.u32 %v5698_v31, 16  ;;  %v1817_v36 = vshrl.u32 %v5698_v31, 16  ;;  %v1090_v8 = vadd.f32 %v5623_v0, %v1089_v30  ;;  %v1786_v14 = vld [vmem:[#allocation3 + $0x8] sm:$0xfe]  ;;  %4790 = vmatprep.subr.bf16.mxu1 %v5363_v28 }
 0x120   : > { %v2172_v20 = vshrl.u32 %v1786_v14, 16  ;;  %v2175_v22 = vshll.u32 %v1786_v14, 16  ;;  %v2143_v26 = vrot.slane %v1786_v14, 1  ;;  %v1788_v30 = vld [vmem:[#allocation3 + $0x8] sm:$0xfc] }
 0x121   : > { %v1599_v41 = vld [vmem:[#allocation2 + $0x50] ss:$2 sm:$0xff]  ;;  %v1659_v42 = vld [vmem:[#allocation2 + $0x51] ss:$2 sm:$0xff]  ;;  %v1934_v43 = vsel %vm1931_vm2, %v1932_v32, %v1933_v33  ;;  %v5714_v45 = vrot.slane %v1813_v35, 1  ;;  %v1986_v46 = vrot.slane %v1817_v36, 1 }
 0x122   : > { %v1713_v47 = vmax.f32 %v1599_v41, %v1659_v42  ;;  %v1597_v48 = vld [vmem:[#allocation2 + $0x40] ss:$2 sm:$0xff]  ;;  %v1657_v49 = vld [vmem:[#allocation2 + $0x41] ss:$2 sm:$0xff]  ;;  %1955 = vrot.lane.b32.xlu1 %v1934_v43, %s5428_s23  ;;  %v1987_v50 = vrot.slane %v1813_v35, 2  ;;  %v2174_v34 = vrot.slane %v2172_v20, 1  ;;  %4791 = vmatpush3.bf16.msra.mxu1 %v5364_v29 }
 0x123   : > { %v1712_v51 = vmax.f32 %v1597_v48, %v1657_v49  ;;  %v5083_v52 = vpop.f32.mrb[28].mxu0  ;;  %v1816_v53 = vsel %vm1804_vm3, %v1811_v44, %v5714_v45  ;;  %v2177_v41 = vrot.slane %v2175_v22, 2 }
 0x124   : > { %v1111_v57 = vadd.f32 %v5083_v52, %v5623_v0  ;;  %v1102_v58 = vpop.f32.mrb[29].mxu0  ;;  %1897 = vrot.lane.b32.xlu0 %v1816_v53, %s5427_s18  ;;  %v5730_v60 = vor.u32 %v1987_v50, %v1986_v46  ;;  %v2195_v53 = vrot.slane %v1788_v30, 2 }
 0x125   : > { %v1740_v61 = vpack.c.bf16 %v1713_v47, %v1712_v51  ;;  %v1103_v63 = vadd.f32 %v5623_v0, %v1102_v58  ;;  %v5084_v1 = vpop.f32.mrb[30].mxu0 }
 0x126   : > { %v1483_v3 = vmax.f32 %v1095_v56, %v1111_v57  ;;  %v1114_v4 = vadd.f32 %v5084_v1, %v5623_v0  ;;  %v1105_v5 = vpop.f32.mrb[31].mxu0  ;;  %v1989_v6 = vsel %vm1977_vm4, %v1985_v59, %v5730_v60  ;;  %v2178_v59 = vor.u32 %v2177_v41, %v2174_v34 }
 0x127   : > { %1755 = vst.msk [vmem:[#allocation3 + $0x10] sm:$0xff] %vm775_vm0, %v1740_v61  ;;  %v1481_v9 = vmax.f32 %v1087_v62, %v1103_v63  ;;  %v1106_v10 = vadd.f32 %v5623_v0, %v1105_v5  ;;  %2035 = vrot.lane.b32.xlu1 %v1989_v6, %s5429_s30 }
 0x128   : > { %1543 = vst.msk [vmem:[#allocation2 + $0x70] sm:$0xff] %vm775_vm0, %v1483_v3  ;;  %v1484_v12 = vmax.f32 %v1098_v2, %v1114_v4 }
 0x129   : > { %1541 = vst.msk [vmem:[#allocation2 + $0x60] sm:$0xff] %vm775_vm0, %v1481_v9  ;;  %v1482_v13 = vmax.f32 %v1090_v8, %v1106_v10  ;;  %v1819_v8 = vor.u32 %v1817_v36, %v5714_v45 }
 0x12a   : > { %1544 = vst.msk [vmem:[#allocation2 + $0x78] sm:$0xff] %vm775_vm0, %v1484_v12 }
 0x12b   : > { %1542 = vst.msk [vmem:[#allocation2 + $0x68] sm:$0xff] %vm775_vm0, %v1482_v13  ;;  %v5087_v17 = vpop.f32.mrb[32].mxu0 }
 0x12c   : > { %v1118_v19 = vpop.f32.mrb[33].mxu0  ;;  %v1127_v46 = vadd.f32 %v5087_v17, %v5623_v0 }
 0x12d   : > { %v5088_v21 = vpop.f32.mrb[34].mxu0 }
 0x12e   : > { %v5758_v23 = vld [vmem:[#allocation3 + $0x10] sm:$0xff]  ;;  %v1121_v24 = vpop.f32.mrb[35].mxu0  ;;  %v1130_v56 = vadd.f32 %v5088_v21, %v5623_v0 }
 0x12f   : > { %2224 = vrot.lane.b32.xlu1 %v5758_v23, %s5428_s23  ;;  %2086 = vrot.lane.b32.xlu0 %v5758_v23, %s5427_s18  ;;  %v5765_v25 = vrot.slane %v5758_v23, 1  ;;  %v1821_v27 = vshll.u32 %v5758_v23, 16  ;;  %v1825_v32 = vshrl.u32 %v5758_v23, 16  ;;  %v5782_v40 = vrot.slane %v5758_v23, 2  ;;  %v1791_v14 = vld [vmem:[#allocation3 + $0x10] sm:$0xfe] }
 0x130   : > { %v1122_v3 = vadd.f32 %v5623_v0, %v1121_v24  ;;  %v2283_v45 = vrot.slane %v1791_v14, 1  ;;  %v1793_v41 = vld [vmem:[#allocation3 + $0x10] sm:$0xfc] }
 0x131   : > { %v1603_v35 = vld [vmem:[#allocation2 + $0x70] ss:$2 sm:$0xff]  ;;  %v1663_v37 = vld [vmem:[#allocation2 + $0x71] ss:$2 sm:$0xff]  ;;  %v1936_v38 = vsel %vm1931_vm2, %v1933_v33, %v5765_v25  ;;  %v2144_v39 = vsel %vm1931_vm2, %v2143_v26, %v5765_v25  ;;  %v1990_v47 = vrot.slane %v1825_v32, 1  ;;  %v1991_v48 = vrot.slane %v1821_v27, 2 }
 0x132   : > { %v1715_v42 = vmax.f32 %v1603_v35, %v1663_v37  ;;  %v1601_v43 = vld [vmem:[#allocation2 + $0x60] ss:$2 sm:$0xff]  ;;  %v1661_v44 = vld [vmem:[#allocation2 + $0x61] ss:$2 sm:$0xff]  ;;  %v1119_v33 = vadd.f32 %v5623_v0, %v1118_v19  ;;  %v2196_v1 = vsel %vm2059_vm5, %v2195_v53, %v5782_v40  ;;  %v5798_v2 = vrot.slane %v1821_v27, 1 }
 0x133   : > { %v1714_v49 = vmax.f32 %v1601_v43, %v1661_v44  ;;  %v5091_v50 = vpop.f32.mrb[36].mxu0  ;;  %1957 = vrot.lane.b32.xlu1 %v1936_v38, %s5428_s23  ;;  %2149 = vrot.lane.b32.xlu0 %v2144_v39, %s5429_s30  ;;  %v5791_v54 = vor.u32 %v1991_v48, %v1990_v47  ;;  %v2290_v53 = vshrl.u32 %v1791_v14, 16 }
 0x134   : > { %v1143_v51 = vadd.f32 %v5091_v50, %v5623_v0  ;;  %v1134_v52 = vpop.f32.mrb[37].mxu0  ;;  %v1824_v10 = vsel %vm1804_vm3, %v1819_v8, %v5798_v2 }
 0x135   : > { %v1741_v55 = vpack.c.bf16 %v1715_v42, %v1714_v49  ;;  %v1135_v57 = vadd.f32 %v5623_v0, %v1134_v52  ;;  %v5092_v58 = vpop.f32.mrb[38].mxu0  ;;  %v5806_v6 = vsel %vm1977_vm4, %v2178_v59, %v5791_v54  ;;  %v1993_v24 = vsel %vm1977_vm4, %v5730_v60, %v5791_v54 }
 0x136   : > { %v1487_v61 = vmax.f32 %v1127_v46, %v1143_v51  ;;  %v1146_v62 = vadd.f32 %v5092_v58, %v5623_v0  ;;  %v1137_v63 = vpop.f32.mrb[39].mxu0  ;;  %7974 = vst [vmem:[#allocation6_spill] sm:$0xff] %v5806_v6  ;;  %v2335_v52 = vrot.slane %v1793_v41, 2 }
 0x137   : > { %1756 = vst.msk [vmem:[#allocation3 + $0x18] sm:$0xff] %vm775_vm0, %v1741_v55  ;;  %v1485_v4 = vmax.f32 %v1119_v33, %v1135_v57  ;;  %v1138_v5 = vadd.f32 %v5623_v0, %v1137_v63  ;;  %2201 = vrot.lane.b32.xlu1 %v2196_v1, %s5427_s18  ;;  %v2293_v55 = vshll.u32 %v1791_v14, 16  ;;  %v2292_v1 = vrot.slane %v2290_v53, 1 }
 0x138   : > { %1547 = vst.msk [vmem:[#allocation2 + $0x90] sm:$0xff] %vm775_vm0, %v1487_v61  ;;  %v1488_v7 = vmax.f32 %v1130_v56, %v1146_v62  ;;  %v1827_v62 = vor.u32 %v1825_v32, %v5798_v2 }
 0x139   : > { %1545 = vst.msk [vmem:[#allocation2 + $0x80] sm:$0xff] %vm775_vm0, %v1485_v4  ;;  %v1486_v9 = vmax.f32 %v1122_v3, %v1138_v5  ;;  %v2295_v3 = vrot.slane %v2293_v55, 2 }
 0x13a   : > { %1548 = vst.msk [vmem:[#allocation2 + $0x98] sm:$0xff] %vm775_vm0, %v1488_v7 }
 0x13b   : > { %1546 = vst.msk [vmem:[#allocation2 + $0x88] sm:$0xff] %vm775_vm0, %v1486_v9  ;;  %2119 = vrot.lane.b32.xlu1 %v1824_v10, %s5428_s23  ;;  %v5095_v11 = vpop.f32.mrb[40].mxu0  ;;  %v2296_v23 = vor.u32 %v2295_v3, %v2292_v1 }
 0x13c   : > { %v1150_v12 = vpop.f32.mrb[41].mxu0  ;;  %v1159_v22 = vadd.f32 %v5095_v11, %v5623_v0 }
 0x13d   : > { %v5096_v13 = vpop.f32.mrb[42].mxu0  ;;  %v1151_v28 = vadd.f32 %v5623_v0, %v1150_v12 }
 0x13e   : > { %v5818_v16 = vld [vmem:[#allocation3 + $0x18] sm:$0xff]  ;;  %v1153_v31 = vpop.f32.mrb[43].mxu0  ;;  %v1162_v30 = vadd.f32 %v5096_v13, %v5623_v0 }
 0x13f   : > { %1899 = vrot.lane.b32.xlu1 %v1824_v10, %s5427_s18  ;;  %2088 = vrot.lane.b32.xlu0 %v5818_v16, %s5427_s18  ;;  %v5824_v36 = vrot.slane %v5818_v16, 1  ;;  %v1154_v34 = vadd.f32 %v5623_v0, %v1153_v31  ;;  %v5843_v42 = vrot.slane %v5818_v16, 2  ;;  %v1829_v43 = vshll.u32 %v5818_v16, 16 }
 0x140   : > { %v1833_v49 = vshrl.u32 %v5818_v16, 16 }
 0x141   : > { %v1607_v17 = vld [vmem:[#allocation2 + $0x90] ss:$2 sm:$0xff]  ;;  %v1667_v18 = vld [vmem:[#allocation2 + $0x91] ss:$2 sm:$0xff]  ;;  %v5832_v26 = vsel %vm1931_vm2, %v2283_v45, %v5824_v36  ;;  %v1938_v48 = vsel %vm1931_vm2, %v5765_v25, %v5824_v36  ;;  %v2336_v56 = vsel %vm2059_vm5, %v2335_v52, %v5843_v42  ;;  %v5861_v57 = vrot.slane %v1829_v43, 1 }
 0x142   : > { %v1717_v19 = vmax.f32 %v1607_v17, %v1667_v18  ;;  %v1605_v20 = vld [vmem:[#allocation2 + $0x80] ss:$2 sm:$0xff]  ;;  %v1665_v21 = vld [vmem:[#allocation2 + $0x81] ss:$2 sm:$0xff]  ;;  %7975 = vst [vmem:[#allocation7_spill] sm:$0xff] %v5832_v26  ;;  %v1994_v58 = vrot.slane %v1833_v49, 1  ;;  %v5874_v5 = vsel %vm2059_vm5, %v5782_v40, %v5843_v42 }
 0x143   : > { %v1716_v27 = vmax.f32 %v1605_v20, %v1665_v21  ;;  %v5099_v29 = vpop.f32.mrb[44].mxu0  ;;  %2037 = vrot.lane.b32.xlu1 %v1993_v24, %s5429_s30  ;;  %2364 = vrot.lane.b32.xlu0 %v5818_v16, %s5429_s30  ;;  %v1995_v59 = vrot.slane %v1829_v43, 2  ;;  %v1832_v7 = vsel %vm1804_vm3, %v1827_v62, %v5861_v57  ;;  %v1835_v62 = vor.u32 %v1833_v49, %v5861_v57 }
 0x144   : > { %v1175_v35 = vadd.f32 %v5099_v29, %v5623_v0  ;;  %v1166_v60 = vpop.f32.mrb[45].mxu0 }
 0x145   : > { %v1742_v37 = vpack.c.bf16 %v1717_v19, %v1716_v27  ;;  %v1167_v38 = vadd.f32 %v5623_v0, %v1166_v60  ;;  %v5100_v39 = vpop.f32.mrb[46].mxu0  ;;  %v5878_v9 = vor.u32 %v1995_v59, %v1994_v58 }
 0x146   : > { %v1491_v44 = vmax.f32 %v1159_v22, %v1175_v35  ;;  %v1178_v46 = vadd.f32 %v5100_v39, %v5623_v0  ;;  %v1169_v47 = vpop.f32.mrb[47].mxu0 }
 0x147   : > { %1757 = vst.msk [vmem:[#allocation3 + $0x20] sm:$0xff] %vm775_vm0, %v1742_v37  ;;  %v1489_v33 = vmax.f32 %v1151_v28, %v1167_v38  ;;  %v1170_v50 = vadd.f32 %v5623_v0, %v1169_v47  ;;  %2226 = vrot.lane.b32.xlu1 %v5818_v16, %s5428_s23  ;;  %2151 = vrot.lane.b32.xlu0 %v1938_v48, %s5429_s30 }
 0x148   : > { %1551 = vst.msk [vmem:[#allocation2 + $0xb0] sm:$0xff] %vm775_vm0, %v1491_v44  ;;  %v1492_v51 = vmax.f32 %v1162_v30, %v1178_v46  ;;  %v2297_v45 = vsel %vm1977_vm4, %v2296_v23, %v5878_v9  ;;  %v5919_v46 = vsel %vm1977_vm4, %v5791_v54, %v5878_v9 }
 0x149   : > { %1549 = vst.msk [vmem:[#allocation2 + $0xa0] sm:$0xff] %vm775_vm0, %v1489_v33  ;;  %v1490_v25 = vmax.f32 %v1154_v34, %v1170_v50  ;;  %7977 = vst [vmem:[#allocation9_spill] sm:$0xff] %v5919_v46 }
 0x14a   : > { %1552 = vst.msk [vmem:[#allocation2 + $0xb8] sm:$0xff] %vm775_vm0, %v1492_v51 }
 0x14b   : > { %1550 = vst.msk [vmem:[#allocation2 + $0xa8] sm:$0xff] %vm775_vm0, %v1490_v25  ;;  %1959 = vrot.lane.b32.xlu1 %v1938_v48, %s5428_s23  ;;  %2341 = vrot.lane.b32.xlu0 %v2336_v56, %s5428_s23  ;;  %v5103_v61 = vpop.f32.mrb[48].mxu0 }
 0x14c   : > { %v1182_v63 = vpop.f32.mrb[49].mxu0  ;;  %v1191_v31 = vadd.f32 %v5103_v61, %v5623_v0 }
 0x14d   : > { %v5104_v4 = vpop.f32.mrb[50].mxu0  ;;  %v1183_v18 = vadd.f32 %v5623_v0, %v1182_v63 }
 0x14e   : > { %v1185_v8 = vpop.f32.mrb[51].mxu0  ;;  %v5880_v10 = vld [vmem:[#allocation3 + $0x20] sm:$0xff]  ;;  %v1194_v20 = vadd.f32 %v5104_v4, %v5623_v0 }
 0x14f   : > { %2203 = vrot.lane.b32.xlu1 %v5874_v5, %s5427_s18  ;;  %2121 = vrot.lane.b32.xlu0 %v1832_v7, %s5428_s23  ;;  %v5886_v32 = vshrl.u32 %v5880_v10, 16  ;;  %v5897_v24 = vshll.u32 %v5880_v10, 16  ;;  %v1186_v29 = vadd.f32 %v5623_v0, %v1185_v8  ;;  %v5922_v47 = vrot.slane %v5880_v10, 1  ;;  %v1803_v50 = vld [vmem:[#allocation3 + $0x20] sm:$0xfc] }
 0x150   : > { %v2067_v52 = vrot.slane %v5880_v10, 2  ;;  %v2917_v56 = vshrl.u32 %v1803_v50, 16  ;;  %v2920_v49 = vshll.u32 %v1803_v50, 16 }
 0x151   : > { %v1611_v2 = vld [vmem:[#allocation2 + $0xb0] ss:$2 sm:$0xff]  ;;  %v1671_v11 = vld [vmem:[#allocation2 + $0xb1] ss:$2 sm:$0xff]  ;;  %v2819_v27 = vrot.slane %v5886_v32, 7  ;;  %7978 = vst [vmem:[#allocation10_spill] sm:$0xff] %v5922_v47  ;;  %v5933_v54 = vsel %vm1931_vm2, %v5824_v36, %v5922_v47 }
 0x152   : > { %v1719_v12 = vmax.f32 %v1611_v2, %v1671_v11  ;;  %v1609_v13 = vld [vmem:[#allocation2 + $0xa0] ss:$2 sm:$0xff]  ;;  %v1669_v14 = vld [vmem:[#allocation2 + $0xa1] ss:$2 sm:$0xff]  ;;  %7979 = vst [vmem:[#allocation11_spill] sm:$0xff] %v5933_v54  ;;  %v5945_v58 = vrot.slane %v5897_v24, 1  ;;  %v5951_v61 = vsel %vm2059_vm5, %v5843_v42, %v2067_v52 }
 0x153   : > { %v1718_v17 = vmax.f32 %v1609_v13, %v1669_v14  ;;  %v5107_v19 = vpop.f32.mrb[52].mxu0  ;;  %1901 = vrot.lane.b32.xlu1 %v1832_v7, %s5427_s18  ;;  %2311 = vrot.lane.b32.xlu0 %v2297_v45, %s5427_s18  ;;  %v5906_v38 = vor.u32 %v2819_v27, %v5897_v24  ;;  %v1999_v63 = vrot.slane %v5897_v24, 2  ;;  %v1998_v23 = vrot.slane %v5886_v32, 1 }
 0x154   : > { %v1207_v21 = vadd.f32 %v5107_v19, %v5623_v0  ;;  %v1198_v22 = vpop.f32.mrb[53].mxu0  ;;  %7980 = vst [vmem:[#allocation12_spill] sm:$0xff] %v5945_v58  ;;  %v2919_v16 = vrot.slane %v2917_v56, 1 }
 0x155   : > { %v1743_v28 = vpack.c.bf16 %v1719_v12, %v1718_v17  ;;  %v1199_v30 = vadd.f32 %v5623_v0, %v1198_v22  ;;  %v5108_v34 = vpop.f32.mrb[54].mxu0  ;;  %7976 = vst [vmem:[#allocation8_spill] sm:$0xff] %v5906_v38 }
 0x156   : > { %v1495_v35 = vmax.f32 %v1191_v31, %v1207_v21  ;;  %v1210_v60 = vadd.f32 %v5108_v34, %v5623_v0  ;;  %v1201_v37 = vpop.f32.mrb[55].mxu0 }
 0x157   : > { %1758 = vst.msk [vmem:[#allocation3 + $0x28] sm:$0xff] %vm775_vm0, %v1743_v28  ;;  %v1493_v39 = vmax.f32 %v1183_v18, %v1199_v30  ;;  %v1202_v41 = vadd.f32 %v5623_v0, %v1201_v37  ;;  %2259 = vrot.lane.b32.xlu1 %v1832_v7, %s5429_s30  ;;  %2090 = vrot.lane.b32.xlu0 %v5880_v10, %s5427_s18 }
 0x158   : > { %1555 = vst.msk [vmem:[#allocation2 + $0xd0] sm:$0xff] %vm775_vm0, %v1495_v35  ;;  %v1496_v43 = vmax.f32 %v1194_v20, %v1210_v60  ;;  %v5980_v30 = vor.u32 %v1999_v63, %v1998_v23  ;;  %v2922_v60 = vrot.slane %v2920_v49, 2 }
 0x159   : > { %1553 = vst.msk [vmem:[#allocation2 + $0xc0] sm:$0xff] %vm775_vm0, %v1493_v39  ;;  %v1494_v44 = vmax.f32 %v1186_v29, %v1202_v41  ;;  %v1840_v29 = vsel %vm1804_vm3, %v1835_v62, %v5945_v58 }
 0x15a   : > { %1556 = vst.msk [vmem:[#allocation2 + $0xd8] sm:$0xff] %vm775_vm0, %v1496_v43  ;;  %7981 = vst [vmem:[#allocation13_spill] sm:$0xff] %v5980_v30 }
 0x15b   : > { %1554 = vst.msk [vmem:[#allocation2 + $0xc8] sm:$0xff] %vm775_vm0, %v1494_v44  ;;  %2039 = vrot.lane.b32.xlu1 %v5919_v46, %s5429_s30  ;;  %2366 = vrot.lane.b32.xlu0 %v5880_v10, %s5429_s30  ;;  %v5111_v48 = vpop.f32.mrb[56].mxu0  ;;  %v6000_v44 = vsel %vm1977_vm4, %v5878_v9, %v5980_v30 }
 0x15c   : > { %v1214_v33 = vpop.f32.mrb[57].mxu0  ;;  %v1223_v8 = vadd.f32 %v5111_v48, %v5623_v0  ;;  %7982 = vst [vmem:[#allocation14_spill] sm:$0xff] %v6000_v44  ;;  %v2923_v48 = vor.u32 %v2922_v60, %v2919_v16 }
 0x15d   : > { %v5112_v51 = vpop.f32.mrb[58].mxu0  ;;  %v1215_v11 = vadd.f32 %v5623_v0, %v1214_v33 }
 0x15e   : > { %v1217_v53 = vpop.f32.mrb[59].mxu0  ;;  %v5935_v55 = vld [vmem:[#allocation3 + $0x28] sm:$0xff]  ;;  %v1226_v57 = vadd.f32 %v5112_v51, %v5623_v0 }
 0x15f   : > { %2228 = vrot.lane.b32.xlu1 %v5880_v10, %s5428_s23  ;;  %2153 = vrot.lane.b32.xlu0 %v5933_v54, %s5429_s30  ;;  %v5942_v25 = vshrl.u32 %v5935_v55, 16  ;;  %v5958_v1 = vshll.u32 %v5935_v55, 16  ;;  %v1218_v13 = vadd.f32 %v5623_v0, %v1217_v53  ;;  %v6009_v56 = vrot.slane %v5935_v55, 1 }
 0x161   : > { %v1615_v59 = vld [vmem:[#allocation2 + $0xd0] ss:$2 sm:$0xff]  ;;  %v1675_v36 = vld [vmem:[#allocation2 + $0xd1] ss:$2 sm:$0xff]  ;;  %v2821_v2 = vrot.slane %v5942_v25, 7  ;;  %v2002_v20 = vrot.slane %v5942_v25, 1 }
 0x162   : > { %v1721_v3 = vmax.f32 %v1615_v59, %v1675_v36  ;;  %v1613_v4 = vld [vmem:[#allocation2 + $0xc0] ss:$2 sm:$0xff]  ;;  %v1673_v7 = vld [vmem:[#allocation2 + $0xc1] ss:$2 sm:$0xff]  ;;  %v2003_v21 = vrot.slane %v5958_v1, 2  ;;  %7983 = vst [vmem:[#allocation15_spill] sm:$0xff] %v6009_v56 }
 0x163   : > { %v1720_v42 = vmax.f32 %v1613_v4, %v1673_v7  ;;  %v5115_v12 = vpop.f32.mrb[60].mxu0  ;;  %1961 = vrot.lane.b32.xlu1 %v5933_v54, %s5428_s23  ;;  %2343 = vrot.lane.b32.xlu0 %v5951_v61, %s5428_s23  ;;  %v2822_v45 = vor.u32 %v2821_v2, %v5958_v1 }
 0x164   : > { %v1239_v14 = vadd.f32 %v5115_v12, %v5623_v0  ;;  %v1230_v31 = vpop.f32.mrb[61].mxu0  ;;  %v5994_v43 = vor.u32 %v2003_v21, %v2002_v20  ;;  %v6028_v12 = vsel %vm1931_vm2, %v5922_v47, %v6009_v56 }
 0x165   : > { %v1744_v17 = vpack.c.bf16 %v1721_v3, %v1720_v42  ;;  %v1231_v18 = vadd.f32 %v5623_v0, %v1230_v31  ;;  %v5116_v19 = vpop.f32.mrb[62].mxu0  ;;  %v5990_v37 = vsel %vm2818_vm6, %v2819_v27, %v2822_v45  ;;  %7984 = vst [vmem:[#allocation16_spill] sm:$0xff] %v6028_v12 }
 0x166   : > { %v1499_v22 = vmax.f32 %v1223_v8, %v1239_v14  ;;  %v1242_v24 = vadd.f32 %v5116_v19, %v5623_v0  ;;  %v1233_v28 = vpop.f32.mrb[63].mxu0  ;;  %v2924_v51 = vsel %vm1977_vm4, %v2923_v48, %v5994_v43  ;;  %v2069_v48 = vrot.slane %v5935_v55, 2 }
 0x167   : > { %1759 = vst.msk [vmem:[#allocation3 + $0x30] sm:$0xff] %vm775_vm0, %v1744_v17  ;;  %v1497_v34 = vmax.f32 %v1215_v11, %v1231_v18  ;;  %v1234_v35 = vadd.f32 %v5623_v0, %v1233_v28  ;;  %2205 = vrot.lane.b32.xlu1 %v5951_v61, %s5427_s18  ;;  %2123 = vrot.lane.b32.xlu0 %v1840_v29, %s5428_s23  ;;  %v3061_v62 = vshll.u32 %v2924_v51, 16  ;;  %v3059_v60 = vshrl.u32 %v2924_v51, 16 }
 0x168   : > { %1559 = vst.msk [vmem:[#allocation2 + $0xf0] sm:$0xff] %vm775_vm0, %v1499_v22  ;;  %v1500_v39 = vmax.f32 %v1226_v57, %v1242_v24 }
 0x169   : > { %1557 = vst.msk [vmem:[#allocation2 + $0xe0] sm:$0xff] %vm775_vm0, %v1497_v34  ;;  %v1498_v41 = vmax.f32 %v1218_v13, %v1234_v35  ;;  %v3063_v18 = vrot.slane %v3061_v62, 1 }
 0x16a   : > { %1560 = vst.msk [vmem:[#allocation2 + $0xf8] sm:$0xff] %vm775_vm0, %v1500_v39 }
 0x16b   : > { %1558 = vst.msk [vmem:[#allocation2 + $0xe8] sm:$0xff] %vm775_vm0, %v1498_v41  ;;  %1903 = vrot.lane.b32.xlu1 %v1840_v29, %s5427_s18  ;;  %2313 = vrot.lane.b32.xlu0 %v6000_v44, %s5427_s18  ;;  %v5119_v27 = vpop.f32.mrb[64].mxu0  ;;  %v3064_v51 = vor.u32 %v3063_v18, %v3059_v60 }
 0x16c   : > { %v1246_v33 = vpop.f32.mrb[65].mxu0  ;;  %v1255_v11 = vadd.f32 %v5119_v27, %v5623_v0 }
 0x16d   : > { %v5120_v50 = vpop.f32.mrb[66].mxu0  ;;  %v1247_v57 = vadd.f32 %v5623_v0, %v1246_v33 }
 0x16e   : > { %v1249_v53 = vpop.f32.mrb[67].mxu0  ;;  %v6011_v9 = vld [vmem:[#allocation3 + $0x30] sm:$0xff]  ;;  %v1258_v31 = vadd.f32 %v5120_v50, %v5623_v0 }
 0x16f   : > { %2261 = vrot.lane.b32.xlu1 %v1840_v29, %s5429_s30  ;;  %2092 = vrot.lane.b32.xlu0 %v5935_v55, %s5427_s18  ;;  %v6017_v59 = vshll.u32 %v6011_v9, 16  ;;  %v6020_v36 = vshrl.u32 %v6011_v9, 16  ;;  %v1250_v21 = vadd.f32 %v5623_v0, %v1249_v53 }
 0x171   : > { %v1619_v63 = vld [vmem:[#allocation2 + $0xf0] ss:$2 sm:$0xff]  ;;  %v1679_v3 = vld [vmem:[#allocation2 + $0xf1] ss:$2 sm:$0xff]  ;;  %v2006_v4 = vrot.slane %v6020_v36, 1  ;;  %v2007_v7 = vrot.slane %v6017_v59, 2 }
 0x172   : > { %v1723_v8 = vmax.f32 %v1619_v63, %v1679_v3  ;;  %v1617_v23 = vld [vmem:[#allocation2 + $0xe0] ss:$2 sm:$0xff]  ;;  %v1677_v42 = vld [vmem:[#allocation2 + $0xe1] ss:$2 sm:$0xff]  ;;  %v2824_v16 = vrot.slane %v6020_v36, 7  ;;  %v6080_v3 = vrot.slane %v5958_v1, 1 }
 0x173   : > { %v1722_v49 = vmax.f32 %v1617_v23, %v1677_v42  ;;  %v5123_v13 = vpop.f32.mrb[68].mxu0  ;;  %2041 = vrot.lane.b32.xlu1 %v6000_v44, %s5429_s30  ;;  %2368 = vrot.lane.b32.xlu0 %v5935_v55, %s5429_s30  ;;  %v6036_v14 = vor.u32 %v2007_v7, %v2006_v4  ;;  %v1843_v7 = vor.u32 %v5886_v32, %v5945_v58 }
 0x174   : > { %v1271_v45 = vadd.f32 %v5123_v13, %v5623_v0  ;;  %v1262_v17 = vpop.f32.mrb[69].mxu0  ;;  %v2825_v19 = vor.u32 %v2824_v16, %v6017_v59  ;;  %7987 = vst [vmem:[#allocation19_spill] sm:$0xff] %v6080_v3 }
 0x175   : > { %v1745_v20 = vpack.c.bf16 %v1723_v8, %v1722_v49  ;;  %v1263_v22 = vadd.f32 %v5623_v0, %v1262_v17  ;;  %v5124_v24 = vpop.f32.mrb[70].mxu0  ;;  %v6048_v28 = vsel %vm1977_vm4, %v5994_v43, %v6036_v14  ;;  %v6106_v17 = vld [vmem:[%s7923_s2] ss:$0 sm:$0xff] }
 0x176   : > { %7985 = vst [vmem:[#allocation17_spill] sm:$0xff] %v6048_v28  ;;  %v1503_v29 = vmax.f32 %v1255_v11, %v1271_v45  ;;  %v1274_v34 = vadd.f32 %v5124_v24, %v5623_v0  ;;  %v1265_v35 = vpop.f32.mrb[71].mxu0  ;;  %v3065_v39 = vshll.u32 %v6048_v28, 16  ;;  %v6062_v33 = vsel %vm2818_vm6, %v2821_v2, %v2825_v19 }
 0x177   : > { %1760 = vst.msk [vmem:[#allocation3 + $0x38] sm:$0xff] %vm775_vm0, %v1745_v20  ;;  %v1501_v41 = vmax.f32 %v1247_v57, %v1263_v22  ;;  %v1266_v27 = vadd.f32 %v5623_v0, %v1265_v35  ;;  %2230 = vrot.lane.b32.xlu1 %v5935_v55, %s5428_s23  ;;  %2155 = vrot.lane.b32.xlu0 %v6028_v12, %s5429_s30  ;;  %7986 = vst [vmem:[#allocation18_spill] sm:$0xff] %v6062_v33 }
 0x178   : > { %1563 = vst.msk [vmem:[#allocation2 + $0x110] sm:$0xff] %vm775_vm0, %v1503_v29  ;;  %v1504_v50 = vmax.f32 %v1258_v31, %v1274_v34  ;;  %v3067_v53 = vrot.slane %v3065_v39, 1  ;;  %v6077_v2 = vsel %vm2059_vm5, %v2067_v52, %v2069_v48  ;;  %v1848_v52 = vsel %vm1804_vm3, %v1843_v7, %v6080_v3 }
 0x179   : > { %1561 = vst.msk [vmem:[#allocation2 + $0x100] sm:$0xff] %vm775_vm0, %v1501_v41  ;;  %v1502_v0 = vmax.f32 %v1250_v21, %v1266_v27  ;;  %v6115_v24 = vsel %vm1977_vm4, %v5980_v30, %v5994_v43 }
 0x17a   : > { %1564 = vst.msk [vmem:[#allocation2 + $0x118] sm:$0xff] %vm775_vm0, %v1504_v50  ;;  %v3068_v62 = vsel %vm1804_vm3, %v3064_v51, %v3067_v53  ;;  %7988 = vst [vmem:[#allocation20_spill] sm:$0xff] %v6115_v24 }
 0x17b   : > { %1562 = vst.msk [vmem:[#allocation2 + $0x108] sm:$0xff] %vm775_vm0, %v1502_v0  ;;  %5178 = vmatmul.mubr.msk.bf16.vlgmr.msra.gmra.mrb[120].mxu0 %vm775_vm0, %v3068_v62  ;;  %1963 = vrot.lane.b32.xlu1 %v6028_v12, %s5428_s23  ;;  %v5127_v63 = vpop.f32.mrb[72].mxu0 }
 0x17c   : > { %2345 = vrot.lane.b32.xlu0 %v6077_v2, %s5428_s23  ;;  %v1278_v4 = vpop.f32.mrb[73].mxu0  ;;  %5181 = vmatprep.mubr.msk.bf16.mxu0 %vm5426_vm1, %v7932_v15  ;;  %v1287_v18 = vadd.f32 %v6106_v17, %v5127_v63 }
 0x17d   : > { %v5128_v8 = vpop.f32.mrb[74].mxu0  ;;  %v1279_v21 = vadd.f32 %v6106_v17, %v1278_v4  ;;  %v3083_v4 = vshrl.u32 %v6048_v28, 16 }
 0x17e   : > { %v1281_v23 = vpop.f32.mrb[75].mxu0  ;;  %v6088_v10 = vld [vmem:[#allocation3 + $0x38] sm:$0xff]  ;;  %v1290_v34 = vadd.f32 %v6106_v17, %v5128_v8 }
 0x17f   : > { %2207 = vrot.lane.b32.xlu1 %v6077_v2, %s5427_s18  ;;  %v6095_v1 = vshll.u32 %v6088_v10, 16  ;;  %v6098_v42 = vshrl.u32 %v6088_v10, 16  ;;  %v1282_v27 = vadd.f32 %v6106_v17, %v1281_v23 }
 0x180   : > { %2125 = vrot.lane.b32.xlu0 %v1848_v52, %s5428_s23 }
 0x181   : > { %v1623_v11 = vld [vmem:[#allocation2 + $0x110] ss:$2 sm:$0xff]  ;;  %v1683_v32 = vld [vmem:[#allocation2 + $0x111] ss:$2 sm:$0xff]  ;;  %v2010_v49 = vrot.slane %v6098_v42, 1  ;;  %v2011_v57 = vrot.slane %v6095_v1, 2 }
 0x182   : > { %v1725_v13 = vmax.f32 %v1623_v11, %v1683_v32  ;;  %v1621_v31 = vld [vmem:[#allocation2 + $0x100] ss:$2 sm:$0xff]  ;;  %v1681_v45 = vld [vmem:[#allocation2 + $0x101] ss:$2 sm:$0xff]  ;;  %v2827_v19 = vrot.slane %v6098_v42, 7  ;;  %v3085_v32 = vor.u32 %v3083_v4, %v3067_v53 }
 0x183   : > { %v1724_v20 = vmax.f32 %v1621_v31, %v1681_v45  ;;  %v5131_v22 = vpop.f32.mrb[76].mxu0  ;;  %1905 = vrot.lane.b32.xlu1 %v1848_v52, %s5427_s18  ;;  %v6117_v29 = vor.u32 %v2011_v57, %v2010_v49  ;;  %v5365_v57 = vld [vmem:[%s7924_s3 + $0xc0] sm:$0xff]  }
 0x184   : > { %v1303_v35 = vadd.f32 %v6106_v17, %v5131_v22  ;;  %2315 = vrot.lane.b32.xlu0 %v6115_v24, %s5427_s18  ;;  %v1294_v60 = vpop.f32.mrb[77].mxu0  ;;  %v2828_v39 = vor.u32 %v2827_v19, %v6095_v1  ;;  %4858 = vmatprep.subr.bf16.mxu1 %v5365_v57 }
 0x185   : > { %v1746_v41 = vpack.c.bf16 %v1725_v13, %v1724_v20  ;;  %v1295_v43 = vadd.f32 %v6106_v17, %v1294_v60  ;;  %v5132_v50 = vpop.f32.mrb[78].mxu0  ;;  %v6131_v51 = vsel %vm1977_vm4, %v6036_v14, %v6117_v29  ;;  %v1943_v13 = vrot.slane %v6011_v9, 1 }
 0x186   : > { %7989 = vst [vmem:[#allocation21_spill] sm:$0xff] %v6131_v51  ;;  %v1507_v0 = vmax.f32 %v1287_v18, %v1303_v35  ;;  %v1306_v62 = vadd.f32 %v6106_v17, %v5132_v50  ;;  %v1297_v63 = vpop.f32.mrb[79].mxu0  ;;  %v3086_v7 = vshll.u32 %v6131_v51, 16  ;;  %v6142_v14 = vsel %vm2818_vm6, %v2824_v16, %v2828_v39 }
 0x187   : > { %1761 = vst.msk [vmem:[#allocation3 + $0x40] sm:$0xff] %vm775_vm0, %v1746_v41  ;;  %v1505_v8 = vmax.f32 %v1279_v21, %v1295_v43  ;;  %v1298_v23 = vadd.f32 %v6106_v17, %v1297_v63  ;;  %2263 = vrot.lane.b32.xlu1 %v1848_v52, %s5429_s30  ;;  %7990 = vst [vmem:[#allocation22_spill] sm:$0xff] %v6142_v14  ;;  %v6169_v18 = vsel %vm1931_vm2, %v6009_v56, %v1943_v13 }
 0x188   : > { %1567 = vst.msk [vmem:[#allocation2 + $0x130] sm:$0xff] %vm775_vm0, %v1507_v0  ;;  %v1508_v11 = vmax.f32 %v1290_v34, %v1306_v62  ;;  %2094 = vrot.lane.b32.xlu0 %v6011_v9, %s5427_s18  ;;  %v6147_v49 = vrot.slane %v3086_v7, 1  ;;  %7991 = vst [vmem:[#allocation23_spill] sm:$0xff] %v6169_v18  ;;  %v7931_v21 = vrot.slane %v6011_v9, 2  ;;  %v1855_v60 = vrot.slane %v6017_v59, 1 }
 0x189   : > { %1565 = vst.msk [vmem:[#allocation2 + $0x120] sm:$0xff] %vm775_vm0, %v1505_v8  ;;  %v1506_v52 = vmax.f32 %v1282_v27, %v1298_v23  ;;  %v1851_v7 = vor.u32 %v5942_v25, %v6080_v3 }
 0x18a   : > { %1568 = vst.msk [vmem:[#allocation2 + $0x138] sm:$0xff] %vm775_vm0, %v1508_v11  ;;  %v3089_v16 = vsel %vm1804_vm3, %v3085_v32, %v6147_v49  ;;  %v6193_v4 = vsel %vm2059_vm5, %v2069_v48, %v7931_v21 }
 0x18b   : > { %1566 = vst.msk [vmem:[#allocation2 + $0x128] sm:$0xff] %vm775_vm0, %v1506_v52  ;;  %5182 = vmatmul.mubr.msk.bf16.gmra.mrb[124].mxu0 %vm775_vm0, %v3089_v16  ;;  %2043 = vrot.lane.b32.xlu1 %v6115_v24, %s5429_s30  ;;  %v5135_v53 = vpop.f32.mrb[80].mxu0  ;;  %7992 = vst [vmem:[#allocation24_spill] sm:$0xff] %v6193_v4  ;;  %v1856_v16 = vsel %vm1804_vm3, %v1851_v7, %v1855_v60 }
 0x18c   : > { %2370 = vrot.lane.b32.xlu0 %v6011_v9, %s5429_s30  ;;  %v1310_v31 = vpop.f32.mrb[81].mxu0  ;;  %5185 = vmatprep.mubr.msk.bf16.mxu0 %vm5426_vm1, %v7932_v15  ;;  %v1319_v63 = vadd.f32 %v6106_v17, %v5135_v53 }
 0x18d   : > { %v5136_v45 = vpop.f32.mrb[82].mxu0  ;;  %v1311_v23 = vadd.f32 %v6106_v17, %v1310_v31 }
 0x18e   : > { %v1313_v20 = vpop.f32.mrb[83].mxu0  ;;  %v6172_v22 = vld [vmem:[#allocation3 + $0x40] sm:$0xff]  ;;  %v1322_v52 = vadd.f32 %v6106_v17, %v5136_v45 }
 0x18f   : > { %1965 = vrot.lane.b32.xlu1 %v6169_v18, %s5428_s23  ;;  %v6177_v34 = vshll.u32 %v6172_v22, 16  ;;  %v6180_v35 = vshrl.u32 %v6172_v22, 16  ;;  %v1314_v55 = vadd.f32 %v6106_v17, %v1313_v20 }
 0x190   : > { %2157 = vrot.lane.b32.xlu0 %v6169_v18, %s5429_s30 }
 0x191   : > { %v1627_v39 = vld [vmem:[#allocation2 + $0x130] ss:$2 sm:$0xff]  ;;  %v1687_v41 = vld [vmem:[#allocation2 + $0x131] ss:$2 sm:$0xff]  ;;  %v2014_v27 = vrot.slane %v6180_v35, 1  ;;  %v2015_v43 = vrot.slane %v6177_v34, 2 }
 0x192   : > { %v1727_v50 = vmax.f32 %v1627_v39, %v1687_v41  ;;  %v1625_v0 = vld [vmem:[#allocation2 + $0x120] ss:$2 sm:$0xff]  ;;  %v1685_v62 = vld [vmem:[#allocation2 + $0x121] ss:$2 sm:$0xff]  ;;  %v7934_v57 = vrot.slane %v6180_v35, 7 }
 0x193   : > { %v1726_v8 = vmax.f32 %v1625_v0, %v1685_v62  ;;  %v5139_v11 = vpop.f32.mrb[84].mxu0  ;;  %2209 = vrot.lane.b32.xlu1 %v6193_v4, %s5427_s18  ;;  %v6200_v32 = vor.u32 %v2015_v43, %v2014_v27  ;;  %v3104_v0 = vshrl.u32 %v6131_v51, 16 }
 0x194   : > { %v1335_v48 = vadd.f32 %v6106_v17, %v5139_v11  ;;  %2347 = vrot.lane.b32.xlu0 %v6193_v4, %s5428_s23  ;;  %v1326_v25 = vpop.f32.mrb[85].mxu0  ;;  %v2831_v20 = vor.u32 %v7934_v57, %v6177_v34  ;;  %v6224_v7 = vpop.permute.xlu1 %1955  ;;  %v1859_v57 = vor.u32 %v6020_v36, %v1855_v60  ;;  %v7997_v36 = vrot.slane %v6095_v1, 1 }
 0x195   : > { %v1747_v53 = vpack.c.bf16 %v1727_v50, %v1726_v8  ;;  %v1327_v31 = vadd.f32 %v6106_v17, %v1326_v25  ;;  %v5140_v39 = vpop.f32.mrb[86].mxu0  ;;  %v6215_v45 = vsel %vm1977_vm4, %v6117_v29, %v6200_v32  ;;  %v3106_v11 = vor.u32 %v3104_v0, %v6147_v49 }
 0x196   : > { %7993 = vst [vmem:[#allocation25_spill] sm:$0xff] %v6215_v45  ;;  %v1511_v41 = vmax.f32 %v1319_v63, %v1335_v48  ;;  %v1338_v27 = vadd.f32 %v6106_v17, %v5140_v39  ;;  %v1329_v43 = vpop.f32.mrb[87].mxu0  ;;  %v3107_v50 = vshll.u32 %v6215_v45, 16  ;;  %v6231_v63 = vsel %vm2818_vm6, %v2827_v19, %v2831_v20 }
 0x197   : > { %1762 = vst.msk [vmem:[#allocation3 + $0x48] sm:$0xff] %vm775_vm0, %v1747_v53  ;;  %v1509_v62 = vmax.f32 %v1311_v23, %v1327_v31  ;;  %v1330_v29 = vadd.f32 %v6106_v17, %v1329_v43  ;;  %1907 = vrot.lane.b32.xlu1 %v1856_v16, %s5427_s18  ;;  %7994 = vst [vmem:[#allocation26_spill] sm:$0xff] %v6231_v63  ;;  %v7936_v39 = vrot.slane %v6088_v10, 1 }
 0x198   : > { %1571 = vst.msk [vmem:[#allocation2 + $0x150] sm:$0xff] %vm775_vm0, %v1511_v41  ;;  %v1512_v8 = vmax.f32 %v1322_v52, %v1338_v27  ;;  %2127 = vrot.lane.b32.xlu0 %v1856_v16, %s5428_s23  ;;  %v6236_v48 = vrot.slane %v3107_v50, 1  ;;  %v6245_v52 = vpop.permute.xlu0 %2084  ;;  %v6296_v60 = vsel %vm1804_vm3, %v1859_v57, %v7997_v36 }
 0x199   : > { %1569 = vst.msk [vmem:[#allocation2 + $0x140] sm:$0xff] %vm775_vm0, %v1509_v62  ;;  %v1510_v23 = vmax.f32 %v1314_v55, %v1330_v29  ;;  %v6251_v55 = vpop.permute.xlu1 %2035 }
 0x19a   : > { %1572 = vst.msk [vmem:[#allocation2 + $0x158] sm:$0xff] %vm775_vm0, %v1512_v8  ;;  %v3110_v25 = vsel %vm1804_vm3, %v3106_v11, %v6236_v48 }
 0x19b   : > { %1570 = vst.msk [vmem:[#allocation2 + $0x148] sm:$0xff] %vm775_vm0, %v1510_v23  ;;  %5186 = vmatmul.mubr.msk.bf16.gmra.mrb[128].mxu0 %vm775_vm0, %v3110_v25  ;;  %2265 = vrot.lane.b32.xlu1 %v1856_v16, %s5429_s30  ;;  %v5143_v19 = vpop.f32.mrb[88].mxu0 }
 0x19c   : > { %2317 = vrot.lane.b32.xlu0 %v6048_v28, %s5427_s18  ;;  %v1342_v49 = vpop.f32.mrb[89].mxu0  ;;  %5189 = vmatprep.mubr.msk.bf16.mxu0 %vm5426_vm1, %v7932_v15  ;;  %v1898_v25 = vpop.permute.xlu0 %1897  ;;  %v1351_v21 = vadd.f32 %v6106_v17, %v5143_v19  ;;  %v6277_v15 = vsel %vm1931_vm2, %v1943_v13, %v7936_v39 }
 0x19d   : > { %v5144_v53 = vpop.f32.mrb[90].mxu0  ;;  %7996 = vst [vmem:[#allocation28_spill] sm:$0xff] %v6277_v15  ;;  %v1343_v38 = vadd.f32 %v6106_v17, %v1342_v49 }
 0x19e   : > { %v1345_v31 = vpop.f32.mrb[91].mxu0  ;;  %v6254_v20 = vld [vmem:[#allocation3 + $0x48] sm:$0xff] }
 0x19f   : > { %2045 = vrot.lane.b32.xlu1 %v6048_v28, %s5429_s30  ;;  %v6259_v16 = vshll.u32 %v6254_v20, 16  ;;  %v6262_v41 = vshrl.u32 %v6254_v20, 16  ;;  %v1354_v28 = vadd.f32 %v6106_v17, %v5144_v53  ;;  %v1346_v13 = vadd.f32 %v6106_v17, %v1345_v31 }
 0x1a0   : > { %2096 = vrot.lane.b32.xlu0 %v6088_v10, %s5427_s18 }
 0x1a1   : > { %v1631_v43 = vld [vmem:[#allocation2 + $0x150] ss:$2 sm:$0xff]  ;;  %v1691_v0 = vld [vmem:[#allocation2 + $0x151] ss:$2 sm:$0xff]  ;;  %v6267_v50 = vpop.permute.xlu1 %2224  ;;  %v2018_v62 = vrot.slane %v6262_v41, 1  ;;  %v2019_v29 = vrot.slane %v6259_v16, 2 }
 0x1a2   : > { %7995 = vst [vmem:[#allocation27_spill] sm:$0xff] %v6267_v50  ;;  %v1729_v8 = vmax.f32 %v1631_v43, %v1691_v0  ;;  %v1629_v11 = vld [vmem:[#allocation2 + $0x140] ss:$2 sm:$0xff]  ;;  %v1689_v23 = vld [vmem:[#allocation2 + $0x141] ss:$2 sm:$0xff]  ;;  %v7938_v19 = vrot.slane %v6262_v41, 7 }
 0x1a3   : > { %v1728_v27 = vmax.f32 %v1629_v11, %v1689_v23  ;;  %v5147_v43 = vpop.f32.mrb[92].mxu0  ;;  %1967 = vrot.lane.b32.xlu1 %v6277_v15, %s5428_s23  ;;  %v6285_v0 = vor.u32 %v2019_v29, %v2018_v62  ;;  %v1783_v23 = vld [vmem:[#allocation3] sm:$0xfc] }
 0x1a4   : > { %v1367_v39 = vadd.f32 %v6106_v17, %v5147_v43  ;;  %2159 = vrot.lane.b32.xlu0 %v6277_v15, %s5429_s30  ;;  %v1358_v59 = vpop.f32.mrb[93].mxu0  ;;  %v2834_v31 = vor.u32 %v7938_v19, %v6259_v16  ;;  %v6309_v43 = vpop.permute.xlu0 %2086  ;;  %v7999_v19 = vrot.slane %v6180_v35, 7 }
 0x1a5   : > { %v1748_v49 = vpack.c.bf16 %v1729_v8, %v1728_v27  ;;  %v1359_v62 = vadd.f32 %v6106_v17, %v1358_v59  ;;  %v5148_v29 = vpop.f32.mrb[94].mxu0  ;;  %v6299_v11 = vpop.permute.xlu1 %1957  ;;  %v6304_v53 = vsel %vm1977_vm4, %v6200_v32, %v6285_v0  ;;  %v3125_v59 = vshrl.u32 %v6215_v45, 16 }
 0x1a6   : > { %7998 = vst [vmem:[#allocation29_spill] sm:$0xff] %v6304_v53  ;;  %v1515_v57 = vmax.f32 %v1351_v21, %v1367_v39  ;;  %v1370_v27 = vadd.f32 %v6106_v17, %v5148_v29  ;;  %v1361_v8 = vpop.f32.mrb[95].mxu0  ;;  %v3128_v36 = vshll.u32 %v6304_v53, 16  ;;  %v6321_v24 = vsel %vm2818_vm6, %v7999_v19, %v2834_v31  ;;  %v6323_v21 = vld [vmem:[#allocation3 + $0x8] sm:$0xff]  ;;  %v5403_v39 = vld [vmem:[#allocation3] sm:$0xff] }
 0x1a7   : > { %1763 = vst.msk [vmem:[#allocation3 + $0x50] sm:$0xff] %vm775_vm0, %v1748_v49  ;;  %v1513_v15 = vmax.f32 %v1343_v38, %v1359_v62  ;;  %v1362_v32 = vadd.f32 %v6106_v17, %v1361_v8  ;;  %1909 = vrot.lane.b32.xlu1 %v6296_v60, %s5427_s18  ;;  %8000 = vst [vmem:[#allocation30_spill] sm:$0xff] %v6321_v24  ;;  %v3127_v38 = vor.u32 %v3125_v59, %v6236_v48  ;;  %v5430_v62 = vmov 0  }
 0x1a8   : > { %1575 = vst.msk [vmem:[#allocation2 + $0x170] sm:$0xff] %vm775_vm0, %v1515_v57  ;;  %v1516_v29 = vmax.f32 %v1354_v28, %v1370_v27  ;;  %2129 = vrot.lane.b32.xlu0 %v6296_v60, %s5428_s23  ;;  %v6330_v49 = vrot.slane %v3128_v36, 1  ;;  %1768 = vst.msk [vmem:[#allocation3 + $0x78] sm:$0xff] %vm775_vm0, %v5430_v62  ;;  %v2060_v8 = vrot.slane %v1783_v23, 2  ;;  %v2387_v57 = vsel %vm775_vm0, %v5403_v39, %v1898_v25  ;;  %v2150_v23 = vpop.permute.xlu0 %2149 }
 0x1a9   : > { %1573 = vst.msk [vmem:[#allocation2 + $0x160] sm:$0xff] %vm775_vm0, %v1513_v15  ;;  %v1514_v19 = vmax.f32 %v1346_v13, %v1362_v32  ;;  %v6334_v31 = vpop.permute.xlu1 %2201  ;;  %v7940_v48 = vrot.slane %v6172_v22, 1  ;;  %v8002_v13 = vrot.slane %v6323_v21, 2  ;;  %v8003_v59 = vmov 0.0  }
 0x1aa   : > { %8001 = vst [vmem:[#allocation31_spill] sm:$0xff] %v6334_v31  ;;  %1576 = vst.msk [vmem:[#allocation2 + $0x178] sm:$0xff] %vm775_vm0, %v1516_v29  ;;  %v3131_v28 = vsel %vm1804_vm3, %v3127_v38, %v6330_v49  ;;  %v2410_v29 = vsel %vm2408_vm7, %v2387_v57, %v6224_v7  ;;  %v8004_v62 = vrot.slane %v6088_v10, 1 }
 0x1ab   : > { %1574 = vst.msk [vmem:[#allocation2 + $0x168] sm:$0xff] %vm775_vm0, %v1514_v19  ;;  %5190 = vmatmul.mubr.msk.bf16.gmra.mrb[132].mxu0 %vm775_vm0, %v3131_v28  ;;  %2047 = vrot.lane.b32.xlu1 %v6131_v51, %s5429_s30  ;;  %v5151_v15 = vpop.f32.mrb[96].mxu0  ;;  %v2062_v25 = vsel %vm2059_vm5, %v2060_v8, %v8002_v13 }
 0x1ac   : > { %2319 = vrot.lane.b32.xlu0 %v6131_v51, %s5427_s18  ;;  %v1374_v27 = vpop.f32.mrb[97].mxu0  ;;  %5193 = vmatprep.mubr.msk.bf16.mxu0 %vm5426_vm1, %v8003_v59  ;;  %v2467_v36 = vsel %vm775_vm0, %v2062_v25, %v6245_v52  ;;  %v6362_v8 = vsel %vm1931_vm2, %v8004_v62, %v7940_v48  ;;  %v5366_v52 = vld [vmem:[%s7924_s3 + $0x80] sm:$0xff]   ;;  %v5367_v25 = vld [vmem:[%s7924_s3 + $0xc8] sm:$0xff]  }
 0x1ad   : > { %v2120_v32 = vpop.permute.xlu1 %2119  ;;  %v5152_v39 = vpop.f32.mrb[98].mxu0  ;;  %8005 = vst [vmem:[#allocation32_spill] sm:$0xff] %v6362_v8 }
 0x1ae   : > { %v2499_v38 = vsel %vm2408_vm7, %v2467_v36, %v2120_v32  ;;  %v1377_v19 = vpop.f32.mrb[99].mxu0  ;;  %v6365_v13 = vld [vmem:[#allocation3 + $0x50] sm:$0xff]  ;;  %v2433_v36 = vsel %vm2431_vm8, %v2410_v29, %v6251_v55  ;;  %v8006_v32 = vrot.slane %v6095_v1, 1  ;;  %v1383_v55 = vadd.f32 %v6106_v17, %v5151_v15  ;;  %v5368_v29 = vld [vmem:[%s7924_s3 + $0x88] sm:$0xff]  }
 0x1af   : > { %1969 = vrot.lane.b32.xlu1 %v6362_v8, %s5428_s23  ;;  %v2521_v7 = vsel %vm2431_vm8, %v2499_v38, %v2150_v23  ;;  %v6374_v57 = vshll.u32 %v6365_v13, 16  ;;  %v6377_v10 = vshrl.u32 %v6365_v13, 16  ;;  %v8007_v1 = vrot.slane %v6177_v34, 1  ;;  %v5369_v15 = vld [vmem:[%s7924_s3 + $0xd0] sm:$0xff]  }
 0x1b0   : > { %2098 = vrot.lane.b32.xlu0 %v6172_v22, %s5427_s18  ;;  %3778 = vmatprep.mubr.bf16.mxu1 %v2521_v7  ;;  %v1867_v23 = vor.u32 %v6098_v42, %v8006_v32  ;;  %v1375_v32 = vadd.f32 %v6106_v17, %v1374_v27  ;;  %v7949_v27 = vrot.slane %v6254_v20, 1 }
 0x1b1   : > { %v1635_v38 = vld [vmem:[#allocation2 + $0x170] ss:$2 sm:$0xff]  ;;  %v1695_v62 = vld [vmem:[#allocation2 + $0x171] ss:$2 sm:$0xff]  ;;  %v6389_v48 = vpop.permute.xlu1 %1899  ;;  %3779 = vmatmul.mubr.bf16.vlgmr.msra.gmra.mrb[0].mxu1 %v2433_v36  ;;  %v6391_v28 = vpop.permute.xlu0 %2088  ;;  %v2022_v51 = vrot.slane %v6377_v10, 1  ;;  %v2023_v44 = vrot.slane %v6374_v57, 2 }
 0x1b2   : > { %v1731_v18 = vmax.f32 %v1635_v38, %v1695_v62  ;;  %v1633_v7 = vld [vmem:[#allocation2 + $0x160] ss:$2 sm:$0xff]  ;;  %v1693_v46 = vld [vmem:[#allocation2 + $0x161] ss:$2 sm:$0xff]  ;;  %v6399_v42 = vsel %vm1804_vm3, %v1867_v23, %v8007_v1  ;;  %4859 = vmatpush3.bf16.msra.mxu1 %v5366_v52  ;;  %v1386_v52 = vadd.f32 %v6106_v17, %v5152_v39 }
 0x1b3   : > { %v1730_v36 = vmax.f32 %v1633_v7, %v1693_v46  ;;  %v5155_v12 = vpop.f32.mrb[100].mxu0  ;;  %1911 = vrot.lane.b32.xlu1 %v6399_v42, %s5427_s18  ;;  %v6407_v38 = vor.u32 %v2023_v44, %v2022_v51  ;;  %4860 = vmatprep.subr.bf16.mxu1 %v5367_v25  ;;  %v1378_v7 = vadd.f32 %v6106_v17, %v1377_v19 }
 0x1b4   : > { %v1399_v23 = vadd.f32 %v6106_v17, %v5155_v12  ;;  %2161 = vrot.lane.b32.xlu0 %v6362_v8, %s5429_s30  ;;  %v1390_v46 = vpop.f32.mrb[101].mxu0 }
 0x1b5   : > { %v1749_v62 = vpack.c.bf16 %v1731_v18, %v1730_v36  ;;  %v1391_v44 = vadd.f32 %v6106_v17, %v1390_v46  ;;  %v5156_v51 = vpop.f32.mrb[102].mxu0  ;;  %v6419_v25 = vpop.permute.xlu1 %2037  ;;  %v6424_v39 = vsel %vm1977_vm4, %v6285_v0, %v6407_v38  ;;  %v3146_v18 = vshrl.u32 %v6304_v53, 16  ;;  %v5370_v36 = vld [vmem:[%s7924_s3 + $0x90] sm:$0xff]  }
 0x1b6   : > { %8008 = vst [vmem:[#allocation33_spill] sm:$0xff] %v6424_v39  ;;  %v1519_v12 = vmax.f32 %v1383_v55, %v1399_v23  ;;  %v1402_v1 = vadd.f32 %v6106_v17, %v5156_v51  ;;  %v6427_v8 = vpop.permute.xlu0 %2364  ;;  %v1393_v50 = vpop.f32.mrb[103].mxu0  ;;  %v3149_v19 = vshll.u32 %v6424_v39, 16  ;;  %4861 = vmatpush3.bf16.msra.mxu1 %v5368_v29  ;;  %v7947_v51 = vrot.slane %v6377_v10, 7 }
 0x1b7   : > { %8009 = vst [vmem:[#allocation34_spill] sm:$0xff] %v6427_v8  ;;  %1764 = vst.msk [vmem:[#allocation3 + $0x58] sm:$0xff] %vm775_vm0, %v1749_v62  ;;  %v1517_v46 = vmax.f32 %v1375_v32, %v1391_v44  ;;  %v1394_v0 = vadd.f32 %v6106_v17, %v1393_v50  ;;  %2049 = vrot.lane.b32.xlu1 %v6215_v45, %s5429_s30  ;;  %4862 = vmatprep.subr.bf16.mxu1 %v5369_v15  ;;  %v5371_v15 = vld [vmem:[%s7924_s3 + $0xd8] sm:$0xff]   ;;  %v8011_v62 = vrot.slane %v6172_v22, 1 }
 0x1b8   : > { %1579 = vst.msk [vmem:[#allocation2 + $0x190] sm:$0xff] %vm775_vm0, %v1519_v12  ;;  %v1520_v55 = vmax.f32 %v1386_v52, %v1402_v1  ;;  %2131 = vrot.lane.b32.xlu0 %v6399_v42, %s5428_s23  ;;  %v3148_v29 = vor.u32 %v3146_v18, %v6330_v49  ;;  %v6442_v23 = vrot.slane %v3149_v19, 1  ;;  %v5372_v12 = vld [vmem:[%s7924_s3 + $0x98] sm:$0xff]   ;;  %v2837_v1 = vor.u32 %v7947_v51, %v6374_v57  ;;  %v5373_v19 = vld [vmem:[%s7924_s3 + $0xe0] sm:$0xff]  }
 0x1b9   : > { %1577 = vst.msk [vmem:[#allocation2 + $0x180] sm:$0xff] %vm775_vm0, %v1517_v46  ;;  %v1518_v32 = vmax.f32 %v1378_v7, %v1394_v0  ;;  %v6446_v50 = vpop.permute.xlu1 %2226  ;;  %v6461_v44 = vsel %vm1931_vm2, %v8011_v62, %v7949_v27  ;;  %v7948_v7 = vrot.slane %v6259_v16, 1  ;;  %v6492_v62 = vrot.slane %v6365_v13, 1 }
 0x1ba   : > { %8010 = vst [vmem:[#allocation35_spill] sm:$0xff] %v6446_v50  ;;  %1580 = vst.msk [vmem:[#allocation2 + $0x198] sm:$0xff] %vm775_vm0, %v1520_v55  ;;  %v6452_v52 = vpop.permute.xlu0 %2151  ;;  %v3152_v49 = vsel %vm1804_vm3, %v3148_v29, %v6442_v23  ;;  %4863 = vmatpush3.bf16.msra.mxu1 %v5370_v36  ;;  %v8013_v36 = vrot.slane %v6177_v34, 1  ;;  %v8014_v55 = vrot.slane %v6262_v41, 7 }
 0x1bb   : > { %8012 = vst [vmem:[#allocation36_spill] sm:$0xff] %v6461_v44  ;;  %1578 = vst.msk [vmem:[#allocation2 + $0x188] sm:$0xff] %vm775_vm0, %v1518_v32  ;;  %5194 = vmatmul.mubr.msk.bf16.gmra.mrb[136].mxu0 %vm775_vm0, %v3152_v49  ;;  %1971 = vrot.lane.b32.xlu1 %v6461_v44, %s5428_s23  ;;  %v5159_v18 = vpop.f32.mrb[104].mxu0 }
 0x1bc   : > { %2100 = vrot.lane.b32.xlu0 %v6254_v20, %s5427_s18  ;;  %v1875_v46 = vor.u32 %v6180_v35, %v8013_v36  ;;  %v1406_v0 = vpop.f32.mrb[105].mxu0  ;;  %5197 = vmatprep.mubr.msk.bf16.mxu0 %vm5426_vm1, %v8003_v59  ;;  %v6487_v29 = vsel %vm2818_vm6, %v8014_v55, %v2837_v1  ;;  %v5374_v1 = vld [vmem:[%s7924_s3 + $0xa0] sm:$0xff]   ;;  %v2389_v55 = vsel %vm775_vm0, %v6323_v21, %v6389_v48  ;;  %v5375_v48 = vld [vmem:[%s7924_s3 + $0xe8] sm:$0xff]  }
 0x1bd   : > { %8015 = vst [vmem:[#allocation37_spill] sm:$0xff] %v6487_v29  ;;  %v6489_v32 = vpop.permute.xlu1 %1959  ;;  %v5160_v49 = vpop.f32.mrb[106].mxu0  ;;  %4864 = vmatprep.subr.bf16.mxu1 %v5371_v15 }
 0x1be   : > { %v6494_v51 = vpop.permute.xlu0 %2341  ;;  %v6499_v34 = vsel %vm1804_vm3, %v1875_v46, %v7948_v7  ;;  %v1409_v35 = vpop.f32.mrb[107].mxu0  ;;  %v6501_v36 = vld [vmem:[#allocation3 + $0x58] sm:$0xff]  ;;  %4865 = vmatpush3.bf16.msra.mxu1 %v5372_v12  ;;  %v8017_v12 = vrot.slane %v6323_v21, 2 }
 0x1bf   : > { %8016 = vst [vmem:[#allocation38_spill] sm:$0xff] %v6494_v51  ;;  %1913 = vrot.lane.b32.xlu1 %v6499_v34, %s5427_s18  ;;  %v6512_v15 = vshll.u32 %v6501_v36, 16  ;;  %v6515_v46 = vshrl.u32 %v6501_v36, 16  ;;  %4866 = vmatprep.subr.bf16.mxu1 %v5373_v19  ;;  %v8019_v19 = vrot.slane %v6254_v20, 1  ;;  %v1415_v51 = vadd.f32 %v6106_v17, %v5159_v18 }
 0x1c0   : > { %v2064_v7 = vsel %vm2059_vm5, %v8017_v12, %v5782_v40  ;;  %2163 = vrot.lane.b32.xlu0 %v6461_v44, %s5429_s30  ;;  %v1418_v18 = vadd.f32 %v6106_v17, %v5160_v49 }
 0x1c1   : > { %v2470_v27 = vsel %vm775_vm0, %v2064_v7, %v6309_v43  ;;  %v1639_v50 = vld [vmem:[#allocation2 + $0x190] ss:$2 sm:$0xff]  ;;  %v1699_v6 = vld [vmem:[#allocation2 + $0x191] ss:$2 sm:$0xff]  ;;  %v6528_v31 = vpop.permute.xlu1 %2203  ;;  %v6534_v21 = vsel %vm1931_vm2, %v8019_v19, %v6492_v62  ;;  %v2180_v40 = vrot.slane %v6515_v46, 1  ;;  %v2181_v12 = vrot.slane %v6512_v15, 2 }
 0x1c2   : > { %8018 = vst [vmem:[#allocation39_spill] sm:$0xff] %v6528_v31  ;;  %8020 = vst [vmem:[#allocation40_spill] sm:$0xff] %v6534_v21  ;;  %v1733_v44 = vmax.f32 %v1639_v50, %v1699_v6  ;;  %v1637_v54 = vld [vmem:[#allocation2 + $0x180] ss:$2 sm:$0xff]  ;;  %v1697_v8 = vld [vmem:[#allocation2 + $0x181] ss:$2 sm:$0xff]  ;;  %v1407_v43 = vadd.f32 %v6106_v17, %v1406_v0  ;;  %v2122_v7 = vpop.permute.xlu0 %2121  ;;  %v2412_v31 = vsel %vm2408_vm7, %v2389_v55, %v6299_v11  ;;  %4867 = vmatpush3.bf16.msra.mxu1 %v5374_v1 }
 0x1c3   : > { %v1732_v26 = vmax.f32 %v1637_v54, %v1697_v8  ;;  %v2501_v19 = vsel %vm2408_vm7, %v2470_v27, %v2122_v7  ;;  %v5163_v30 = vpop.f32.mrb[108].mxu0  ;;  %2051 = vrot.lane.b32.xlu1 %v6304_v53, %s5429_s30  ;;  %v6545_v29 = vor.u32 %v2181_v12, %v2180_v40  ;;  %v7953_v6 = vrot.slane %v6374_v57, 1  ;;  %4868 = vmatprep.subr.bf16.mxu1 %v5375_v48  ;;  %v5376_v50 = vld [vmem:[%s7924_s3 + $0xa8] sm:$0xff]  }
 0x1c4   : > { %v1431_v11 = vadd.f32 %v6106_v17, %v5163_v30  ;;  %2133 = vrot.lane.b32.xlu0 %v6499_v34, %s5428_s23  ;;  %v1422_v54 = vpop.f32.mrb[109].mxu0  ;;  %v2524_v8 = vsel %vm2431_vm8, %v2501_v19, %v6452_v52  ;;  %v2436_v27 = vsel %vm2431_vm8, %v2412_v31, %v6419_v25  ;;  %v1410_v1 = vadd.f32 %v6106_v17, %v1409_v35 }
 0x1c5   : > { %v1750_v0 = vpack.c.bf16 %v1733_v44, %v1732_v26  ;;  %v1423_v55 = vadd.f32 %v6106_v17, %v1422_v54  ;;  %3786 = vmatprep.mubr.bf16.mxu1 %v2524_v8  ;;  %v5164_v48 = vpop.f32.mrb[110].mxu0  ;;  %v6561_v49 = vpop.permute.xlu1 %1901  ;;  %v6566_v30 = vsel %vm1977_vm4, %v6407_v38, %v6545_v29  ;;  %v3167_v31 = vshrl.u32 %v6424_v39, 16  ;;  %v1780_v44 = vld [vmem:[#allocation3 + $0x58] sm:$0x1] }
 0x1c6   : > { %8021 = vst [vmem:[#allocation41_spill] sm:$0xff] %v6566_v30  ;;  %v1523_v40 = vmax.f32 %v1415_v51, %v1431_v11  ;;  %v1434_v52 = vadd.f32 %v6106_v17, %v5164_v48  ;;  %3787 = vmatmul.mubr.bf16.gmra.mrb[4].mxu1 %v2436_v27  ;;  %v6569_v12 = vpop.permute.xlu0 %2311  ;;  %v1425_v26 = vpop.f32.mrb[111].mxu0  ;;  %v3170_v25 = vshll.u32 %v6566_v30, 16  ;;  %v8023_v54 = vrot.slane %v6259_v16, 1  ;;  %v1782_v8 = vld [vmem:[#allocation3 + $0x58] sm:$0x3] }
 0x1c7   : > { %8022 = vst [vmem:[#allocation42_spill] sm:$0xff] %v6569_v12  ;;  %1765 = vst.msk [vmem:[#allocation3 + $0x60] sm:$0xff] %vm775_vm0, %v1750_v0  ;;  %v1521_v35 = vmax.f32 %v1407_v43, %v1423_v55  ;;  %v1426_v7 = vadd.f32 %v6106_v17, %v1425_v26  ;;  %1973 = vrot.lane.b32.xlu1 %v6534_v21, %s5428_s23  ;;  %4869 = vmatpush3.bf16.msra.mxu1 %v5376_v50  ;;  %v1893_v50 = vshll.u32 %v1780_v44, 16 }
 0x1c8   : > { %1583 = vst.msk [vmem:[#allocation2 + $0x1b0] sm:$0xff] %vm775_vm0, %v1523_v40  ;;  %v1524_v51 = vmax.f32 %v1418_v18, %v1434_v52  ;;  %2102 = vrot.lane.b32.xlu0 %v6365_v13, %s5427_s18  ;;  %v3169_v19 = vor.u32 %v3167_v31, %v6442_v23  ;;  %v6581_v11 = vrot.slane %v3170_v25, 1  ;;  %v1883_v43 = vor.u32 %v6262_v41, %v8023_v54  ;;  %v5377_v40 = vld [vmem:[%s7924_s3 + $0xf0] sm:$0xff]  }
 0x1c9   : > { %1581 = vst.msk [vmem:[#allocation2 + $0x1a0] sm:$0xff] %vm775_vm0, %v1521_v35  ;;  %v1522_v27 = vmax.f32 %v1410_v1, %v1426_v7  ;;  %v6587_v0 = vpop.permute.xlu1 %2259  ;;  %v1953_v1 = vrot.slane %v1780_v44, 1  ;;  %v6604_v55 = vrot.slane %v6365_v13, 2  ;;  %v2081_v48 = vrot.slane %v1782_v8, 2  ;;  %v5378_v44 = vld [vmem:[%s7924_s3 + $0xb0] sm:$0xff]   ;;  %4870 = vmatprep.subr.bf16.mxu1 %v5377_v40 }
 0x1ca   : > { %8024 = vst [vmem:[#allocation43_spill] sm:$0xff] %v6587_v0  ;;  %1584 = vst.msk [vmem:[#allocation2 + $0x1b8] sm:$0xff] %vm775_vm0, %v1524_v51  ;;  %v6590_v18 = vpop.permute.xlu0 %2090  ;;  %v3173_v23 = vsel %vm1804_vm3, %v3169_v19, %v6581_v11  ;;  %v6597_v16 = vsel %vm1804_vm3, %v1883_v43, %v7953_v6  ;;  %v2027_v26 = vshrl.u32 %v1782_v8, 16  ;;  %v2030_v31 = vshll.u32 %v1782_v8, 16 }
 0x1cb   : > { %8025 = vst [vmem:[#allocation44_spill] sm:$0xff] %v6590_v18  ;;  %1582 = vst.msk [vmem:[#allocation2 + $0x1a8] sm:$0xff] %vm775_vm0, %v1522_v27  ;;  %5198 = vmatmul.mubr.msk.bf16.gmra.mrb[140].mxu0 %vm775_vm0, %v3173_v23  ;;  %1915 = vrot.lane.b32.xlu1 %v6597_v16, %s5427_s18  ;;  %v5167_v41 = vpop.f32.mrb[112].mxu0  ;;  %v7955_v25 = vrot.slane %v6515_v46, 7  ;;  %v1895_v51 = vrot.slane %v1893_v50, 1  ;;  %v6620_v19 = vrot.slane %v6501_v36, 1  ;;  %v6624_v54 = vsel %vm2059_vm5, %v6604_v55, %v2081_v48 }
 0x1cc   : > { %2165 = vrot.lane.b32.xlu0 %v6534_v21, %s5429_s30  ;;  %v1438_v52 = vpop.f32.mrb[113].mxu0  ;;  %5201 = vmatprep.mubr.msk.bf16.mxu0 %vm5426_vm1, %v8003_v59  ;;  %8026 = vst [vmem:[#allocation45_spill] sm:$0xff] %v6624_v54  ;;  %v1954_v50 = vsel %vm1931_vm2, %v6492_v62, %v1953_v1  ;;  %v8028_v48 = vrot.slane %v6374_v57, 1  ;;  %v8030_v57 = vrot.slane %v6377_v10, 7 }
 0x1cd   : > { %v6617_v35 = vpop.permute.xlu1 %2039  ;;  %v5168_v7 = vpop.f32.mrb[114].mxu0  ;;  %v2840_v6 = vor.u32 %v7955_v25, %v6512_v15  ;;  %4871 = vmatpush3.bf16.msra.mxu1 %v5378_v44  ;;  %v3188_v44 = vshrl.u32 %v6566_v30, 16  ;;  %v6652_v25 = vrot.slane %v2027_v26, 1  ;;  %v6670_v26 = vsel %vm1931_vm2, %v6492_v62, %v6620_v19 }
 0x1ce   : > { %v6626_v43 = vpop.permute.xlu0 %2366  ;;  %v1441_v8 = vpop.f32.mrb[115].mxu0  ;;  %v6628_v27 = vld [vmem:[#allocation3 + $0x60] sm:$0xff]  ;;  %v6641_v40 = vor.u32 %v6377_v10, %v8028_v48  ;;  %v1450_v14 = vadd.f32 %v6106_v17, %v5168_v7 }
 0x1cf   : > { %8027 = vst [vmem:[#allocation46_spill] sm:$0xff] %v6626_v43  ;;  %2053 = vrot.lane.b32.xlu1 %v6424_v39, %s5429_s30  ;;  %v6644_v21 = vshll.u32 %v6628_v27, 16  ;;  %v6647_v23 = vshrl.u32 %v6628_v27, 16  ;;  %v6654_v43 = vrot.slane %v2030_v31, 2  ;;  %v6656_v1 = vld [vmem:[#allocation3 + $0x60] sm:$0x3]  ;;  %v6661_v48 = vsel %vm2818_vm6, %v8030_v57, %v2840_v6 }
 0x1d0   : > { %2135 = vrot.lane.b32.xlu0 %v6597_v16, %s5428_s23  ;;  %8029 = vst [vmem:[#allocation47_spill] sm:$0xff] %v6656_v1  ;;  %8031 = vst [vmem:[#allocation48_spill] sm:$0xff] %v6661_v48  ;;  %v1896_v63 = vsel %vm1804_vm3, %v6641_v40, %v1895_v51  ;;  %v1447_v57 = vadd.f32 %v6106_v17, %v5167_v41  ;;  %v1439_v48 = vadd.f32 %v6106_v17, %v1438_v52 }
 0x1d1   : > { %v1643_v0 = vld [vmem:[#allocation2 + $0x1b0] ss:$2 sm:$0xff]  ;;  %v1703_v54 = vld [vmem:[#allocation2 + $0x1b1] ss:$2 sm:$0xff]  ;;  %v6663_v12 = vpop.permute.xlu1 %2228  ;;  %v2298_v31 = vrot.slane %v6647_v23, 1  ;;  %v2299_v56 = vrot.slane %v6644_v21, 2  ;;  %v1442_v41 = vadd.f32 %v6106_v17, %v1441_v8 }
 0x1d2   : > { %8032 = vst [vmem:[#allocation49_spill] sm:$0xff] %v6663_v12  ;;  %v1735_v10 = vmax.f32 %v1643_v0, %v1703_v54  ;;  %v1641_v24 = vld [vmem:[#allocation2 + $0x1a0] ss:$2 sm:$0xff]  ;;  %v1701_v6 = vld [vmem:[#allocation2 + $0x1a1] ss:$2 sm:$0xff]  ;;  %v6676_v12 = vpop.permute.xlu0 %2153  ;;  %v8033_v51 = vrot.slane %v6512_v15, 1 }
 0x1d3   : > { %v1734_v62 = vmax.f32 %v1641_v24, %v1701_v6  ;;  %v5171_v3 = vpop.f32.mrb[116].mxu0  ;;  %1975 = vrot.lane.b32.xlu1 %v1954_v50, %s5428_s23  ;;  %v6685_v0 = vor.u32 %v2299_v56, %v2298_v31  ;;  %v2249_v54 = vrot.slane %v6644_v21, 1  ;;  %v2188_v24 = vshll.u32 %v6656_v1, 16 }
 0x1d4   : > { %v6681_v47 = vor.u32 %v6515_v46, %v8033_v51  ;;  %v1463_v52 = vadd.f32 %v6106_v17, %v5171_v3  ;;  %2104 = vrot.lane.b32.xlu0 %v6501_v36, %s5427_s18  ;;  %v1454_v58 = vpop.f32.mrb[117].mxu0  ;;  %v2185_v51 = vshrl.u32 %v6656_v1, 16 }
 0x1d5   : > { %v1751_v7 = vpack.c.bf16 %v1735_v10, %v1734_v62  ;;  %v1455_v6 = vadd.f32 %v6106_v17, %v1454_v58  ;;  %v5172_v50 = vpop.f32.mrb[118].mxu0  ;;  %v6695_v56 = vpop.permute.xlu1 %1961  ;;  %v6700_v8 = vsel %vm1977_vm4, %v6545_v29, %v6685_v0  ;;  %v2033_v62 = vor.u32 %v6654_v43, %v6652_v25  ;;  %v5380_v25 = vld [vmem:[%s7924_s3 + $0xb8] sm:$0xff]  }
 0x1d6   : > { %v6704_v3 = vsel %vm1804_vm3, %v6681_v47, %v2249_v54  ;;  %v1527_v31 = vmax.f32 %v1447_v57, %v1463_v52  ;;  %v1466_v33 = vadd.f32 %v6106_v17, %v5172_v50  ;;  %v6707_v4 = vpop.permute.xlu0 %2343  ;;  %v1457_v10 = vpop.f32.mrb[119].mxu0  ;;  %v3192_v58 = vshll.u32 %v6700_v8, 16  ;;  %v5379_v52 = vld [vmem:[%s7924_s3 + $0xf8] sm:$0xff]  }
 0x1d7   : > { %8034 = vst [vmem:[#allocation50_spill] sm:$0xff] %v6704_v3  ;;  %1766 = vst.msk [vmem:[#allocation3 + $0x68] sm:$0xff] %vm775_vm0, %v1751_v7  ;;  %v1525_v1 = vmax.f32 %v1439_v48, %v1455_v6  ;;  %v1458_v30 = vadd.f32 %v6106_v17, %v1457_v10  ;;  %1917 = vrot.lane.b32.xlu1 %v1896_v63, %s5427_s18  ;;  %v3190_v3 = vor.u32 %v3188_v44, %v6581_v11  ;;  %v1785_v63 = vld [vmem:[#allocation3 + $0x60] sm:$0x1] }
 0x1d8   : > { %v6717_v57 = vor.u32 %v6647_v23, %v2249_v54  ;;  %1587 = vst.msk [vmem:[#allocation2 + $0x1d0] sm:$0xff] %vm775_vm0, %v1527_v31  ;;  %v1528_v43 = vmax.f32 %v1450_v14, %v1466_v33  ;;  %2167 = vrot.lane.b32.xlu0 %v6670_v26, %s5429_s30  ;;  %v6728_v17 = vrot.slane %v3192_v58, 1  ;;  %v2187_v11 = vrot.slane %v2185_v51, 1  ;;  %v5404_v54 = vld [vmem:[#allocation3 + $0x10] sm:$0xff]  ;;  %4872 = vmatprep.subr.bf16.mxu1 %v5379_v52 }
 0x1d9   : > { %v2190_v44 = vrot.slane %v2188_v24, 2  ;;  %v2473_v48 = vsel %vm775_vm0, %v5874_v5, %v6391_v28  ;;  %v2391_v7 = vsel %vm775_vm0, %v5404_v54, %v6561_v49  ;;  %1585 = vst.msk [vmem:[#allocation2 + $0x1c0] sm:$0xff] %vm775_vm0, %v1525_v1  ;;  %v1526_v6 = vmax.f32 %v1442_v41, %v1458_v30  ;;  %v6736_v33 = vpop.permute.xlu1 %2205  ;;  %4873 = vmatpush3.bf16.msra.mxu1 %v5380_v25 }
 0x1da   : > { %v2842_v14 = vrot.slane %v6647_v23, 7  ;;  %1588 = vst.msk [vmem:[#allocation2 + $0x1d8] sm:$0xff] %vm775_vm0, %v1528_v43  ;;  %v2124_v51 = vpop.permute.xlu0 %2123  ;;  %v3195_v24 = vsel %vm1804_vm3, %v3190_v3, %v6728_v17  ;;  %v2034_v5 = vsel %vm1977_vm4, %v6407_v38, %v2033_v62  ;;  %v8035_v28 = vrot.slane %v6512_v15, 1  ;;  %v6782_v62 = vld [vmem:[#allocation3 + $0x30] sm:$0xff] }
 0x1db   : > { %v2191_v30 = vor.u32 %v2190_v44, %v2187_v11  ;;  %1586 = vst.msk [vmem:[#allocation2 + $0x1c8] sm:$0xff] %vm775_vm0, %v1526_v6  ;;  %v2503_v1 = vsel %vm2408_vm7, %v2473_v48, %v2124_v51  ;;  %5202 = vmatmul.mubr.msk.bf16.gmra.mrb[144].mxu0 %vm775_vm0, %v3195_v24  ;;  %2055 = vrot.lane.b32.xlu1 %v2034_v5, %s5429_s30  ;;  %v2147_v41 = vrot.slane %v1785_v63, 1  ;;  %v2115_v50 = vshll.u32 %v1785_v63, 16  ;;  %v6798_v51 = vld [vmem:[#allocation3 + $0x38] sm:$0xff] }
 0x1dc   : > { %v6748_v49 = vsel %vm1804_vm3, %v6641_v40, %v8035_v28  ;;  %v2843_v38 = vor.u32 %v2842_v14, %v6644_v21  ;;  %v2527_v15 = vsel %vm2431_vm8, %v2503_v1, %v6676_v12  ;;  %v2414_v40 = vsel %vm2408_vm7, %v2391_v7, %v6489_v32  ;;  %5205 = vmatprep.mubr.msk.bf16.mxu0 %vm5426_vm1, %v8003_v59  ;;  %v5381_v1 = vld [vmem:[%s7924_s3 + $0x140] sm:$0xff]  }
 0x1dd   : > { %2137 = vrot.lane.b32.xlu0 %v6748_v49, %s5428_s23  ;;  %v6767_v3 = vsel %vm1977_vm4, %v6545_v29, %v2191_v30  ;;  %3794 = vmatprep.mubr.bf16.mxu1 %v2527_v15  ;;  %v6769_v31 = vpop.permute.xlu1 %1903  ;;  %v2439_v21 = vsel %vm2431_vm8, %v2414_v40, %v6617_v35  ;;  %v8037_v10 = vrot.slane %v6515_v46, 7  ;;  %v2148_v29 = vsel %vm1931_vm2, %v6620_v19, %v2147_v41 }
 0x1de   : > { %8036 = vst [vmem:[#allocation51_spill] sm:$0xff] %v6767_v3  ;;  %3795 = vmatmul.mubr.bf16.gmra.mrb[8].mxu1 %v2439_v21  ;;  %v6778_v32 = vpop.permute.xlu0 %2313  ;;  %v6780_v58 = vld [vmem:[#allocation3 + $0x68] sm:$0xff]  ;;  %v2117_v52 = vrot.slane %v2115_v50, 1  ;;  %v2073_v24 = vrot.slane %v6798_v51, 2  ;;  %4940 = vmatprep.subr.bf16.mxu1 %v5381_v1  ;;  %v8039_v40 = vrot.slane %v6011_v9, 2 }
 0x1df   : > { %v6776_v12 = vsel %vm2818_vm6, %v8037_v10, %v2843_v38  ;;  %2232 = vrot.lane.b32.xlu1 %v6782_v62, %s5428_s23  ;;  %v2738_v35 = vshll.u32 %v6780_v58, 16  ;;  %v6790_v46 = vshrl.u32 %v6780_v58, 16  ;;  %v6811_v41 = vld [vmem:[#allocation3 + $0x68] sm:$0x1]  ;;  %v3210_v10 = vshrl.u32 %v6700_v8, 16 }
 0x1e0   : > { %8038 = vst [vmem:[#allocation52_spill] sm:$0xff] %v6776_v12  ;;  %v2118_v28 = vsel %vm1804_vm3, %v6681_v47, %v2117_v52  ;;  %v6823_v21 = vsel %vm2059_vm5, %v8039_v40, %v2073_v24  ;;  %v6827_v52 = vld [vmem:[#allocation3 + $0x78] sm:$0x3] }
 0x1e1   : > { %2169 = vrot.lane.b32.xlu0 %v2148_v29, %s5429_s30  ;;  %v1647_v25 = vld [vmem:[#allocation2 + $0x1d0] ss:$2 sm:$0xff]  ;;  %v1707_v43 = vld [vmem:[#allocation2 + $0x1d1] ss:$2 sm:$0xff]  ;;  %v6793_v63 = vpop.permute.xlu1 %2261  ;;  %v2793_v11 = vrot.slane %v6790_v46, 1  ;;  %v2794_v44 = vrot.slane %v2738_v35, 2 }
 0x1e2   : > { %v1737_v48 = vmax.f32 %v1647_v25, %v1707_v43  ;;  %v1645_v54 = vld [vmem:[#allocation2 + $0x1c0] ss:$2 sm:$0xff]  ;;  %v1705_v7 = vld [vmem:[#allocation2 + $0x1c1] ss:$2 sm:$0xff]  ;;  %v6796_v6 = vpop.permute.xlu0 %2092  ;;  %v2740_v50 = vrot.slane %v2738_v35, 1  ;;  %v6833_v25 = vrot.slane %v6628_v27, 1 }
 0x1e3   : > { %v1736_v5 = vmax.f32 %v1645_v54, %v1705_v7  ;;  %2267 = vrot.lane.b32.xlu1 %v6296_v60, %s5429_s30  ;;  %v6805_v30 = vor.u32 %v2794_v44, %v2793_v11  ;;  %v2287_v11 = vrot.slane %v6811_v41, 1  ;;  %v3212_v44 = vor.u32 %v3210_v10, %v6728_v17 }
 0x1e4   : > { %v6837_v9 = vsel %vm1804_vm3, %v6717_v57, %v2740_v50  ;;  %v6840_v43 = vor.u32 %v6790_v46, %v2740_v50  ;;  %v7965_v54 = vrot.slane %v6790_v46, 7 }
 0x1e5   : > { %2139 = vrot.lane.b32.xlu0 %v2118_v28, %s5428_s23  ;;  %v1752_v38 = vpack.c.bf16 %v1737_v48, %v1736_v5  ;;  %v2042_v15 = vpop.permute.xlu1 %2041  ;;  %v6816_v60 = vsel %vm1977_vm4, %v6685_v0, %v6805_v30  ;;  %v2930_v5 = vshrl.u32 %v6827_v52, 16  ;;  %v2933_v28 = vshll.u32 %v6827_v52, 16 }
 0x1e6   : > { %v6818_v47 = vpop.permute.xlu0 %2368  ;;  %v3214_v29 = vshll.u32 %v6816_v60, 16  ;;  %v6853_v1 = vsel %vm1931_vm2, %v6833_v25, %v2287_v11  ;;  %v2846_v40 = vor.u32 %v7965_v54, %v2738_v35 }
 0x1e7   : > { %1767 = vst.msk [vmem:[#allocation3 + $0x70] sm:$0xff] %vm775_vm0, %v1752_v38  ;;  %2211 = vrot.lane.b32.xlu1 %v6823_v21, %s5427_s18  ;;  %8041 = vst [vmem:[#allocation54_spill] sm:$0xff] %v6853_v1  ;;  %v2935_v35 = vrot.slane %v2933_v28, 2 }
 0x1e8   : > { %v3216_v48 = vrot.slane %v3214_v29, 1  ;;  %v6868_v17 = vsel %vm2818_vm6, %v2842_v14, %v2846_v40  ;;  %v6872_v29 = vrot.slane %v2930_v5, 1  ;;  %v5407_v14 = vld [vmem:[#allocation3 + $0x18] sm:$0xff] }
 0x1e9   : > { %2349 = vrot.lane.b32.xlu0 %v6823_v21, %s5428_s23  ;;  %v6847_v7 = vpop.permute.xlu1 %2230  ;;  %8042 = vst [vmem:[#allocation55_spill] sm:$0xff] %v6868_v17  ;;  %v2393_v5 = vsel %vm775_vm0, %v5407_v14, %v6769_v31 }
 0x1ea   : > { %8040 = vst [vmem:[#allocation53_spill] sm:$0xff] %v6847_v7  ;;  %v2156_v50 = vpop.permute.xlu0 %2155  ;;  %v3217_v38 = vsel %vm1804_vm3, %v3212_v44, %v3216_v48  ;;  %v2075_v44 = vrot.slane %v6172_v22, 2  ;;  %v2936_v17 = vor.u32 %v2935_v35, %v6872_v29  ;;  %v2416_v14 = vsel %vm2408_vm7, %v2393_v5, %v6695_v56  ;;  %v6921_v5 = vld [vmem:[#allocation3 + $0x40] sm:$0xff] }
 0x1eb   : > { %5206 = vmatmul.mubr.msk.bf16.gmra.mrb[148].mxu0 %vm775_vm0, %v3217_v38  ;;  %2234 = vrot.lane.b32.xlu1 %v6798_v51, %s5428_s23  ;;  %v3232_v56 = vshrl.u32 %v6816_v60, 16 }
 0x1ec   : > { %5209 = vmatprep.mubr.msk.bf16.mxu0 %vm5426_vm1, %v8003_v59  ;;  %v6897_v3 = vsel %vm2059_vm5, %v2073_v24, %v2075_v44 }
 0x1ed   : > { %2372 = vrot.lane.b32.xlu0 %v6798_v51, %s5429_s30  ;;  %v6870_v10 = vpop.permute.xlu1 %1963 }
 0x1ee   : > { %v6874_v11 = vpop.permute.xlu0 %2345  ;;  %v6877_v38 = vld [vmem:[#allocation3 + $0x70] sm:$0xff] }
 0x1ef   : > { %2269 = vrot.lane.b32.xlu1 %v6399_v42, %s5429_s30  ;;  %v6882_v54 = vshrl.u32 %v6877_v38, 16  ;;  %v2852_v23 = vshll.u32 %v6877_v38, 16  ;;  %v2476_v42 = vsel %vm775_vm0, %v5951_v61, %v6590_v18 }
 0x1f1   : > { %8043 = vst [vmem:[#allocation56_spill] sm:$0xff] %v6882_v54  ;;  %2321 = vrot.lane.b32.xlu0 %v6215_v45, %s5427_s18  ;;  %v6889_v28 = vpop.permute.xlu1 %2207  ;;  %v2925_v22 = vrot.slane %v6882_v54, 1  ;;  %v2926_v40 = vrot.slane %v2852_v23, 2  ;;  %v2874_v1 = vrot.slane %v2852_v23, 1  ;;  %v7969_v7 = vrot.slane %v6882_v54, 7 }
 0x1f2   : > { %8044 = vst [vmem:[#allocation57_spill] sm:$0xff] %v6889_v28  ;;  %v2126_v12 = vpop.permute.xlu0 %2125 }
 0x1f3   : > { %v2505_v45 = vsel %vm2408_vm7, %v2476_v42, %v2126_v12  ;;  %2213 = vrot.lane.b32.xlu1 %v6897_v3, %s5427_s18  ;;  %v2927_v31 = vor.u32 %v2926_v40, %v2925_v22  ;;  %v6909_v61 = vsel %vm1804_vm3, %v6840_v43, %v2874_v1  ;;  %v6912_v24 = vor.u32 %v2874_v1, %v6882_v54  ;;  %v8054_v54 = vld [vmem:[#allocation18_spill] sm:$0xff] }
 0x1f4   : > { %v2530_v35 = vsel %vm2431_vm8, %v2505_v45, %v2156_v50  ;;  %v2442_v42 = vsel %vm2431_vm8, %v2416_v14, %v2042_v15  ;;  %v3234_v15 = vor.u32 %v3232_v56, %v3216_v48 }
 0x1f5   : > { %2351 = vrot.lane.b32.xlu0 %v6897_v3, %s5428_s23  ;;  %3802 = vmatprep.mubr.bf16.mxu1 %v2530_v35  ;;  %v1906_v12 = vpop.permute.xlu1 %1905  ;;  %v2928_v22 = vsel %vm1977_vm4, %v6805_v30, %v2927_v31  ;;  %v2937_v40 = vsel %vm1977_vm4, %v2927_v31, %v2936_v17 }
 0x1f6   : > { %3803 = vmatmul.mubr.bf16.gmra.mrb[12].mxu1 %v2442_v42  ;;  %v6918_v45 = vpop.permute.xlu0 %2315  ;;  %v3236_v50 = vshll.u32 %v2928_v22, 16  ;;  %v3254_v35 = vshrl.u32 %v2928_v22, 16  ;;  %v3258_v14 = vshll.u32 %v2937_v40, 16  ;;  %v2077_v42 = vrot.slane %v6254_v20, 2 }
 0x1f7   : > { %2236 = vrot.lane.b32.xlu1 %v6921_v5, %s5428_s23 }
 0x1f8   : > { %v3238_v1 = vrot.slane %v3236_v50, 1  ;;  %v3260_v22 = vrot.slane %v3258_v14, 1  ;;  %v2854_v50 = vor.u32 %v2852_v23, %v7969_v7  ;;  %v3280_v23 = vshll.u32 %v6872_v29, 16 }
 0x1f9   : > { %2374 = vrot.lane.b32.xlu0 %v6921_v5, %s5429_s30  ;;  %v6927_v18 = vpop.permute.xlu1 %2263 }
 0x1fa   : > { %v6929_v17 = vpop.permute.xlu0 %2094  ;;  %v3239_v31 = vsel %vm1804_vm3, %v3234_v15, %v3238_v1  ;;  %v3256_v48 = vor.u32 %v3254_v35, %v3238_v1  ;;  %v3276_v35 = vshrl.u32 %v2937_v40, 16  ;;  %v5409_v40 = vld [vmem:[#allocation3 + $0x20] sm:$0xff] }
 0x1fb   : > { %5210 = vmatmul.mubr.msk.bf16.gmra.mrb[152].mxu0 %vm775_vm0, %v3239_v31  ;;  %2271 = vrot.lane.b32.xlu1 %v6499_v34, %s5429_s30  ;;  %v6946_v31 = vsel %vm2059_vm5, %v2075_v44, %v2077_v42  ;;  %v8045_v34 = vrot.slane %v6790_v46, 7  ;;  %v3282_v44 = vrot.slane %v3280_v23, 1  ;;  %v2395_v29 = vsel %vm775_vm0, %v5409_v40, %v1906_v12 }
 0x1fc   : > { %5213 = vmatprep.mubr.msk.bf16.mxu0 %vm5426_vm1, %v8003_v59  ;;  %v3261_v1 = vsel %vm1804_vm3, %v3256_v48, %v3260_v22  ;;  %v3278_v46 = vor.u32 %v3276_v35, %v3260_v22  ;;  %v2418_v22 = vsel %vm2408_vm7, %v2395_v29, %v6870_v10  ;;  %v6983_v12 = vsel %vm2059_vm5, %v2077_v42, %v6604_v55  ;;  %v5410_v42 = vld [vmem:[#allocation3 + $0x28] sm:$0xff] }
 0x1fd   : > { %2323 = vrot.lane.b32.xlu0 %v6304_v53, %s5427_s18  ;;  %v2044_v56 = vpop.permute.xlu1 %2043  ;;  %v6953_v53 = vsel %vm2818_vm6, %v8045_v34, %v2854_v50  ;;  %v2977_v40 = vsel %vm775_vm0, %v5990_v37, %v6796_v6 }
 0x1fe   : > { %v6943_v15 = vpop.permute.xlu0 %2370  ;;  %8046 = vst [vmem:[#allocation58_spill] sm:$0xff] %v6953_v53 }
 0x1ff   : > { %2215 = vrot.lane.b32.xlu1 %v6946_v31, %s5427_s18 }
 0x201   : > { %2353 = vrot.lane.b32.xlu0 %v6946_v31, %s5428_s23  ;;  %v1966_v14 = vpop.permute.xlu1 %1965 }
 0x202   : > { %v2158_v7 = vpop.permute.xlu0 %2157 }
 0x203   : > { %2238 = vrot.lane.b32.xlu1 %v6254_v20, %s5428_s23  ;;  %5214 = vmatmul.mubr.msk.bf16.gmra.mrb[156].mxu0 %vm775_vm0, %v3261_v1  ;;  %v2479_v1 = vsel %vm775_vm0, %v6077_v2, %v6796_v6  ;;  %v8050_v6 = vld [vmem:[#allocation41_spill] sm:$0xff] }
 0x204   : > { %5217 = vmatprep.mubr.msk.bf16.mxu0 %vm5426_vm1, %v8003_v59  ;;  %v7027_v59 = vld [vmem:[#allocation3 + $0x18] sm:$0xfe] }
 0x205   : > { %2376 = vrot.lane.b32.xlu0 %v6254_v20, %s5429_s30  ;;  %v6966_v50 = vpop.permute.xlu1 %2209  ;;  %v3283_v20 = vsel %vm1804_vm3, %v3278_v46, %v3282_v44 }
 0x206   : > { %8047 = vst [vmem:[#allocation59_spill] sm:$0xff] %v6966_v50  ;;  %v6969_v48 = vpop.permute.xlu0 %2347 }
 0x207   : > { %2273 = vrot.lane.b32.xlu1 %v6597_v16, %s5429_s30  ;;  %v2445_v16 = vsel %vm2431_vm8, %v2418_v22, %v2044_v56 }
 0x208   : > { %v3044_v46 = vshll.u32 %v2445_v16, 16 }
 0x209   : > { %2325 = vrot.lane.b32.xlu0 %v6424_v39, %s5427_s18  ;;  %v1908_v34 = vpop.permute.xlu1 %1907 }
 0x20a   : > { %v2128_v35 = vpop.permute.xlu0 %2127  ;;  %v2397_v44 = vsel %vm775_vm0, %v5410_v42, %v1908_v34  ;;  %v3069_v42 = vshrl.u32 %v2445_v16, 16 }
 0x20b   : > { %v2507_v23 = vsel %vm2408_vm7, %v2479_v1, %v2128_v35  ;;  %2217 = vrot.lane.b32.xlu1 %v6983_v12, %s5427_s18  ;;  %5218 = vmatmul.mubr.msk.bf16.gmra.mrb[160].mxu0 %vm775_vm0, %v3283_v20  ;;  %v3004_v29 = vsel %vm2408_vm7, %v2977_v40, %v2128_v35  ;;  %v7006_v20 = vrot.slane %v3044_v46, 1  ;;  %v2420_v34 = vsel %vm2408_vm7, %v2397_v44, %v1966_v14 }
 0x20c   : > { %v2533_v10 = vsel %vm2431_vm8, %v2507_v23, %v2158_v7  ;;  %v2197_v23 = vrot.slane %v6501_v36, 2 }
 0x20d   : > { %2355 = vrot.lane.b32.xlu0 %v6983_v12, %s5428_s23  ;;  %3810 = vmatprep.mubr.bf16.mxu1 %v2533_v10  ;;  %v6993_v2 = vpop.permute.xlu1 %2265  ;;  %8049 = vst [vmem:[#allocation61_spill] sm:$0xff] %v7006_v20  ;;  %v3071_v35 = vor.u32 %v3069_v42, %v7006_v20  ;;  %v8053_v42 = vld [vmem:[#allocation24_spill] sm:$0xff] }
 0x20e   : > { %8048 = vst [vmem:[#allocation60_spill] sm:$0xff] %v6993_v2  ;;  %3811 = vmatmul.mubr.bf16.gmra.mrb[16].mxu1 %v2445_v16  ;;  %v6996_v56 = vpop.permute.xlu0 %2317  ;;  %v2198_v40 = vsel %vm2059_vm5, %v6604_v55, %v2197_v23  ;;  %v2979_v55 = vsel %vm775_vm0, %v8054_v54, %v6929_v17  ;;  %v2732_v54 = vshll.u32 %v7027_v59, 16 }
 0x20f   : > { %2240 = vrot.lane.b32.xlu1 %v6365_v13, %s5428_s23 }
 0x211   : > { %2378 = vrot.lane.b32.xlu0 %v6365_v13, %s5429_s30  ;;  %v2046_v22 = vpop.permute.xlu1 %2045  ;;  %v3022_v13 = vsel %vm2431_vm8, %v3004_v29, %v2158_v7  ;;  %v8052_v29 = vld [vmem:[#allocation47_spill] sm:$0xff] }
 0x212   : > { %v7009_v1 = vpop.permute.xlu0 %2096  ;;  %v2448_v10 = vsel %vm2431_vm8, %v2420_v34, %v2046_v22  ;;  %v3054_v16 = vshll.u32 %v3022_v13, 16  ;;  %v2199_v34 = vrot.slane %v8052_v29, 2 }
 0x213   : > { %2275 = vrot.lane.b32.xlu1 %v6748_v49, %s5429_s30  ;;  %v3072_v37 = vshll.u32 %v2448_v10, 16 }
 0x215   : > { %2327 = vrot.lane.b32.xlu0 %v8050_v6, %s5427_s18  ;;  %v1968_v46 = vpop.permute.xlu1 %1967  ;;  %v3074_v14 = vrot.slane %v3072_v37, 1  ;;  %v2482_v37 = vsel %vm775_vm0, %v8053_v42, %v6929_v17  ;;  %v7044_v42 = vrot.slane %v3054_v16, 1  ;;  %v3076_v17 = vshrl.u32 %v3022_v13, 16 }
 0x216   : > { %v2160_v44 = vpop.permute.xlu0 %2159  ;;  %v3090_v13 = vshrl.u32 %v2448_v10, 16 }
 0x217   : > { %2219 = vrot.lane.b32.xlu1 %v2198_v40, %s5427_s18  ;;  %v7023_v22 = vsel %vm1804_vm3, %v3071_v35, %v3074_v14 }
 0x218   : > { %8051 = vst [vmem:[#allocation41_spill] sm:$0xff] %v7023_v22  ;;  %v2337_v22 = vrot.slane %v6628_v27, 2  ;;  %v3092_v50 = vor.u32 %v3090_v13, %v3074_v14  ;;  %v2255_v13 = vshll.u32 %v6811_v41, 16 }
 0x219   : > { %2357 = vrot.lane.b32.xlu0 %v2198_v40, %s5428_s23  ;;  %v1910_v7 = vpop.permute.xlu1 %1909  ;;  %v7038_v40 = vld [vmem:[#allocation3 + $0x20] sm:$0xfe] }
 0x21a   : > { %v2399_v53 = vsel %vm775_vm0, %v6782_v62, %v1910_v7  ;;  %v2130_v35 = vpop.permute.xlu0 %2129 }
 0x21b   : > { %v2509_v29 = vsel %vm2408_vm7, %v2482_v37, %v2130_v35  ;;  %v3005_v20 = vsel %vm2408_vm7, %v2979_v55, %v2130_v35  ;;  %2242 = vrot.lane.b32.xlu1 %v6501_v36, %s5428_s23  ;;  %v2869_v37 = vshll.u32 %v7038_v40, 16  ;;  %v2422_v55 = vsel %vm2408_vm7, %v2399_v53, %v1968_v46 }
 0x21c   : > { %v7047_v39 = vsel %vm2431_vm8, %v3005_v20, %v2160_v44  ;;  %v2536_v62 = vsel %vm2431_vm8, %v2509_v29, %v2160_v44  ;;  %v2200_v20 = vsel %vm2059_vm5, %v2197_v23, %v2199_v34  ;;  %v2734_v46 = vrot.slane %v2732_v54, 1 }
 0x21d   : > { %2380 = vrot.lane.b32.xlu0 %v6501_v36, %s5429_s30  ;;  %3818 = vmatprep.mubr.bf16.mxu1 %v2536_v62  ;;  %v2048_v7 = vpop.permute.xlu1 %2047  ;;  %v3079_v16 = vshll.u32 %v7047_v39, 16  ;;  %v2338_v36 = vsel %vm2059_vm5, %v2197_v23, %v2337_v22  ;;  %v3078_v62 = vor.u32 %v3076_v17, %v7044_v42  ;;  %v2867_v17 = vshrl.u32 %v7038_v40, 16 }
 0x21e   : > { %3819 = vmatmul.mubr.bf16.gmra.mrb[20].mxu1 %v2448_v10  ;;  %v7056_v35 = vpop.permute.xlu0 %2319  ;;  %v2451_v44 = vsel %vm2431_vm8, %v2422_v55, %v2048_v7  ;;  %v2730_v10 = vshrl.u32 %v7027_v59, 16 }
 0x21f   : > { %8055 = vst [vmem:[#allocation47_spill] sm:$0xff] %v7056_v35  ;;  %2221 = vrot.lane.b32.xlu1 %v2200_v20, %s5427_s18  ;;  %v3093_v29 = vshll.u32 %v2451_v44, 16  ;;  %v3081_v53 = vrot.slane %v3079_v16, 1  ;;  %v2871_v35 = vrot.slane %v2869_v37, 1  ;;  %v8056_v20 = vld [vmem:[#allocation12_spill] sm:$0xff] }
 0x220   : > { %v2735_v14 = vor.u32 %v2734_v46, %v2730_v10  ;;  %v2766_v46 = vrot.slane %v7027_v59, 1  ;;  %v8058_v10 = vld [vmem:[#allocation22_spill] sm:$0xff] }
 0x221   : > { %2359 = vrot.lane.b32.xlu0 %v2338_v36, %s5428_s23  ;;  %v1970_v2 = vpop.permute.xlu1 %1969  ;;  %v3095_v34 = vrot.slane %v3093_v29, 1  ;;  %v7067_v28 = vsel %vm1804_vm3, %v3078_v62, %v3081_v53  ;;  %v2872_v37 = vor.u32 %v2871_v35, %v2867_v17  ;;  %v8057_v29 = vld [vmem:[#allocation19_spill] sm:$0xff]  ;;  %v2981_v41 = vsel %vm775_vm0, %v8058_v10, %v7009_v1  ;;  %v8059_v59 = vld [vmem:[#allocation50_spill] sm:$0xff] }
 0x222   : > { %v7069_v23 = vpop.permute.xlu0 %2098  ;;  %v2736_v36 = vsel %vm1804_vm3, %v2735_v14, %v8056_v20  ;;  %v2257_v14 = vrot.slane %v2255_v13, 1 }
 0x223   : > { %2244 = vrot.lane.b32.xlu1 %v6628_v27, %s5428_s23  ;;  %v7076_v7 = vsel %vm1804_vm3, %v3092_v50, %v3095_v34  ;;  %v2873_v50 = vsel %vm1804_vm3, %v2872_v37, %v8057_v29  ;;  %v3111_v29 = vshrl.u32 %v2451_v44, 16 }
 0x225   : > { %2382 = vrot.lane.b32.xlu0 %v6628_v27, %s5429_s30  ;;  %v1912_v54 = vpop.permute.xlu1 %1911  ;;  %v3113_v10 = vor.u32 %v3111_v29, %v3095_v34  ;;  %v8062_v29 = vld [vmem:[#allocation15_spill] sm:$0xff] }
 0x226   : > { %v2401_v55 = vsel %vm775_vm0, %v6798_v51, %v1912_v54  ;;  %v2162_v16 = vpop.permute.xlu0 %2161  ;;  %v2485_v51 = vsel %vm775_vm0, %v6823_v21, %v7009_v1  ;;  %v1792_v21 = vld [vmem:[#allocation3 + $0x68] sm:$0x3] }
 0x227   : > { %2752 = vrot.lane.b32.xlu1 %v2736_v36, %s5427_s18  ;;  %v2424_v35 = vsel %vm2408_vm7, %v2401_v55, %v1970_v2  ;;  %v8060_v2 = vld [vmem:[#allocation10_spill] sm:$0xff] }
 0x228   : > { %v2767_v55 = vsel %vm1931_vm2, %v2766_v46, %v8060_v2  ;;  %v8061_v2 = vld [vmem:[#allocation30_spill] sm:$0xff] }
 0x229   : > { %2884 = vrot.lane.b32.xlu0 %v2873_v50, %s5428_s23  ;;  %v2050_v62 = vpop.permute.xlu1 %2049  ;;  %v3097_v50 = vshrl.u32 %v7047_v39, 16  ;;  %v2306_v39 = vshll.u32 %v1792_v21, 16 }
 0x22a   : > { %v2132_v17 = vpop.permute.xlu0 %2131  ;;  %v7098_v54 = vsel %vm2431_vm8, %v2424_v35, %v2050_v62 }
 0x22b   : > { %v2511_v37 = vsel %vm2408_vm7, %v2485_v51, %v2132_v17  ;;  %v3006_v20 = vsel %vm2408_vm7, %v2981_v41, %v2132_v17  ;;  %2277 = vrot.lane.b32.xlu1 %v8059_v59, %s5429_s30  ;;  %v3114_v36 = vshll.u32 %v7098_v54, 16  ;;  %v2258_v41 = vsel %vm1804_vm3, %v6717_v57, %v2257_v14  ;;  %v1798_v14 = vld [vmem:[#allocation3 + $0x18] sm:$0xfc] }
 0x22c   : > { %v7108_v1 = vsel %vm2431_vm8, %v3006_v20, %v2162_v16  ;;  %v2539_v13 = vsel %vm2431_vm8, %v2511_v37, %v2162_v16  ;;  %v2303_v17 = vshrl.u32 %v1792_v21, 16  ;;  %v3099_v37 = vor.u32 %v3097_v50, %v3081_v53 }
 0x22d   : > { %2772 = vrot.lane.b32.xlu0 %v2767_v55, %s5428_s23  ;;  %v3100_v62 = vshll.u32 %v7108_v1, 16  ;;  %3826 = vmatprep.mubr.bf16.mxu1 %v2539_v13  ;;  %v1972_v35 = vpop.permute.xlu1 %1971  ;;  %v3116_v51 = vrot.slane %v3114_v36, 1  ;;  %v2339_v50 = vrot.slane %v1792_v21, 2 }
 0x22e   : > { %3827 = vmatmul.mubr.bf16.gmra.mrb[24].mxu1 %v2451_v44  ;;  %v7114_v46 = vpop.permute.xlu0 %2100  ;;  %v2898_v44 = vrot.slane %v7038_v40, 1  ;;  %v2308_v40 = vrot.slane %v2306_v39, 2 }
 0x22f   : > { %v3102_v20 = vrot.slane %v3100_v62, 1  ;;  %v7121_v16 = vsel %vm775_vm0, %v8061_v2, %v7114_v46  ;;  %2279 = vrot.lane.b32.xlu1 %v2258_v41, %s5429_s30  ;;  %v7128_v34 = vsel %vm1804_vm3, %v3113_v10, %v3116_v51  ;;  %v2305_v62 = vrot.slane %v2303_v17, 1 }
 0x230   : > { %v2899_v53 = vsel %vm1931_vm2, %v2898_v44, %v8062_v29  ;;  %v2785_v10 = vshrl.u32 %v1798_v14, 16  ;;  %v2788_v2 = vshll.u32 %v1798_v14, 16  ;;  %v2340_v17 = vsel %vm2059_vm5, %v2337_v22, %v2339_v50 }
 0x231   : > { %2329 = vrot.lane.b32.xlu0 %v6700_v8, %s5427_s18  ;;  %v1914_v57 = vpop.permute.xlu1 %1913  ;;  %v7131_v55 = vsel %vm1804_vm3, %v3099_v37, %v3102_v20  ;;  %v3118_v50 = vshrl.u32 %v7108_v1, 16 }
 0x232   : > { %v2403_v36 = vsel %vm775_vm0, %v6921_v5, %v1914_v57  ;;  %v2164_v13 = vpop.permute.xlu0 %2163  ;;  %v2488_v5 = vsel %vm775_vm0, %v6897_v3, %v7069_v23  ;;  %v8063_v57 = vld [vmem:[#allocation26_spill] sm:$0xff]  ;;  %v2787_v22 = vrot.slane %v2785_v10, 1 }
 0x233   : > { %2904 = vrot.lane.b32.xlu1 %v2899_v53, %s5429_s30  ;;  %v2426_v37 = vsel %vm2408_vm7, %v2403_v36, %v1972_v35  ;;  %v2983_v21 = vsel %vm775_vm0, %v8063_v57, %v7069_v23  ;;  %v2309_v35 = vor.u32 %v2308_v40, %v2305_v62  ;;  %v3132_v53 = vshrl.u32 %v7098_v54, 16  ;;  %v8064_v40 = vld [vmem:[#allocation37_spill] sm:$0xff] }
 0x234   : > { %v3120_v1 = vor.u32 %v3118_v50, %v3102_v20 }
 0x235   : > { %2384 = vrot.lane.b32.xlu0 %v6780_v58, %s5429_s30  ;;  %v2052_v41 = vpop.permute.xlu1 %2051 }
 0x236   : > { %v2134_v44 = vpop.permute.xlu0 %2133  ;;  %v2457_v39 = vsel %vm2431_vm8, %v2426_v37, %v2052_v41 }
 0x237   : > { %v2513_v29 = vsel %vm2408_vm7, %v2488_v5, %v2134_v44  ;;  %v3007_v14 = vsel %vm2408_vm7, %v2983_v21, %v2134_v44  ;;  %2754 = vrot.lane.b32.xlu1 %v6748_v49, %s5427_s18  ;;  %v3135_v3 = vshll.u32 %v2457_v39, 16  ;;  %v2790_v5 = vrot.slane %v2788_v2, 2 }
 0x238   : > { %v3025_v36 = vsel %vm2431_vm8, %v3007_v14, %v2164_v13  ;;  %v2542_v23 = vsel %vm2431_vm8, %v2513_v29, %v2164_v13  ;;  %v3134_v21 = vor.u32 %v3132_v53, %v3116_v51  ;;  %v2310_v13 = vsel %vm1977_vm4, %v6685_v0, %v2309_v35 }
 0x239   : > { %2361 = vrot.lane.b32.xlu0 %v2340_v17, %s5428_s23  ;;  %v3121_v41 = vshll.u32 %v3025_v36, 16  ;;  %3834 = vmatprep.mubr.bf16.mxu1 %v2542_v23  ;;  %v1974_v37 = vpop.permute.xlu1 %1973  ;;  %v3137_v57 = vrot.slane %v3135_v3, 1  ;;  %v2791_v2 = vor.u32 %v2790_v5, %v2787_v22  ;;  %v5411_v17 = vld [vmem:[#allocation3 + $0x48] sm:$0xff]  ;;  %v2491_v23 = vsel %vm775_vm0, %v6946_v31, %v7114_v46 }
 0x23a   : > { %3835 = vmatmul.mubr.bf16.gmra.mrb[28].mxu1 %v7098_v54  ;;  %v2103_v49 = vpop.permute.xlu0 %2102  ;;  %v8065_v3 = vld [vmem:[#allocation13_spill] sm:$0xff]  ;;  %v3153_v46 = vshrl.u32 %v2457_v39, 16 }
 0x23b   : > { %v3123_v62 = vrot.slane %v3121_v41, 1  ;;  %v2987_v44 = vsel %vm775_vm0, %v8064_v40, %v2103_v49  ;;  %2774 = vrot.lane.b32.xlu1 %v6670_v26, %s5428_s23  ;;  %v7169_v10 = vsel %vm1804_vm3, %v3134_v21, %v3137_v57  ;;  %v2792_v0 = vsel %vm1977_vm4, %v2791_v2, %v8065_v3 }
 0x23c   : > { %v3139_v21 = vshrl.u32 %v3025_v36, 16  ;;  %v7202_v2 = vsel %vm1931_vm2, %v6620_v19, %v6833_v25 }
 0x23d   : > { %2331 = vrot.lane.b32.xlu0 %v2310_v13, %s5427_s18  ;;  %v1916_v51 = vpop.permute.xlu1 %1915  ;;  %v7172_v54 = vsel %vm1804_vm3, %v3120_v1, %v3123_v62 }
 0x23e   : > { %v2405_v29 = vsel %vm775_vm0, %v5411_v17, %v1916_v51  ;;  %v2166_v14 = vpop.permute.xlu0 %2165  ;;  %v3141_v36 = vor.u32 %v3139_v21, %v3123_v62  ;;  %v2494_v62 = vsel %vm775_vm0, %v6983_v12, %v2103_v49  ;;  %v8067_v21 = vld [vmem:[#allocation42_spill] sm:$0xff] }
 0x23f   : > { %2808 = vrot.lane.b32.xlu1 %v8050_v6, %s5429_s30  ;;  %v2428_v35 = vsel %vm2408_vm7, %v2405_v29, %v1974_v37  ;;  %v8066_v29 = vld [vmem:[#allocation48_spill] sm:$0xff] }
 0x241   : > { %2806 = vrot.lane.b32.xlu0 %v2792_v0, %s5429_s30  ;;  %v2054_v20 = vpop.permute.xlu1 %2053 }
 0x242   : > { %v2136_v53 = vpop.permute.xlu0 %2135  ;;  %v7185_v22 = vsel %vm2431_vm8, %v2428_v35, %v2054_v20  ;;  %v2768_v35 = vrot.slane %v6780_v58, 1 }
 0x243   : > { %v2515_v50 = vsel %vm2408_vm7, %v2491_v23, %v2136_v53  ;;  %v3008_v41 = vsel %vm2408_vm7, %v7121_v16, %v2136_v53  ;;  %2756 = vrot.lane.b32.xlu1 %v8059_v59, %s5427_s18  ;;  %v3156_v5 = vshll.u32 %v7185_v22, 16  ;;  %v3155_v16 = vor.u32 %v3153_v46, %v3137_v57 }
 0x244   : > { %v3026_v37 = vsel %vm2431_vm8, %v3008_v41, %v2166_v14  ;;  %v2545_v31 = vsel %vm2431_vm8, %v2515_v50, %v2166_v14  ;;  %v2769_v46 = vsel %vm1931_vm2, %v6833_v25, %v2768_v35 }
 0x245   : > { %2886 = vrot.lane.b32.xlu0 %v8059_v59, %s5428_s23  ;;  %v3142_v40 = vshll.u32 %v3026_v37, 16  ;;  %3842 = vmatprep.mubr.bf16.mxu1 %v2545_v31  ;;  %v1976_v13 = vpop.permute.xlu1 %1975  ;;  %v7197_v1 = vrot.slane %v3156_v5, 1  ;;  %v3160_v49 = vshrl.u32 %v3026_v37, 16  ;;  %v7252_v37 = vld [vmem:[#allocation3 + $0x70] sm:$0x3] }
 0x246   : > { %3843 = vmatmul.mubr.bf16.gmra.mrb[32].mxu1 %v2457_v39  ;;  %v2105_v51 = vpop.permute.xlu0 %2104 }
 0x247   : > { %v3144_v17 = vrot.slane %v3142_v40, 1  ;;  %v7206_v59 = vsel %vm775_vm0, %v8066_v29, %v2105_v51  ;;  %2776 = vrot.lane.b32.xlu1 %v7202_v2, %s5428_s23  ;;  %v7214_v39 = vsel %vm1804_vm3, %v3155_v16, %v7197_v1  ;;  %v8068_v40 = vld [vmem:[#allocation7_spill] sm:$0xff]  ;;  %v7254_v29 = vld [vmem:[#allocation3 + $0x70] sm:$0x1] }
 0x249   : > { %2906 = vrot.lane.b32.xlu0 %v7202_v2, %s5429_s30  ;;  %v1918_v57 = vpop.permute.xlu1 %1917  ;;  %v7217_v19 = vsel %vm1804_vm3, %v3141_v36, %v3144_v17  ;;  %v3162_v36 = vor.u32 %v3160_v49, %v3144_v17  ;;  %v2770_v49 = vrot.slane %v7252_v37, 1 }
 0x24a   : > { %v2168_v14 = vpop.permute.xlu0 %2167 }
 0x24b   : > { %2810 = vrot.lane.b32.xlu1 %v6700_v8, %s5429_s30 }
 0x24d   : > { %2858 = vrot.lane.b32.xlu0 %v6628_v27, %s5427_s18  ;;  %v2056_v3 = vpop.permute.xlu1 %2055 }
 0x24e   : > { %v7225_v20 = vpop.f32.mrb[120].mxu0 }
 0x24f   : > { %v2138_v0 = vpop.permute.xlu0 %2137  ;;  %v5179_v50 = vpop.f32.mrb[121].mxu0  ;;  %2758 = vrot.lane.b32.xlu1 %v6837_v9, %s5427_s18 }
 0x250   : > { %v2517_v23 = vsel %vm2408_vm7, %v2494_v62, %v2138_v0  ;;  %v3009_v53 = vsel %vm2408_vm7, %v2987_v44, %v2138_v0  ;;  %v7238_v12 = vpop.f32.mrb[122].mxu0 }
 0x251   : > { %v7233_v8 = vsel %vm2431_vm8, %v3009_v53, %v2168_v14  ;;  %2888 = vrot.lane.b32.xlu0 %v6837_v9, %s5428_s23  ;;  %v2548_v27 = vsel %vm2431_vm8, %v2517_v23, %v2168_v14  ;;  %v5180_v5 = vpop.f32.mrb[123].mxu0  ;;  %v7241_v44 = vpop.permute.xlu1 %2232  ;;  %v2643_v9 = vsel %vm775_vm0, %v8068_v40, %v8067_v21  ;;  %v7257_v14 = vld [vmem:[#allocation3 + $0x50] sm:$0xff]  ;;  %v2801_v21 = vshll.u32 %v7252_v37, 16 }
 0x252   : > { %v3163_v41 = vshll.u32 %v7233_v8, 16  ;;  %3850 = vmatprep.mubr.bf16.mxu1 %v2548_v27  ;;  %v2407_v25 = vsel %vm775_vm0, %v7257_v14, %v1918_v57  ;;  %v8069_v23 = vld [vmem:[#allocation45_spill] sm:$0xff]  ;;  %v8070_v27 = vld [vmem:[#allocation38_spill] sm:$0xff]  ;;  %v2900_v57 = vrot.slane %v6877_v38, 1 }
 0x253   : > { %3851 = vmatmul.mubr.bf16.gmra.mrb[36].mxu1 %v7185_v22  ;;  %v2170_v31 = vpop.permute.xlu0 %2169  ;;  %2778 = vrot.lane.b32.xlu1 %v2769_v46, %s5428_s23  ;;  %v2497_v53 = vsel %vm775_vm0, %v8069_v23, %v2105_v51  ;;  %v2675_v17 = vsel %vm2408_vm7, %v2643_v9, %v8070_v27  ;;  %v2430_v40 = vsel %vm2408_vm7, %v2407_v25, %v1976_v13  ;;  %v8071_v23 = vld [vmem:[#allocation34_spill] sm:$0xff]  ;;  %v8072_v25 = vld [vmem:[#allocation11_spill] sm:$0xff] }
 0x254   : > { %v7249_v16 = vrot.slane %v3163_v41, 1  ;;  %v2746_v41 = vshll.u32 %v7254_v29, 16  ;;  %v7293_v27 = vld [vmem:[#allocation3 + $0x78] sm:$0x1]  ;;  %v2901_v13 = vsel %vm1931_vm2, %v2768_v35, %v2900_v57 }
 0x255   : > { %2908 = vrot.lane.b32.xlu0 %v2769_v46, %s5429_s30  ;;  %v7261_v62 = vpop.permute.xlu1 %2267  ;;  %v2798_v46 = vshrl.u32 %v7252_v37, 16 }
 0x256   : > { %v7265_v0 = vsel %vm1804_vm3, %v3162_v36, %v7249_v16  ;;  %v2463_v36 = vsel %vm2431_vm8, %v2430_v40, %v2056_v3 }
 0x257   : > { %v2140_v50 = vpop.permute.xlu0 %2139  ;;  %2812 = vrot.lane.b32.xlu1 %v6816_v60, %s5429_s30  ;;  %v7299_v3 = vrot.slane %v2798_v46, 1 }
 0x258   : > { %v2519_v5 = vsel %vm2408_vm7, %v2497_v53, %v2140_v50  ;;  %v2697_v53 = vsel %vm2431_vm8, %v2675_v17, %v8071_v23  ;;  %v2771_v50 = vsel %vm1931_vm2, %v2768_v35, %v2770_v49  ;;  %v2646_v17 = vsel %vm775_vm0, %v8072_v25, %v6778_v32 }
 0x259   : > { %2860 = vrot.lane.b32.xlu0 %v6780_v58, %s5427_s18  ;;  %v2551_v51 = vsel %vm2431_vm8, %v2519_v5, %v2170_v31  ;;  %v7283_v9 = vpop.permute.xlu1 %2211  ;;  %v2748_v58 = vrot.slane %v2746_v41, 1  ;;  %v2803_v31 = vrot.slane %v2801_v21, 2  ;;  %v8073_v5 = vld [vmem:[#allocation31_spill] sm:$0xff]  ;;  %v8074_v41 = vld [vmem:[#allocation6_spill] sm:$0xff]  ;;  %v2677_v32 = vsel %vm2408_vm7, %v2646_v17, %v6707_v4  ;;  %v5383_v17 = vld [vmem:[%s7924_s3 + $0x148] sm:$0xff]  }
 0x25a   : > { %3858 = vmatprep.mubr.bf16.mxu1 %v2551_v51  ;;  %v2555_v51 = vsel %vm775_vm0, %v8074_v41, %v8073_v5 }
 0x25b   : > { %3859 = vmatmul.mubr.bf16.gmra.mrb[40].mxu1 %v2463_v36  ;;  %v7286_v60 = vpop.permute.xlu0 %2349  ;;  %2780 = vrot.lane.b32.xlu1 %v2771_v50, %s5428_s23  ;;  %v2878_v36 = vshll.u32 %v7293_v27, 16  ;;  %v2749_v46 = vsel %vm1804_vm3, %v6840_v43, %v2748_v58  ;;  %v2804_v50 = vor.u32 %v2803_v31, %v7299_v3  ;;  %v8076_v43 = vld [vmem:[#allocation43_spill] sm:$0xff] }
 0x25c   : > { %3897 = vmatprep.mubr.bf16.mxu1 %v2697_v53  ;;  %v5382_v53 = vld [vmem:[%s7924_s3 + $0x100] sm:$0xff]  }
 0x25d   : > { %2910 = vrot.lane.b32.xlu0 %v2901_v13, %s5429_s30  ;;  %v7308_v40 = vpop.permute.xlu1 %2234  ;;  %v8075_v13 = vld [vmem:[#allocation27_spill] sm:$0xff]  ;;  %v2880_v4 = vrot.slane %v2878_v36, 1  ;;  %v8078_v36 = vld [vmem:[#allocation16_spill] sm:$0xff] }
 0x25e   : > { %v7313_v35 = vpop.f32.mrb[124].mxu0  ;;  %v2587_v25 = vsel %vm2408_vm7, %v2555_v51, %v8075_v13  ;;  %v8077_v51 = vld [vmem:[#allocation46_spill] sm:$0xff]  ;;  %v5384_v13 = vld [vmem:[%s7924_s3 + $0x108] sm:$0xff]  }
 0x25f   : > { %v7311_v23 = vpop.permute.xlu0 %2372  ;;  %v5183_v21 = vpop.f32.mrb[125].mxu0  ;;  %2760 = vrot.lane.b32.xlu1 %v2749_v46, %s5427_s18  ;;  %v2609_v58 = vsel %vm2431_vm8, %v2587_v25, %v8076_v43  ;;  %v2649_v25 = vsel %vm775_vm0, %v8078_v36, %v6918_v45  ;;  %v8079_v43 = vld [vmem:[#allocation39_spill] sm:$0xff]  ;;  %v5385_v45 = vld [vmem:[%s7924_s3 + $0x150] sm:$0xff]  }
 0x260   : > { %v7328_v5 = vpop.f32.mrb[126].mxu0  ;;  %v2700_v21 = vsel %vm2431_vm8, %v2677_v32, %v8077_v51  ;;  %v2750_v32 = vshrl.u32 %v7254_v29, 16 }
 0x261   : > { %2890 = vrot.lane.b32.xlu0 %v6909_v61, %s5428_s23  ;;  %v5184_v41 = vpop.f32.mrb[127].mxu0  ;;  %v7332_v46 = vpop.permute.xlu1 %2269  ;;  %v2805_v61 = vsel %vm1977_vm4, %v6805_v30, %v2804_v50  ;;  %v2881_v50 = vsel %vm1804_vm3, %v6912_v24, %v2880_v4 }
 0x262   : > { %v2902_v41 = vrot.slane %v6827_v52, 1  ;;  %v8081_v52 = vld [vmem:[#allocation35_spill] sm:$0xff] }
 0x263   : > { %3898 = vmatmul.mubr.bf16.vlgmr.msra.gmra.mrb[44].mxu1 %v2609_v58  ;;  %v7337_v31 = vpop.permute.xlu0 %2321  ;;  %2814 = vrot.lane.b32.xlu1 %v2805_v61, %s5429_s30  ;;  %v5386_v61 = vld [vmem:[%s7924_s3 + $0x110] sm:$0xff]  }
 0x264   : > { %3905 = vmatprep.mubr.bf16.mxu1 %v2700_v21  ;;  %4941 = vmatpush3.bf16.msra.mxu1 %v5382_v53  ;;  %v8080_v53 = vld [vmem:[#allocation9_spill] sm:$0xff]  ;;  %v2679_v21 = vsel %vm2408_vm7, %v2649_v25, %v6874_v11  ;;  %v2903_v11 = vsel %vm1931_vm2, %v2900_v57, %v2902_v41 }
 0x265   : > { %2862 = vrot.lane.b32.xlu0 %v6877_v38, %s5427_s18  ;;  %v2558_v58 = vsel %vm775_vm0, %v8080_v53, %v8079_v43  ;;  %v7356_v30 = vpop.permute.xlu1 %2213  ;;  %4942 = vmatprep.subr.bf16.mxu1 %v5383_v17  ;;  %v2703_v25 = vsel %vm2431_vm8, %v2679_v21, %v6818_v47  ;;  %v8082_v38 = vld [vmem:[#allocation23_spill] sm:$0xff] }
 0x266   : > { %v2589_v24 = vsel %vm2408_vm7, %v2558_v58, %v8081_v52  ;;  %v2652_v57 = vsel %vm775_vm0, %v8082_v38, %v6996_v56  ;;  %v5389_v53 = vld [vmem:[%s7924_s3 + $0x160] sm:$0xff]  }
 0x267   : > { %v7364_v51 = vpop.permute.xlu0 %2351  ;;  %2762 = vrot.lane.b32.xlu1 %v2750_v32, %s5427_s18  ;;  %v2612_v17 = vsel %vm2431_vm8, %v2589_v24, %v6793_v63  ;;  %v5388_v63 = vld [vmem:[%s7924_s3 + $0x118] sm:$0xff]   ;;  %v2681_v37 = vsel %vm2408_vm7, %v2652_v57, %v6969_v48  ;;  %v5391_v48 = vld [vmem:[%s7924_s3 + $0x168] sm:$0xff]   ;;  %v5394_v57 = vld [vmem:[%s7924_s3 + $0x130] sm:$0xff]  }
 0x268   : > { %4943 = vmatpush3.bf16.msra.mxu1 %v5384_v13  ;;  %v5387_v13 = vld [vmem:[%s7924_s3 + $0x158] sm:$0xff]  }
 0x269   : > { %2892 = vrot.lane.b32.xlu0 %v2881_v50, %s5428_s23  ;;  %v7375_v4 = vpop.permute.xlu1 %2236  ;;  %4944 = vmatprep.subr.bf16.mxu1 %v5385_v45  ;;  %v8083_v32 = vld [vmem:[#allocation14_spill] sm:$0xff]  ;;  %v8084_v45 = vld [vmem:[#allocation49_spill] sm:$0xff] }
 0x26a   : > { %v2561_v47 = vsel %vm775_vm0, %v8083_v32, %v6736_v33  ;;  %v5390_v33 = vld [vmem:[%s7924_s3 + $0x120] sm:$0xff]  }
 0x26b   : > { %3906 = vmatmul.mubr.bf16.gmra.mrb[48].mxu1 %v2612_v17  ;;  %v7385_v36 = vpop.permute.xlu0 %2374  ;;  %2782 = vrot.lane.b32.xlu1 %v2770_v49, %s5428_s23  ;;  %v2591_v21 = vsel %vm2408_vm7, %v2561_v47, %v8084_v45  ;;  %v8087_v32 = vld [vmem:[#allocation47_spill] sm:$0xff]  ;;  %v8088_v47 = vld [vmem:[#allocation28_spill] sm:$0xff] }
 0x26c   : > { %3913 = vmatprep.mubr.bf16.mxu1 %v2703_v25  ;;  %4945 = vmatpush3.bf16.msra.mxu1 %v5386_v61  ;;  %v2882_v61 = vshrl.u32 %v7293_v27, 16  ;;  %v8086_v25 = vld [vmem:[#allocation20_spill] sm:$0xff] }
 0x26d   : > { %2912 = vrot.lane.b32.xlu0 %v2903_v11, %s5429_s30  ;;  %v7402_v43 = vpop.permute.xlu1 %2271  ;;  %4946 = vmatprep.subr.bf16.mxu1 %v5387_v13  ;;  %v2706_v11 = vsel %vm2431_vm8, %v2681_v37, %v6943_v15  ;;  %v5393_v13 = vld [vmem:[%s7924_s3 + $0x170] sm:$0xff]  }
 0x26e   : > { %v7409_v56 = vpop.f32.mrb[128].mxu0 }
 0x26f   : > { %v7407_v58 = vpop.permute.xlu0 %2323  ;;  %v5187_v50 = vpop.f32.mrb[129].mxu0  ;;  %2816 = vrot.lane.b32.xlu1 %v7299_v3, %s5429_s30  ;;  %v2615_v3 = vsel %vm2431_vm8, %v2591_v21, %v6927_v18  ;;  %v8085_v18 = vld [vmem:[#allocation57_spill] sm:$0xff] }
 0x270   : > { %4947 = vmatpush3.bf16.msra.mxu1 %v5388_v63  ;;  %v7420_v49 = vpop.f32.mrb[130].mxu0  ;;  %v2564_v63 = vsel %vm775_vm0, %v8086_v25, %v8085_v18  ;;  %v8089_v50 = vld [vmem:[#allocation53_spill] sm:$0xff] }
 0x271   : > { %2864 = vrot.lane.b32.xlu0 %v7293_v27, %s5427_s18  ;;  %v5188_v52 = vpop.f32.mrb[131].mxu0  ;;  %v7428_v24 = vpop.permute.xlu1 %2215  ;;  %4948 = vmatprep.subr.bf16.mxu1 %v5389_v53  ;;  %v5392_v27 = vld [vmem:[%s7924_s3 + $0x128] sm:$0xff]   ;;  %v2655_v53 = vsel %vm775_vm0, %v8088_v47, %v8087_v32  ;;  %v2593_v37 = vsel %vm2408_vm7, %v2564_v63, %v8089_v50  ;;  %s330_s18 = scalar_lea.vmem %s7930_s9, %s8113_s12 }
 0x272   : > { %v2683_v45 = vsel %vm2408_vm7, %v2655_v53, %v7286_v60  ;;  %v8092_v18 = vld [vmem:[#allocation17_spill] sm:$0xff] }
 0x273   : > { %3914 = vmatmul.mubr.bf16.gmra.mrb[52].mxu1 %v2615_v3  ;;  %v2354_v17 = vpop.permute.xlu0 %2353  ;;  %v5396_v3 = vld [vmem:[%s7924_s3 + $0x138] sm:$0xff]  }
 0x274   : > { %3921 = vmatprep.mubr.bf16.mxu1 %v2706_v11  ;;  %4949 = vmatpush3.bf16.msra.mxu1 %v5390_v33  ;;  %v5395_v33 = vld [vmem:[%s7924_s3 + $0x178] sm:$0xff]  }
 0x275   : > { %2894 = vrot.lane.b32.xlu0 %v2882_v61, %s5428_s23  ;;  %4950 = vmatprep.subr.bf16.mxu1 %v5391_v48  ;;  %v7444_v38 = vpop.permute.xlu1 %2238  ;;  %v8090_v61 = vld [vmem:[#allocation60_spill] sm:$0xff] }
 0x276   : > { %v2618_v48 = vsel %vm2431_vm8, %v2593_v37, %v8090_v61 }
 0x277   : > { %v2377_v15 = vpop.permute.xlu0 %2376 }
 0x278   : > { %4951 = vmatpush3.bf16.msra.mxu1 %v5392_v27 }
 0x279   : > { %2914 = vrot.lane.b32.xlu0 %v2902_v41, %s5429_s30  ;;  %4952 = vmatprep.subr.bf16.mxu1 %v5393_v13  ;;  %v7460_v21 = vpop.permute.xlu1 %2273  ;;  %v2709_v41 = vsel %vm2431_vm8, %v2683_v45, %v7311_v23  ;;  %v8091_v13 = vld [vmem:[#allocation59_spill] sm:$0xff] }
 0x27a   : > { %v2567_v25 = vsel %vm775_vm0, %v8092_v18, %v8091_v13 }
 0x27b   : > { %3922 = vmatmul.mubr.bf16.gmra.mrb[56].mxu1 %v2618_v48  ;;  %v2326_v52 = vpop.permute.xlu0 %2325  ;;  %v2595_v23 = vsel %vm2408_vm7, %v2567_v25, %v7241_v44 }
 0x27c   : > { %3929 = vmatprep.mubr.bf16.mxu1 %v2709_v41  ;;  %4953 = vmatpush3.bf16.msra.mxu1 %v5394_v57  ;;  %v8093_v57 = vld [vmem:[#allocation32_spill] sm:$0xff] }
 0x27d   : > { %4954 = vmatprep.subr.bf16.mxu1 %v5395_v33  ;;  %v7469_v11 = vpop.permute.xlu1 %2217  ;;  %v2658_v32 = vsel %vm775_vm0, %v8093_v57, %v7337_v31  ;;  %v2621_v33 = vsel %vm2431_vm8, %v2595_v23, %v7261_v62 }
 0x27e   : > { %v7471_v27 = vpop.f32.mrb[132].mxu0  ;;  %v2685_v53 = vsel %vm2408_vm7, %v2658_v32, %v7364_v51  ;;  %v8094_v51 = vld [vmem:[#allocation21_spill] sm:$0xff] }
 0x27f   : > { %v2356_v60 = vpop.permute.xlu0 %2355  ;;  %v5191_v63 = vpop.f32.mrb[133].mxu0  ;;  %v2712_v44 = vsel %vm2431_vm8, %v2685_v53, %v7385_v36  ;;  %v2570_v18 = vsel %vm775_vm0, %v8094_v51, %v7283_v9 }
 0x280   : > { %4955 = vmatpush3.bf16.msra.mxu1 %v5396_v3  ;;  %v7481_v47 = vpop.f32.mrb[134].mxu0  ;;  %v2597_v62 = vsel %vm2408_vm7, %v2570_v18, %v7308_v40  ;;  %v8095_v63 = vld [vmem:[#allocation36_spill] sm:$0xff] }
 0x281   : > { %v5192_v50 = vpop.f32.mrb[135].mxu0  ;;  %v7485_v37 = vpop.permute.xlu1 %2240  ;;  %v2661_v36 = vsel %vm775_vm0, %v8095_v63, %v7407_v58  ;;  %v2624_v53 = vsel %vm2431_vm8, %v2597_v62, %v7332_v46 }
 0x282   : > { %v2687_v57 = vsel %vm2408_vm7, %v2661_v36, %v2354_v17 }
 0x283   : > { %3930 = vmatmul.mubr.bf16.gmra.mrb[60].mxu1 %v2621_v33  ;;  %v2379_v45 = vpop.permute.xlu0 %2378  ;;  %v2715_v9 = vsel %vm2431_vm8, %v2687_v57, %v2377_v15 }
 0x284   : > { %3937 = vmatprep.mubr.bf16.mxu1 %v2712_v44  ;;  %v4792_v61 = vpop.f32.mrb[0].mxu1 }
 0x285   : > { %v2276_v48 = vpop.permute.xlu1 %2275  ;;  %v4793_v31 = vpop.f32.mrb[1].mxu1 }
 0x286   : > { %v7491_v41 = vadd.f32 %v4793_v31, %v4792_v61  ;;  %v4795_v13 = vpop.f32.mrb[2].mxu1  ;;  %v8096_v61 = vld [vmem:[#allocation25_spill] sm:$0xff] }
 0x287   : > { %v2328_v3 = vpop.permute.xlu0 %2327  ;;  %v4796_v25 = vpop.f32.mrb[3].mxu1  ;;  %v2573_v58 = vsel %vm775_vm0, %v8096_v61, %v7356_v30 }
 0x288   : > { %v7501_v23 = vadd.f32 %v4796_v25, %v4795_v13  ;;  %v2599_v17 = vsel %vm2408_vm7, %v2573_v58, %v7375_v4  ;;  %v8097_v13 = vld [vmem:[#allocation40_spill] sm:$0xff]  ;;  %v8098_v4 = vld [vmem:[#allocation29_spill] sm:$0xff] }
 0x289   : > { %v2220_v32 = vpop.permute.xlu1 %2219  ;;  %v2664_v46 = vsel %vm775_vm0, %v8097_v13, %v2326_v52  ;;  %v2627_v62 = vsel %vm2431_vm8, %v2599_v17, %v7402_v43  ;;  %v2576_v52 = vsel %vm775_vm0, %v8098_v4, %v7428_v24 }
 0x28a   : > { %v2689_v15 = vsel %vm2408_vm7, %v2664_v46, %v2356_v60  ;;  %v2667_v60 = vsel %vm775_vm0, %v6670_v26, %v2328_v3 }
 0x28b   : > { %3938 = vmatmul.mubr.bf16.gmra.mrb[64].mxu1 %v2624_v53  ;;  %v2358_v50 = vpop.permute.xlu0 %2357  ;;  %v2718_v30 = vsel %vm2431_vm8, %v2689_v15, %v2379_v45  ;;  %v2601_v53 = vsel %vm2408_vm7, %v2576_v52, %v7444_v38  ;;  %v8099_v15 = vld [vmem:[#allocation33_spill] sm:$0xff] }
 0x28c   : > { %3945 = vmatprep.mubr.bf16.mxu1 %v2715_v9  ;;  %v2691_v9 = vsel %vm2408_vm7, %v2667_v60, %v2358_v50  ;;  %v2630_v45 = vsel %vm2431_vm8, %v2601_v53, %v7460_v21  ;;  %v2579_v21 = vsel %vm775_vm0, %v8099_v15, %v7469_v11 }
 0x28d   : > { %v2243_v33 = vpop.permute.xlu1 %2242 }
 0x28e   : > { %v7507_v40 = vpop.f32.mrb[136].mxu0 }
 0x28f   : > { %v2381_v44 = vpop.permute.xlu0 %2380  ;;  %v5195_v31 = vpop.f32.mrb[137].mxu0 }
 0x290   : > { %v7516_v51 = vpop.f32.mrb[138].mxu0  ;;  %v2721_v17 = vsel %vm2431_vm8, %v2691_v9, %v2381_v44  ;;  %v8100_v9 = vld [vmem:[#allocation44_spill] sm:$0xff] }
 0x291   : > { %v5196_v18 = vpop.f32.mrb[139].mxu0  ;;  %v2222_v25 = vpop.permute.xlu1 %2221 }
 0x293   : > { %3946 = vmatmul.mubr.bf16.gmra.mrb[68].mxu1 %v2627_v62  ;;  %v2360_v63 = vpop.permute.xlu0 %2359  ;;  %v2603_v62 = vsel %vm2408_vm7, %v2579_v21, %v7485_v37 }
 0x294   : > { %3953 = vmatprep.mubr.bf16.mxu1 %v2718_v30  ;;  %v2633_v52 = vsel %vm2431_vm8, %v2603_v62, %v2276_v48 }
 0x295   : > { %v2245_v36 = vpop.permute.xlu1 %2244 }
 0x297   : > { %v2383_v57 = vpop.permute.xlu0 %2382 }
 0x299   : > { %v4798_v43 = vpop.f32.mrb[4].mxu1  ;;  %v2753_v61 = vpop.permute.xlu1 %2752 }
 0x29a   : > { %v4799_v58 = vpop.f32.mrb[5].mxu1 }
 0x29b   : > { %3954 = vmatmul.mubr.bf16.gmra.mrb[72].mxu1 %v2630_v45  ;;  %v2885_v31 = vpop.permute.xlu0 %2884  ;;  %v7533_v13 = vadd.f32 %v4799_v58, %v4798_v43  ;;  %v4801_v24 = vpop.f32.mrb[6].mxu1  ;;  %v8101_v43 = vld [vmem:[#allocation8_spill] sm:$0xff] }
 0x29c   : > { %3961 = vmatprep.mubr.bf16.mxu1 %v2721_v17  ;;  %v4802_v38 = vpop.f32.mrb[7].mxu1  ;;  %v2975_v45 = vsel %vm775_vm0, %v8101_v43, %v8100_v9  ;;  %v8103_v9 = vld [vmem:[#allocation51_spill] sm:$0xff] }
 0x29d   : > { %v7535_v46 = vadd.f32 %v4802_v38, %v4801_v24  ;;  %v2278_v26 = vpop.permute.xlu1 %2277  ;;  %v3003_v58 = vsel %vm2408_vm7, %v2975_v45, %v2885_v31  ;;  %v2582_v38 = vsel %vm775_vm0, %v8050_v6, %v2220_v32  ;;  %v8102_v6 = vld [vmem:[#allocation54_spill] sm:$0xff]  ;;  %v2585_v43 = vsel %vm775_vm0, %v8103_v9, %v2222_v25  ;;  %v8104_v9 = vld [vmem:[#allocation61_spill] sm:$0xff] }
 0x29e   : > { %v7537_v50 = vpop.f32.mrb[140].mxu0 }
 0x29f   : > { %v2773_v3 = vpop.permute.xlu0 %2772  ;;  %v5199_v18 = vpop.f32.mrb[141].mxu0 }
 0x2a0   : > { %v7544_v44 = vpop.f32.mrb[142].mxu0 }
 0x2a1   : > { %v5200_v30 = vpop.f32.mrb[143].mxu0  ;;  %v2280_v4 = vpop.permute.xlu1 %2279 }
 0x2a3   : > { %3962 = vmatmul.mubr.bf16.gmra.mrb[76].mxu1 %v2633_v52  ;;  %v2330_v53 = vpop.permute.xlu0 %2329 }
 0x2a4   : > { %v2670_v60 = vsel %vm775_vm0, %v7202_v2, %v2330_v53  ;;  %v2605_v2 = vsel %vm2408_vm7, %v2582_v38, %v2243_v33 }
 0x2a5   : > { %v2693_v11 = vsel %vm2408_vm7, %v2670_v60, %v2360_v63  ;;  %v2905_v37 = vpop.permute.xlu1 %2904  ;;  %v2636_v63 = vsel %vm2431_vm8, %v2605_v2, %v2278_v26 }
 0x2a6   : > { %v2724_v17 = vsel %vm2431_vm8, %v2693_v11, %v2383_v57  ;;  %v3021_v24 = vsel %vm2431_vm8, %v3003_v58, %v2905_v37  ;;  %v2607_v11 = vsel %vm2408_vm7, %v2585_v43, %v2245_v36 }
 0x2a7   : > { %3969 = vmatprep.mubr.bf16.mxu1 %v2724_v17  ;;  %v2385_v48 = vpop.permute.xlu0 %2384  ;;  %v3050_v15 = vshll.u32 %v3021_v24, 16  ;;  %v3048_v21 = vshrl.u32 %v3021_v24, 16  ;;  %v5413_v17 = vld [vmem:[#allocation3 + $0x18] sm:$0xff] }
 0x2a8   : > { %v2939_v24 = vsel %vm775_vm0, %v5413_v17, %v2753_v61 }
 0x2a9   : > { %v3052_v18 = vrot.slane %v3050_v15, 1  ;;  %v7559_v62 = vpop.permute.xlu1 %2754  ;;  %v2639_v15 = vsel %vm2431_vm8, %v2607_v11, %v2280_v4  ;;  %v2951_v2 = vsel %vm2408_vm7, %v2939_v24, %v2773_v3 }
 0x2ab   : > { %3970 = vmatmul.mubr.bf16.gmra.mrb[80].mxu1 %v2636_v63  ;;  %v2362_v31 = vpop.permute.xlu0 %2361  ;;  %v3053_v30 = vor.u32 %v3052_v18, %v3048_v21 }
 0x2ad   : > { %v7562_v57 = vpop.permute.xlu1 %2774  ;;  %v3057_v52 = vsel %vm1804_vm3, %v3053_v30, %v7044_v42 }
 0x2ae   : > { %v7566_v60 = vpop.f32.mrb[144].mxu0 }
 0x2af   : > { %v2332_v53 = vpop.permute.xlu0 %2331  ;;  %v5203_v33 = vpop.f32.mrb[145].mxu0 }
 0x2b0   : > { %v2673_v32 = vsel %vm775_vm0, %v8102_v6, %v2332_v53  ;;  %v7572_v45 = vpop.f32.mrb[146].mxu0 }
 0x2b1   : > { %v2695_v26 = vsel %vm2408_vm7, %v2673_v32, %v2362_v31  ;;  %v4804_v58 = vpop.f32.mrb[8].mxu1  ;;  %v5204_v37 = vpop.f32.mrb[147].mxu0 }
 0x2b2   : > { %v2727_v42 = vsel %vm2431_vm8, %v2695_v26, %v2385_v48  ;;  %v4805_v38 = vpop.f32.mrb[9].mxu1  ;;  %v7582_v63 = vpop.permute.xlu1 %2808 }
 0x2b3   : > { %3977 = vmatprep.mubr.bf16.mxu1 %v2727_v42  ;;  %v7580_v25 = vadd.f32 %v4805_v38, %v4804_v58  ;;  %v2807_v21 = vpop.permute.xlu0 %2806  ;;  %v4807_v18 = vpop.f32.mrb[10].mxu1 }
 0x2b4   : > { %3978 = vmatmul.mubr.bf16.gmra.mrb[84].mxu1 %v2639_v15  ;;  %v2963_v36 = vsel %vm2431_vm8, %v2951_v2, %v2807_v21  ;;  %v4808_v31 = vpop.f32.mrb[11].mxu1 }
 0x2b5   : > { %4016 = vmatprep.mubr.bf16.mxu1 %v3057_v52  ;;  %v3040_v48 = vshll.u32 %v2963_v36, 16  ;;  %v7585_v30 = vadd.f32 %v4808_v31, %v4807_v18  ;;  %v3038_v61 = vshrl.u32 %v2963_v36, 16  ;;  %v3181_v52 = vshrl.u32 %v7233_v8, 16  ;;  %v8105_v8 = vld [vmem:[#allocation41_spill] sm:$0xff]  ;;  %v8106_v18 = vld [vmem:[#allocation52_spill] sm:$0xff] }
 0x2b6   : > { %v7587_v32 = vpop.permute.xlu1 %2756 }
 0x2b7   : > { %v3042_v53 = vrot.slane %v3040_v48, 1  ;;  %v2887_v6 = vpop.permute.xlu0 %2886  ;;  %v3183_v24 = vor.u32 %v3181_v52, %v7249_v16 }
 0x2b8   : > { %v3011_v3 = vsel %vm2408_vm7, %v7206_v59, %v2887_v6 }
 0x2b9   : > { %v3043_v4 = vor.u32 %v3042_v53, %v3038_v61 }
 0x2ba   : > { %v7599_v59 = vpop.permute.xlu1 %2776 }
 0x2bb   : > { %v2907_v33 = vpop.permute.xlu0 %2906  ;;  %v3047_v43 = vsel %vm1804_vm3, %v3043_v4, %v8104_v9 }
 0x2bc   : > { %v3029_v26 = vsel %vm2431_vm8, %v3011_v3, %v2907_v33  ;;  %4017 = vmatmul.mubr.bf16.vlgmr.msra.gmra.mrb[88].mxu1 %v3047_v43 }
 0x2bd   : > { %v3184_v11 = vshll.u32 %v3029_v26, 16  ;;  %4024 = vmatprep.mubr.bf16.mxu1 %v7067_v28  ;;  %v3203_v61 = vshrl.u32 %v3029_v26, 16 }
 0x2be   : > { %v7596_v58 = vpop.f32.mrb[148].mxu0  ;;  %v7608_v28 = vpop.permute.xlu1 %2810 }
 0x2bf   : > { %v3186_v37 = vrot.slane %v3184_v11, 1  ;;  %v2859_v42 = vpop.permute.xlu0 %2858  ;;  %v5207_v17 = vpop.f32.mrb[149].mxu0 }
 0x2c0   : > { %v7601_v38 = vpop.f32.mrb[150].mxu0  ;;  %v2992_v36 = vsel %vm775_vm0, %v8106_v18, %v2859_v42  ;;  %v8107_v18 = vld [vmem:[#allocation55_spill] sm:$0xff] }
 0x2c1   : > { %v5208_v15 = vpop.f32.mrb[151].mxu0  ;;  %v7604_v2 = vsel %vm1804_vm3, %v3183_v24, %v3186_v37  ;;  %v3205_v3 = vor.u32 %v3203_v61, %v3186_v37 }
 0x2c2   : > { %v7616_v52 = vpop.permute.xlu1 %2758 }
 0x2c3   : > { %v2889_v21 = vpop.permute.xlu0 %2888 }
 0x2c4   : > { %4025 = vmatmul.mubr.bf16.gmra.mrb[92].mxu1 %v8105_v8  ;;  %v3013_v16 = vsel %vm2408_vm7, %v2992_v36, %v2889_v21 }
 0x2c5   : > { %4032 = vmatprep.mubr.bf16.mxu1 %v7131_v55 }
 0x2c6   : > { %v7629_v8 = vpop.permute.xlu1 %2778 }
 0x2c7   : > { %v2909_v31 = vpop.permute.xlu0 %2908 }
 0x2c8   : > { %v3031_v48 = vsel %vm2431_vm8, %v3013_v16, %v2909_v31 }
 0x2c9   : > { %v3206_v53 = vshll.u32 %v3031_v48, 16  ;;  %v4810_v6 = vpop.f32.mrb[12].mxu1  ;;  %v3225_v31 = vshrl.u32 %v3031_v48, 16 }
 0x2ca   : > { %v4811_v4 = vpop.f32.mrb[13].mxu1 }
 0x2cb   : > { %v3208_v33 = vrot.slane %v3206_v53, 1  ;;  %v7614_v9 = vadd.f32 %v4811_v4, %v4810_v6  ;;  %v2861_v43 = vpop.permute.xlu0 %2860  ;;  %v4813_v55 = vpop.f32.mrb[14].mxu1 }
 0x2cc   : > { %4033 = vmatmul.mubr.bf16.gmra.mrb[96].mxu1 %v7076_v7  ;;  %v4814_v11 = vpop.f32.mrb[15].mxu1  ;;  %v2995_v7 = vsel %vm775_vm0, %v8107_v18, %v2861_v43 }
 0x2cd   : > { %v7619_v42 = vadd.f32 %v4814_v11, %v4813_v55  ;;  %4040 = vmatprep.mubr.bf16.mxu1 %v7172_v54  ;;  %v7623_v26 = vsel %vm1804_vm3, %v3205_v3, %v3208_v33  ;;  %v3227_v3 = vor.u32 %v3225_v31, %v3208_v33  ;;  %v7639_v55 = vpop.permute.xlu1 %2812  ;;  %v8108_v33 = vld [vmem:[#allocation58_spill] sm:$0xff] }
 0x2ce   : > { %v7625_v17 = vpop.f32.mrb[152].mxu0 }
 0x2cf   : > { %v2911_v37 = vpop.permute.xlu0 %2910  ;;  %v5211_v24 = vpop.f32.mrb[153].mxu0 }
 0x2d0   : > { %v7627_v15 = vpop.f32.mrb[154].mxu0 }
 0x2d1   : > { %v5212_v21 = vpop.f32.mrb[155].mxu0  ;;  %v7651_v48 = vpop.permute.xlu1 %2780 }
 0x2d3   : > { %v2891_v36 = vpop.permute.xlu0 %2890 }
 0x2d4   : > { %v3015_v16 = vsel %vm2408_vm7, %v2995_v7, %v2891_v36  ;;  %4041 = vmatmul.mubr.bf16.gmra.mrb[100].mxu1 %v7128_v34 }
 0x2d5   : > { %v3033_v54 = vsel %vm2431_vm8, %v3015_v16, %v2911_v37  ;;  %4048 = vmatprep.mubr.bf16.mxu1 %v7217_v19  ;;  %v2941_v19 = vsel %vm775_vm0, %v7257_v14, %v7559_v62 }
 0x2d6   : > { %v3228_v61 = vshll.u32 %v3033_v54, 16  ;;  %v7637_v53 = vpop.f32.mrb[156].mxu0  ;;  %v2953_v7 = vsel %vm2408_vm7, %v2941_v19, %v7562_v57  ;;  %v3247_v14 = vshrl.u32 %v3033_v54, 16 }
 0x2d7   : > { %v2863_v6 = vpop.permute.xlu0 %2862  ;;  %v5215_v4 = vpop.f32.mrb[157].mxu0 }
 0x2d8   : > { %v3230_v11 = vrot.slane %v3228_v61, 1  ;;  %v7641_v43 = vpop.f32.mrb[158].mxu0  ;;  %v2998_v37 = vsel %vm775_vm0, %v8108_v33, %v2863_v6 }
 0x2d9   : > { %v5216_v24 = vpop.f32.mrb[159].mxu0 }
 0x2da   : > { %v7644_v21 = vsel %vm1804_vm3, %v3227_v3, %v3230_v11 }
 0x2db   : > { %v2893_v34 = vpop.permute.xlu0 %2892 }
 0x2dc   : > { %4049 = vmatmul.mubr.bf16.gmra.mrb[104].mxu1 %v7169_v10  ;;  %v3017_v36 = vsel %vm2408_vm7, %v2998_v37, %v2893_v34  ;;  %v2965_v10 = vsel %vm2431_vm8, %v2953_v7, %v7582_v63  ;;  %v3249_v34 = vor.u32 %v3247_v14, %v3230_v11  ;;  %v5414_v7 = vld [vmem:[#allocation3 + $0x58] sm:$0xff] }
 0x2dd   : > { %4056 = vmatprep.mubr.bf16.mxu1 %v7265_v0  ;;  %v3177_v6 = vshll.u32 %v2965_v10, 16 }
 0x2de   : > { %v4217_v18 = vpop.f32.mrb[160].mxu0 }
 0x2df   : > { %v2913_v16 = vpop.permute.xlu0 %2912  ;;  %v5219_v31 = vpop.f32.mrb[161].mxu0 }
 0x2e0   : > { %v3035_v0 = vsel %vm2431_vm8, %v3017_v36, %v2913_v16  ;;  %v4219_v61 = vpop.f32.mrb[162].mxu0  ;;  %v2761_v31 = vpop.permute.xlu1 %2760  ;;  %v2943_v36 = vsel %vm775_vm0, %v5414_v7, %v7587_v32  ;;  %v3174_v16 = vshrl.u32 %v7185_v22, 16 }
 0x2e1   : > { %v3250_v62 = vshll.u32 %v3035_v0, 16  ;;  %v4816_v4 = vpop.f32.mrb[16].mxu1  ;;  %v5220_v3 = vpop.f32.mrb[163].mxu0  ;;  %v3179_v61 = vrot.slane %v3177_v6, 1  ;;  %v2955_v11 = vsel %vm2408_vm7, %v2943_v36, %v7599_v59  ;;  %v3269_v59 = vshrl.u32 %v3035_v0, 16 }
 0x2e2   : > { %v4817_v24 = vpop.f32.mrb[17].mxu1 }
 0x2e3   : > { %v3252_v33 = vrot.slane %v3250_v62, 1  ;;  %v7661_v18 = vadd.f32 %v4817_v24, %v4816_v4  ;;  %v2865_v57 = vpop.permute.xlu0 %2864  ;;  %v4819_v19 = vpop.f32.mrb[18].mxu1  ;;  %v3176_v62 = vor.u32 %v3174_v16, %v7197_v1  ;;  %v8109_v4 = vld [vmem:[#allocation56_spill] sm:$0xff] }
 0x2e4   : > { %4057 = vmatmul.mubr.bf16.gmra.mrb[108].mxu1 %v7214_v39  ;;  %v4820_v37 = vpop.f32.mrb[19].mxu1  ;;  %v2967_v39 = vsel %vm2431_vm8, %v2955_v11, %v7608_v28  ;;  %v3196_v28 = vshrl.u32 %v2965_v10, 16  ;;  %v5415_v1 = vld [vmem:[#allocation3 + $0x60] sm:$0xff] }
 0x2e5   : > { %v7664_v63 = vadd.f32 %v4820_v37, %v4819_v19  ;;  %4064 = vmatprep.mubr.bf16.mxu1 %v7604_v2  ;;  %v3253_v54 = vsel %vm1804_vm3, %v3249_v34, %v3252_v33  ;;  %v8110_v2 = vrot.slane %v8109_v4, 7  ;;  %v3199_v24 = vshll.u32 %v2967_v39, 16  ;;  %v2815_v19 = vpop.permute.xlu1 %2814 }
 0x2e6   : > { %v3180_v22 = vsel %vm1804_vm3, %v3176_v62, %v3179_v61  ;;  %v2945_v7 = vsel %vm775_vm0, %v5415_v1, %v7616_v52  ;;  %v3271_v16 = vor.u32 %v3269_v59, %v3252_v33  ;;  %v3198_v62 = vor.u32 %v3196_v28, %v3179_v61 }
 0x2e7   : > { %v2895_v14 = vpop.permute.xlu0 %2894  ;;  %v3001_v3 = vsel %vm775_vm0, %v8110_v2, %v2865_v57  ;;  %v3201_v57 = vrot.slane %v3199_v24, 1  ;;  %v2957_v36 = vsel %vm2408_vm7, %v2945_v7, %v7629_v8  ;;  %v5416_v24 = vld [vmem:[#allocation3 + $0x68] sm:$0xff] }
 0x2e8   : > { %v3019_v32 = vsel %vm2408_vm7, %v3001_v3, %v2895_v14  ;;  %v2969_v14 = vsel %vm2431_vm8, %v2957_v36, %v7639_v55  ;;  %v2947_v8 = vsel %vm775_vm0, %v5416_v24, %v2761_v31  ;;  %v3218_v55 = vshrl.u32 %v2967_v39, 16 }
 0x2e9   : > { %v2763_v4 = vpop.permute.xlu1 %2762  ;;  %v3221_v10 = vshll.u32 %v2969_v14, 16  ;;  %v3202_v52 = vsel %vm1804_vm3, %v3198_v62, %v3201_v57  ;;  %v3240_v36 = vshrl.u32 %v2969_v14, 16  ;;  %v8111_v24 = vmov 0.0  }
 0x2ea   : > { %v2949_v7 = vsel %vm775_vm0, %v7254_v29, %v2763_v4 }
 0x2eb   : > { %v2915_v34 = vpop.permute.xlu0 %2914  ;;  %v3223_v61 = vrot.slane %v3221_v10, 1 }
 0x2ec   : > { %v3037_v6 = vsel %vm2431_vm8, %v3019_v32, %v2915_v34  ;;  %4065 = vmatmul.mubr.bf16.gmra.mrb[112].mxu1 %v3180_v22  ;;  %v2959_v22 = vsel %vm2408_vm7, %v2947_v8, %v7651_v48 }
 0x2ed   : > { %v3272_v37 = vshll.u32 %v3037_v6, 16  ;;  %4072 = vmatprep.mubr.bf16.mxu1 %v7623_v26  ;;  %v2783_v6 = vpop.permute.xlu1 %2782  ;;  %v2971_v59 = vsel %vm2431_vm8, %v2959_v22, %v2815_v19  ;;  %v3242_v48 = vor.u32 %v3240_v36, %v3223_v61 }
 0x2ee   : > { %v3243_v28 = vshll.u32 %v2971_v59, 16  ;;  %v2961_v39 = vsel %vm2408_vm7, %v2949_v7, %v2783_v6  ;;  %v3262_v29 = vshrl.u32 %v2971_v59, 16 }
 0x2ef   : > { %v3274_v11 = vrot.slane %v3272_v37, 1  ;;  %v3220_v37 = vor.u32 %v3218_v55, %v3201_v57 }
 0x2f1   : > { %v4822_v0 = vpop.f32.mrb[20].mxu1  ;;  %v3275_v2 = vsel %vm1804_vm3, %v3271_v16, %v3274_v11  ;;  %v3224_v1 = vsel %vm1804_vm3, %v3220_v37, %v3223_v61  ;;  %v2817_v31 = vpop.permute.xlu1 %2816 }
 0x2f2   : > { %v4823_v26 = vpop.f32.mrb[21].mxu1  ;;  %v2973_v16 = vsel %vm2431_vm8, %v2961_v39, %v2817_v31 }
 0x2f3   : > { %v7690_v3 = vadd.f32 %v4823_v26, %v4822_v0  ;;  %v4825_v32 = vpop.f32.mrb[22].mxu1  ;;  %v3265_v19 = vshll.u32 %v2973_v16, 16 }
 0x2f4   : > { %4073 = vmatmul.mubr.bf16.gmra.mrb[116].mxu1 %v3202_v52  ;;  %v4826_v33 = vpop.f32.mrb[23].mxu1 }
 0x2f5   : > { %v7694_v34 = vadd.f32 %v4826_v33, %v4825_v32  ;;  %4080 = vmatprep.mubr.bf16.mxu1 %v7644_v21  ;;  %v3245_v21 = vrot.slane %v3243_v28, 1  ;;  %v3267_v14 = vrot.slane %v3265_v19, 1 }
 0x2f7   : > { %v3246_v26 = vsel %vm1804_vm3, %v3242_v48, %v3245_v21  ;;  %v3264_v4 = vor.u32 %v3262_v29, %v3245_v21 }
 0x2f9   : > { %v3268_v32 = vsel %vm1804_vm3, %v3264_v4, %v3267_v14  ;;  %v7735_v14 = vld [vmem:[%s7925_s4] ss:$0 sm:$0xff] }
 0x2fc   : > { %4081 = vmatmul.mubr.bf16.gmra.mrb[120].mxu1 %v3224_v1 }
 0x2fd   : > { %4088 = vmatprep.mubr.bf16.mxu1 %v3253_v54 }
 0x301   : > { %v4828_v11 = vpop.f32.mrb[24].mxu1 }
 0x302   : > { %v4829_v62 = vpop.f32.mrb[25].mxu1 }
 0x303   : > { %v7705_v57 = vadd.f32 %v4829_v62, %v4828_v11  ;;  %v4831_v0 = vpop.f32.mrb[26].mxu1 }
 0x304   : > { %4089 = vmatmul.mubr.bf16.gmra.mrb[124].mxu1 %v3246_v26  ;;  %v4832_v54 = vpop.f32.mrb[27].mxu1  ;;  %v4303_v26 = vld [vmem:[%s7926_s5 + $0x8] sm:$0xff] }
 0x305   : > { %v7708_v10 = vadd.f32 %v4832_v54, %v4831_v0  ;;  %4096 = vmatprep.mubr.bf16.mxu1 %v3275_v2  ;;  %v4302_v0 = vld [vmem:[%s7926_s5] sm:$0xff]  ;;  %v5431_v54 = vmov 0.0|0.0  }
 0x306   : > { %5251 = vmatprep.subr.bf16.mxu1 %v5431_v54  ;;  %v5252_v29 = vpack.c.bf16 %v4303_v26, %v4302_v0  ;;  %v4304_v0 = vld [vmem:[%s7926_s5 + $0x10] sm:$0xff]  ;;  %v4305_v26 = vld [vmem:[%s7926_s5 + $0x18] sm:$0xff] }
 0x308   : > { %5253 = vmatpush3.bf16.msra.mxu1 %v5252_v29 }
 0x309   : > { %5254 = vmatprep.subr.bf16.mxu1 %v5431_v54 }
 0x30c   : > { %4097 = vmatmul.mubr.bf16.gmra.mrb[128].mxu1 %v3268_v32 }
 0x30d   : > { %v4834_v52 = vpop.f32.mrb[28].mxu1  ;;  %5237 = vmatprep.mubr.msk.f32.mxu1 %vm5426_vm1, %v8111_v24 }
 0x30e   : > { %v4835_v8 = vpop.f32.mrb[29].mxu1 }
 0x30f   : > { %v7713_v33 = vadd.f32 %v4835_v8, %v4834_v52  ;;  %v4837_v55 = vpop.f32.mrb[30].mxu1  ;;  %v3781_v52 = vadd.f32 %v7491_v41, %v7735_v14  ;;  %v3792_v41 = vadd.f32 %v7535_v46, %v7735_v14  ;;  %v3797_v46 = vadd.f32 %v7580_v25, %v7735_v14 }
 0x310   : > { %v4838_v61 = vpop.f32.mrb[31].mxu1 }
 0x311   : > { %v7715_v22 = vadd.f32 %v4838_v61, %v4837_v55 }
 0x319   : > { %v4840_v6 = vpop.f32.mrb[32].mxu1 }
 0x31a   : > { %v4841_v37 = vpop.f32.mrb[33].mxu1 }
 0x31b   : > { %v7717_v2 = vadd.f32 %v4841_v37, %v4840_v6  ;;  %v4843_v59 = vpop.f32.mrb[34].mxu1  ;;  %v3784_v6 = vadd.f32 %v7501_v23, %v7735_v14 }
 0x31c   : > { %v4844_v28 = vpop.f32.mrb[35].mxu1 }
 0x31d   : > { %v7719_v1 = vadd.f32 %v4844_v28, %v4843_v59 }
 0x326   : > { %v4846_v31 = vpop.f32.mrb[36].mxu1 }
 0x327   : > { %v4847_v7 = vpop.f32.mrb[37].mxu1 }
 0x328   : > { %v7721_v36 = vadd.f32 %v4847_v7, %v4846_v31  ;;  %v4849_v21 = vpop.f32.mrb[38].mxu1 }
 0x329   : > { %v4850_v39 = vpop.f32.mrb[39].mxu1 }
 0x32a   : > { %v7723_v16 = vadd.f32 %v4850_v39, %v4849_v21  ;;  %v3789_v21 = vadd.f32 %v7533_v13, %v7735_v14  ;;  %v5255_v13 = vpack.c.bf16 %v4305_v26, %v4304_v0 }
 0x32c   : > { %5256 = vmatpush3.bf16.msra.mxu1 %v5255_v13  ;;  %v3813_v13 = vadd.f32 %v7661_v18, %v7735_v14 }
 0x32d   : > { %5257 = vmatprep.subr.bf16.mxu1 %v5431_v54 }
 0x32e   : > { %v4852_v48 = vpop.f32.mrb[40].mxu1 }
 0x32f   : > { %v4853_v11 = vpop.f32.mrb[41].mxu1 }
 0x330   : > { %v4855_v62 = vpop.f32.mrb[42].mxu1 }
 0x331   : > { %v4856_v19 = vpop.f32.mrb[43].mxu1 }
 0x336   : > { %v4874_v4 = vpop.f32.mrb[44].mxu1 }
 0x337   : > { %v4875_v32 = vpop.f32.mrb[45].mxu1 }
 0x338   : > { %v4876_v8 = vadd.f32 %v4875_v32, %v4874_v4  ;;  %v4877_v55 = vpop.f32.mrb[46].mxu1 }
 0x339   : > { %v4878_v61 = vpop.f32.mrb[47].mxu1 }
 0x33a   : > { %v7742_v37 = vadd.f32 %v4876_v8, %v3781_v52  ;;  %v4879_v59 = vadd.f32 %v4878_v61, %v4877_v55  ;;  %v3800_v55 = vadd.f32 %v7585_v30, %v7735_v14 }
 0x33c   : > { %v7744_v28 = vadd.f32 %v4879_v59, %v3784_v6 }
 0x33e   : > { %v4880_v31 = vpop.f32.mrb[48].mxu1 }
 0x33f   : > { %v4881_v7 = vpop.f32.mrb[49].mxu1 }
 0x340   : > { %v4882_v39 = vadd.f32 %v4881_v7, %v4880_v31  ;;  %v4883_v48 = vpop.f32.mrb[50].mxu1 }
 0x341   : > { %v4884_v11 = vpop.f32.mrb[51].mxu1 }
 0x342   : > { %v7750_v62 = vadd.f32 %v4882_v39, %v3789_v21  ;;  %v4885_v19 = vadd.f32 %v4884_v11, %v4883_v48  ;;  %v3805_v21 = vadd.f32 %v7614_v9, %v7735_v14  ;;  %v3808_v11 = vadd.f32 %v7619_v42, %v7735_v14  ;;  %v4306_v9 = vld [vmem:[%s7926_s5 + $0x20] sm:$0xff]  ;;  %v4307_v42 = vld [vmem:[%s7926_s5 + $0x28] sm:$0xff] }
 0x344   : > { %v7752_v23 = vadd.f32 %v4885_v19, %v3792_v41 }
 0x346   : > { %v4886_v29 = vpop.f32.mrb[52].mxu1 }
 0x347   : > { %v4887_v4 = vpop.f32.mrb[53].mxu1 }
 0x348   : > { %v4888_v32 = vadd.f32 %v4887_v4, %v4886_v29  ;;  %v4889_v52 = vpop.f32.mrb[54].mxu1 }
 0x349   : > { %v4890_v8 = vpop.f32.mrb[55].mxu1 }
 0x34a   : > { %v7765_v61 = vadd.f32 %v4888_v32, %v3797_v46  ;;  %v4891_v6 = vadd.f32 %v4890_v8, %v4889_v52  ;;  %v5258_v32 = vpack.c.bf16 %v4307_v42, %v4306_v9  ;;  %v3816_v52 = vadd.f32 %v7664_v63, %v7735_v14 }
 0x34c   : > { %v7767_v59 = vadd.f32 %v4891_v6, %v3800_v55  ;;  %5259 = vmatpush3.bf16.msra.mxu1 %v5258_v32 }
 0x34d   : > { %5260 = vmatprep.subr.bf16.mxu1 %v5431_v54 }
 0x34e   : > { %v4892_v31 = vpop.f32.mrb[56].mxu1 }
 0x34f   : > { %v4893_v7 = vpop.f32.mrb[57].mxu1 }
 0x350   : > { %v4894_v39 = vadd.f32 %v4893_v7, %v4892_v31  ;;  %v4895_v25 = vpop.f32.mrb[58].mxu1  ;;  %v3821_v7 = vadd.f32 %v7690_v3, %v7735_v14 }
 0x351   : > { %v4896_v48 = vpop.f32.mrb[59].mxu1 }
 0x352   : > { %v7773_v41 = vadd.f32 %v4894_v39, %v3805_v21  ;;  %v4897_v19 = vadd.f32 %v4896_v48, %v4895_v25  ;;  %v3824_v48 = vadd.f32 %v7694_v34, %v7735_v14  ;;  %v3829_v34 = vadd.f32 %v7705_v57, %v7735_v14 }
 0x354   : > { %v7775_v30 = vadd.f32 %v4897_v19, %v3808_v11 }
 0x356   : > { %v4898_v0 = vpop.f32.mrb[60].mxu1 }
 0x357   : > { %v4899_v26 = vpop.f32.mrb[61].mxu1 }
 0x358   : > { %v4900_v29 = vadd.f32 %v4899_v26, %v4898_v0  ;;  %v4901_v4 = vpop.f32.mrb[62].mxu1  ;;  %v4308_v0 = vld [vmem:[%s7926_s5 + $0x30] sm:$0xff]  ;;  %v4309_v26 = vld [vmem:[%s7926_s5 + $0x38] sm:$0xff] }
 0x359   : > { %v4902_v46 = vpop.f32.mrb[63].mxu1  ;;  %v5261_v3 = vpack.c.bf16 %v4309_v26, %v4308_v0 }
 0x35a   : > { %v7787_v8 = vadd.f32 %v4900_v29, %v3813_v13  ;;  %v4903_v55 = vadd.f32 %v4902_v46, %v4901_v4  ;;  %v3832_v46 = vadd.f32 %v7708_v10, %v7735_v14 }
 0x35b   : > { %5262 = vmatpush3.bf16.msra.mxu1 %v5261_v3  ;;  %v3845_v3 = vadd.f32 %v7717_v2, %v7735_v14  ;;  %v3856_v2 = vadd.f32 %v7723_v16, %v7735_v14 }
 0x35c   : > { %v7789_v18 = vadd.f32 %v4903_v55, %v3816_v52  ;;  %5263 = vmatprep.subr.bf16.mxu1 %v5431_v54 }
 0x35e   : > { %v4904_v6 = vpop.f32.mrb[64].mxu1 }
 0x35f   : > { %v4905_v31 = vpop.f32.mrb[65].mxu1 }
 0x360   : > { %v4906_v21 = vadd.f32 %v4905_v31, %v4904_v6  ;;  %v4907_v39 = vpop.f32.mrb[66].mxu1 }
 0x361   : > { %v4908_v25 = vpop.f32.mrb[67].mxu1 }
 0x362   : > { %v7796_v63 = vadd.f32 %v4906_v21, %v3821_v7  ;;  %v4909_v11 = vadd.f32 %v4908_v25, %v4907_v39  ;;  %v3837_v7 = vadd.f32 %v7713_v33, %v7735_v14  ;;  %v3840_v25 = vadd.f32 %v7715_v22, %v7735_v14 }
 0x363   : > { %v3848_v33 = vadd.f32 %v7719_v1, %v7735_v14 }
 0x364   : > { %v7798_v19 = vadd.f32 %v4909_v11, %v3824_v48 }
 0x366   : > { %v4910_v13 = vpop.f32.mrb[68].mxu1 }
 0x367   : > { %v4911_v29 = vpop.f32.mrb[69].mxu1 }
 0x368   : > { %v4912_v4 = vadd.f32 %v4911_v29, %v4910_v13  ;;  %v4913_v9 = vpop.f32.mrb[70].mxu1 }
 0x369   : > { %v4914_v42 = vpop.f32.mrb[71].mxu1 }
 0x36a   : > { %v7811_v32 = vadd.f32 %v4912_v4, %v3829_v34  ;;  %v4915_v52 = vadd.f32 %v4914_v42, %v4913_v9 }
 0x36c   : > { %v7813_v55 = vadd.f32 %v4915_v52, %v3832_v46  ;;  %v3853_v52 = vadd.f32 %v7721_v36, %v7735_v14 }
 0x36e   : > { %v4916_v6 = vpop.f32.mrb[72].mxu1 }
 0x36f   : > { %v4917_v31 = vpop.f32.mrb[73].mxu1 }
 0x370   : > { %v4918_v21 = vadd.f32 %v4917_v31, %v4916_v6  ;;  %v4919_v57 = vpop.f32.mrb[74].mxu1 }
 0x371   : > { %v4920_v39 = vpop.f32.mrb[75].mxu1 }
 0x372   : > { %v7819_v48 = vadd.f32 %v4918_v21, %v3837_v7  ;;  %v4921_v11 = vadd.f32 %v4920_v39, %v4919_v57 }
 0x374   : > { %v7821_v10 = vadd.f32 %v4921_v11, %v3840_v25 }
 0x376   : > { %v4922_v0 = vpop.f32.mrb[76].mxu1 }
 0x377   : > { %v4923_v26 = vpop.f32.mrb[77].mxu1 }
 0x378   : > { %v4924_v13 = vadd.f32 %v4923_v26, %v4922_v0  ;;  %v4925_v29 = vpop.f32.mrb[78].mxu1 }
 0x379   : > { %v4926_v34 = vpop.f32.mrb[79].mxu1 }
 0x37a   : > { %v7827_v4 = vadd.f32 %v4924_v13, %v3845_v3  ;;  %v4927_v9 = vadd.f32 %v4926_v34, %v4925_v29 }
 0x37c   : > { %v7829_v22 = vadd.f32 %v4927_v9, %v3848_v33 }
 0x37e   : > { %v4928_v42 = vpop.f32.mrb[80].mxu1 }
 0x37f   : > { %v4929_v46 = vpop.f32.mrb[81].mxu1 }
 0x380   : > { %v4930_v6 = vadd.f32 %v4929_v46, %v4928_v42  ;;  %v4931_v31 = vpop.f32.mrb[82].mxu1 }
 0x381   : > { %v4932_v7 = vpop.f32.mrb[83].mxu1 }
 0x382   : > { %v7835_v21 = vadd.f32 %v4930_v6, %v3853_v52  ;;  %v4933_v57 = vadd.f32 %v4932_v7, %v4931_v31 }
 0x384   : > { %v7837_v1 = vadd.f32 %v4933_v57, %v3856_v2 }
 0x387   : > { %v4934_v39 = vpop.f32.mrb[84].mxu1 }
 0x388   : > { %v4935_v25 = vpop.f32.mrb[85].mxu1 }
 0x389   : > { %v4937_v11 = vpop.f32.mrb[86].mxu1 }
 0x38a   : > { %v4938_v0 = vpop.f32.mrb[87].mxu1 }
 0x38f   : > { %v4956_v26 = vpop.f32.mrb[88].mxu1 }
 0x390   : > { %v4957_v3 = vpop.f32.mrb[89].mxu1 }
 0x391   : > { %v4958_v13 = vadd.f32 %v4957_v3, %v4956_v26  ;;  %v4959_v29 = vpop.f32.mrb[90].mxu1 }
 0x392   : > { %v4960_v36 = vpop.f32.mrb[91].mxu1 }
 0x393   : > { %v4019_v34 = vadd.f32 %v4958_v13, %v7742_v37  ;;  %v4961_v33 = vadd.f32 %v4960_v36, %v4959_v29 }
 0x395   : > { %v4138_v9 = vadd.f32 %v7225_v20, %v4019_v34  ;;  %v4022_v16 = vadd.f32 %v4961_v33, %v7744_v28 }
 0x397   : > { %v4141_v14 = vadd.f32 %v7238_v12, %v4022_v16  ;;  %v4962_v42 = vpop.f32.mrb[92].mxu1 }
 0x398   : > { %v4963_v46 = vpop.f32.mrb[93].mxu1 }
 0x399   : > { %v4964_v52 = vadd.f32 %v4963_v46, %v4962_v42  ;;  %v4965_v6 = vpop.f32.mrb[94].mxu1 }
 0x39a   : > { %v4966_v31 = vpop.f32.mrb[95].mxu1 }
 0x39b   : > { %v4027_v7 = vadd.f32 %v4964_v52, %v7750_v62  ;;  %v4967_v2 = vadd.f32 %v4966_v31, %v4965_v6 }
 0x39d   : > { %v4146_v57 = vadd.f32 %v7313_v35, %v4027_v7  ;;  %v4030_v39 = vadd.f32 %v4967_v2, %v7752_v23 }
 0x39f   : > { %v4238_v37 = vmax.f32 %v4138_v9, %v4146_v57  ;;  %v4149_v25 = vadd.f32 %v7328_v5, %v4030_v39  ;;  %v4968_v20 = vpop.f32.mrb[96].mxu1 }
 0x3a0   : > { %v4969_v11 = vpop.f32.mrb[97].mxu1 }
 0x3a1   : > { %4248 = vst.msk [vmem:[#allocation4] sm:$0xff] %vm2408_vm7, %v4238_v37  ;;  %v4239_v12 = vmax.f32 %v4141_v14, %v4149_v25  ;;  %v4970_v28 = vadd.f32 %v4969_v11, %v4968_v20  ;;  %v4971_v0 = vpop.f32.mrb[98].mxu1 }
 0x3a2   : > { %v4972_v26 = vpop.f32.mrb[99].mxu1 }
 0x3a3   : > { %4249 = vst.msk [vmem:[#allocation4 + $0x8] sm:$0xff] %vm2408_vm7, %v4239_v12  ;;  %v4035_v62 = vadd.f32 %v4970_v28, %v7765_v61  ;;  %v4973_v3 = vadd.f32 %v4972_v26, %v4971_v0 }
 0x3a5   : > { %v4154_v35 = vadd.f32 %v7409_v56, %v4035_v62  ;;  %v4038_v23 = vadd.f32 %v4973_v3, %v7767_v59 }
 0x3a7   : > { %v4157_v13 = vadd.f32 %v7420_v49, %v4038_v23  ;;  %v4974_v5 = vpop.f32.mrb[100].mxu1 }
 0x3a8   : > { %v4975_v29 = vpop.f32.mrb[101].mxu1 }
 0x3a9   : > { %v4976_v36 = vadd.f32 %v4975_v29, %v4974_v5  ;;  %v4977_v34 = vpop.f32.mrb[102].mxu1 }
 0x3aa   : > { %v4978_v33 = vpop.f32.mrb[103].mxu1 }
 0x3ab   : > { %v4043_v9 = vadd.f32 %v4976_v36, %v7773_v41  ;;  %v4979_v16 = vadd.f32 %v4978_v33, %v4977_v34 }
 0x3ad   : > { %v4162_v14 = vadd.f32 %v7471_v27, %v4043_v9  ;;  %v4046_v42 = vadd.f32 %v4979_v16, %v7775_v30 }
 0x3af   : > { %v4240_v61 = vmax.f32 %v4154_v35, %v4162_v14  ;;  %v4165_v46 = vadd.f32 %v7481_v47, %v4046_v42  ;;  %v4980_v56 = vpop.f32.mrb[104].mxu1 }
 0x3b0   : > { %v4981_v52 = vpop.f32.mrb[105].mxu1 }
 0x3b1   : > { %4250 = vst.msk [vmem:[#allocation4 + $0x10] sm:$0xff] %vm2408_vm7, %v4240_v61  ;;  %v4241_v49 = vmax.f32 %v4157_v13, %v4165_v46  ;;  %v4982_v59 = vadd.f32 %v4981_v52, %v4980_v56  ;;  %v4983_v6 = vpop.f32.mrb[106].mxu1 }
 0x3b2   : > { %v4984_v31 = vpop.f32.mrb[107].mxu1 }
 0x3b3   : > { %4251 = vst.msk [vmem:[#allocation4 + $0x18] sm:$0xff] %vm2408_vm7, %v4241_v49  ;;  %v4051_v41 = vadd.f32 %v4982_v59, %v7787_v8  ;;  %v4985_v7 = vadd.f32 %v4984_v31, %v4983_v6  ;;  %v4222_v31 = vlaneseq }
 0x3b5   : > { %v4170_v27 = vadd.f32 %v7507_v40, %v4051_v41  ;;  %v4054_v30 = vadd.f32 %v4985_v7, %v7789_v18 }
 0x3b7   : > { %v4173_v2 = vadd.f32 %v7516_v51, %v4054_v30  ;;  %v4986_v47 = vpop.f32.mrb[108].mxu1 }
 0x3b8   : > { %v4987_v57 = vpop.f32.mrb[109].mxu1 }
 0x3b9   : > { %v4988_v39 = vadd.f32 %v4987_v57, %v4986_v47  ;;  %v4989_v37 = vpop.f32.mrb[110].mxu1 }
 0x3ba   : > { %v4990_v25 = vpop.f32.mrb[111].mxu1 }
 0x3bb   : > { %v4059_v20 = vadd.f32 %v4988_v39, %v7796_v63  ;;  %v4991_v11 = vadd.f32 %v4990_v25, %v4989_v37 }
 0x3bd   : > { %v4178_v12 = vadd.f32 %v7537_v50, %v4059_v20  ;;  %v4062_v28 = vadd.f32 %v4991_v11, %v7798_v19 }
 0x3bf   : > { %v4242_v8 = vmax.f32 %v4170_v27, %v4178_v12  ;;  %v4181_v0 = vadd.f32 %v7544_v44, %v4062_v28  ;;  %v4992_v40 = vpop.f32.mrb[112].mxu1 }
 0x3c0   : > { %v4993_v26 = vpop.f32.mrb[113].mxu1 }
 0x3c1   : > { %4252 = vst.msk [vmem:[#allocation4 + $0x20] sm:$0xff] %vm2408_vm7, %v4242_v8  ;;  %v4243_v51 = vmax.f32 %v4173_v2, %v4181_v0  ;;  %v4994_v18 = vadd.f32 %v4993_v26, %v4992_v40  ;;  %v4995_v62 = vpop.f32.mrb[114].mxu1  ;;  %v4223_v2 = vshrl.u32 %v4222_v31, 7  ;;  %v4268_v8 = vld [vmem:[#allocation4 + $0x1] ss:$2 sm:$0xff]  ;;  %v4388_v31 = vld [vmem:[%s7928_s7 + $0x18] sm:$0xff] }
 0x3c2   : > { %v4996_v3 = vpop.f32.mrb[115].mxu1 }
 0x3c3   : > { %4253 = vst.msk [vmem:[#allocation4 + $0x28] sm:$0xff] %vm2408_vm7, %v4243_v51  ;;  %v4067_v63 = vadd.f32 %v4994_v18, %v7811_v32  ;;  %v4997_v35 = vadd.f32 %v4996_v3, %v4995_v62  ;;  %v4226_v57 = vadd.s32 24, %v4223_v2  ;;  %v4224_v25 = vadd.s32 8, %v4223_v2  ;;  %v4260_v51 = vld [vmem:[#allocation4 + $0x10] ss:$2 sm:$0xff] }
 0x3c4   : > { %v4225_v20 = vadd.s32 16, %v4223_v2  ;;  %v4227_v11 = vadd.s32 32, %v4223_v2  ;;  %v4270_v62 = vld [vmem:[#allocation4 + $0x11] ss:$2 sm:$0xff] }
 0x3c5   : > { %v4186_v50 = vadd.f32 %v7566_v60, %v4067_v63  ;;  %v4070_v19 = vadd.f32 %v4997_v35, %v7813_v55  ;;  %v4231_v12 = vand.u32 7, %v4226_v57 }
 0x3c6   : > { %v4230_v40 = vand.u32 7, %v4225_v20  ;;  %v4232_v26 = vand.u32 7, %v4227_v11 }
 0x3c7   : > { %v4189_v23 = vadd.f32 %v7572_v45, %v4070_v19  ;;  %v4998_v44 = vpop.f32.mrb[116].mxu1  ;;  %vm4236_vm10 = vcmp.lt.s32.totalorder %v4231_v12, 5 }
 0x3c8   : > { %v4999_v13 = vpop.f32.mrb[117].mxu1  ;;  %vm4235_vm12 = vcmp.lt.s32.totalorder %v4230_v40, 5  ;;  %vm4237_vm13 = vcmp.lt.s32.totalorder %v4232_v26, 5 }
 0x3c9   : > { %v5000_v5 = vadd.f32 %v4999_v13, %v4998_v44  ;;  %v5001_v29 = vpop.f32.mrb[118].mxu1 }
 0x3ca   : > { %v5002_v36 = vpop.f32.mrb[119].mxu1  ;;  %v4262_v18 = vld [vmem:[#allocation4 + $0x20] ss:$2 sm:$0xff]  ;;  %v4272_v3 = vld [vmem:[#allocation4 + $0x21] ss:$2 sm:$0xff] }
 0x3cb   : > { %v4075_v34 = vadd.f32 %v5000_v5, %v7819_v48  ;;  %v5003_v33 = vadd.f32 %v5002_v36, %v5001_v29  ;;  %v4279_v19 = vmax.f32 %v4262_v18, %v4272_v3 }
 0x3cd   : > { %v4194_v9 = vadd.f32 %v7596_v58, %v4075_v34  ;;  %v4078_v16 = vadd.f32 %v5003_v33, %v7821_v10  ;;  %v4284_v34 = vsel %vm4235_vm12, %v4279_v19, -3.4028235e+38 }
 0x3cf   : > { %v4244_v32 = vmax.f32 %v4186_v50, %v4194_v9  ;;  %v4197_v14 = vadd.f32 %v7601_v38, %v4078_v16  ;;  %v5004_v60 = vpop.f32.mrb[120].mxu1  ;;  %v4278_v50 = vmax.f32 %v4260_v51, %v4270_v62 }
 0x3d0   : > { %v5005_v42 = vpop.f32.mrb[121].mxu1 }
 0x3d1   : > { %4254 = vst.msk [vmem:[#allocation4 + $0x30] sm:$0xff] %vm2408_vm7, %v4244_v32  ;;  %v4245_v45 = vmax.f32 %v4189_v23, %v4197_v14  ;;  %v5006_v55 = vadd.f32 %v5005_v42, %v5004_v60  ;;  %v5007_v61 = vpop.f32.mrb[122].mxu1  ;;  %v4289_v42 = vsel %vm2408_vm7, %v4284_v34, -inf }
 0x3d2   : > { %v5008_v46 = vpop.f32.mrb[123].mxu1 }
 0x3d3   : > { %4255 = vst.msk [vmem:[#allocation4 + $0x38] sm:$0xff] %vm2408_vm7, %v4245_v45  ;;  %v4083_v48 = vadd.f32 %v5006_v55, %v7827_v4  ;;  %v5009_v56 = vadd.f32 %v5008_v46, %v5007_v61 }
 0x3d5   : > { %v4202_v58 = vadd.f32 %v7625_v17, %v4083_v48  ;;  %v4086_v10 = vadd.f32 %v5009_v56, %v7829_v22 }
 0x3d7   : > { %v4205_v52 = vadd.f32 %v7627_v15, %v4086_v10  ;;  %v5010_v38 = vpop.f32.mrb[124].mxu1  ;;  %v4385_v10 = vld [vmem:[%s7928_s7] sm:$0xff] }
 0x3d8   : > { %v5011_v49 = vpop.f32.mrb[125].mxu1 }
 0x3d9   : > { %v5012_v59 = vadd.f32 %v5011_v49, %v5010_v38  ;;  %v5013_v6 = vpop.f32.mrb[126].mxu1 }
 0x3da   : > { %v5014_v41 = vpop.f32.mrb[127].mxu1  ;;  %v4264_v28 = vld [vmem:[#allocation4 + $0x30] ss:$2 sm:$0xff]  ;;  %v4274_v0 = vld [vmem:[#allocation4 + $0x31] ss:$2 sm:$0xff] }
 0x3db   : > { %v4091_v7 = vadd.f32 %v5012_v59, %v7835_v21  ;;  %v5015_v27 = vadd.f32 %v5014_v41, %v5013_v6  ;;  %v4280_v35 = vmax.f32 %v4264_v28, %v4274_v0  ;;  %v4387_v6 = vld [vmem:[%s7928_s7 + $0x10] sm:$0xff] }
 0x3dc   : > { %v5267_v41 = vpack.c.bf16 %v4388_v31, %v4387_v6 }
 0x3dd   : > { %v4210_v30 = vadd.f32 %v7637_v53, %v4091_v7  ;;  %v4094_v4 = vadd.f32 %v5015_v27, %v7837_v1  ;;  %v4228_v53 = vand.u32 7, %v4223_v2  ;;  %v4258_v1 = vld [vmem:[#allocation4] ss:$2 sm:$0xff]  ;;  %v4285_v29 = vsel %vm4236_vm10, %v4280_v35, -3.4028235e+38 }
 0x3de   : > { %v4277_v63 = vmax.f32 %v4258_v1, %v4268_v8  ;;  %v4290_v16 = vsel %vm2408_vm7, %v4285_v29, -inf  ;;  %v4310_v7 = vld [vmem:[%s7927_s6] sm:$0x1] }
 0x3df   : > { %v4246_v47 = vmax.f32 %v4202_v58, %v4210_v30  ;;  %v4213_v17 = vadd.f32 %v7641_v43, %v4094_v4  ;;  %v5016_v22 = vpop.f32.mrb[128].mxu1  ;;  %v4229_v43 = vand.u32 7, %v4224_v25  ;;  %vm4233_vm9 = vcmp.lt.s32.totalorder %v4228_v53, 5 }
 0x3e0   : > { %v5017_v15 = vpop.f32.mrb[129].mxu1  ;;  %v4282_v5 = vsel %vm4233_vm9, %v4277_v63, -3.4028235e+38  ;;  %v4294_v55 = vmax.f32 %v4289_v42, %v4290_v16 }
 0x3e1   : > { %4256 = vst.msk [vmem:[#allocation4 + $0x40] sm:$0xff] %vm2408_vm7, %v4246_v47  ;;  %v4247_v39 = vmax.f32 %v4205_v52, %v4213_v17  ;;  %v5019_v37 = vpop.f32.mrb[130].mxu1  ;;  %vm4234_vm11 = vcmp.lt.s32.totalorder %v4229_v43, 5  ;;  %v4287_v9 = vsel %vm2408_vm7, %v4282_v5, -inf  ;;  %v4386_v52 = vld [vmem:[%s7928_s7 + $0x8] sm:$0xff] }
 0x3e2   : > { %v5020_v21 = vpop.f32.mrb[131].mxu1  ;;  %v4283_v36 = vsel %vm4234_vm11, %v4278_v50, -3.4028235e+38  ;;  %v5264_v49 = vpack.c.bf16 %v4386_v52, %v4385_v10 }
 0x3e3   : > { %4257 = vst.msk [vmem:[#allocation4 + $0x48] sm:$0xff] %vm2408_vm7, %v4247_v39  ;;  %v4288_v60 = vsel %vm2408_vm7, %v4283_v36, -inf }
 0x3ea   : > { %v4266_v23 = vld [vmem:[#allocation4 + $0x40] ss:$2 sm:$0xff]  ;;  %v4276_v44 = vld [vmem:[#allocation4 + $0x41] ss:$2 sm:$0xff] }
 0x3eb   : > { %v4281_v13 = vmax.f32 %v4266_v23, %v4276_v44 }
 0x3ed   : > { %v4286_v33 = vsel %vm4237_vm13, %v4281_v13, -3.4028235e+38 }
 0x3ee   : > { %v4291_v32 = vsel %vm2408_vm7, %v4286_v33, -inf }
 0x3ef   : > { %v4292_v14 = vmax.f32 %v4287_v9, %v4291_v32 }
 0x3f1   : > { %v4293_v45 = vmax.f32 %v4292_v14, %v4288_v60 }
 0x3f3   : > { %v4295_v61 = vmax.f32 %v4293_v45, %v4294_v55 }
 0x3f5   : > { %v4296_v46 = vrot.slane %v4295_v61, 4 }
 0x3f7   : > { %v4297_v48 = vmax.f32 %v4295_v61, %v4296_v46 }
 0x3f9   : > { %v4298_v56 = vrot.slane %v4297_v48, 2 }
 0x3fb   : > { %v4299_v58 = vmax.f32 %v4297_v48, %v4298_v56 }
 0x3fd   : > { %v4300_v38 = vrot.slane %v4299_v58, 1 }
 0x3ff   : > { %v4301_v59 = vmax.f32 %v4299_v58, %v4300_v38 }
 0x401   : > { %5238 = vmatmul.mubr.msk.f32.vlgmr.msra.gmra.mrb[132].mxu1 %vm2408_vm7, %v4301_v59 }
 0x402   : > { %5265 = vmatpush3.bf16.msra.mxu1 %v5264_v49  ;;  %5248 = vmatprep.mubr.msk.f32.mxu1 %vm5426_vm1, %v8111_v24 }
 0x403   : > { %5266 = vmatprep.subr.bf16.mxu1 %v5431_v54  ;;  %v4389_v54 = vld [vmem:[#allocation5] sm:$0x1] }
 0x406   : > { %5268 = vmatpush3.bf16.msra.mxu1 %v5267_v41 }
 0x4d4   : > { %v4380_v27 = vpop.f32.mrb[132].mxu1 }
 0x4d5   : > { %v4381_v30 = vadd.f32 %v4380_v27, %v4310_v7  ;;  %v5239_v24 = vpop.f32.mrb[133].mxu1 }
 0x4d7   : > { %v4384_v4 = vmax.f32 %v4381_v30, 0.0 }
 0x4d9   : > { %5249 = vmatmul.mubr.msk.f32.vlgmr.msra.gmra.mrb[134].mxu1 %vm775_vm0, %v4384_v4 }
 0x5ac   : > { %v4459_v2 = vpop.f32.mrb[134].mxu1 }
 0x5ad   : > { %v4460_v47 = vadd.f32 %v4459_v2, %v4389_v54  ;;  %v5250_v17 = vpop.f32.mrb[135].mxu1 }
 0x5af   : > { %v4711_v22 = vmul.f32 -1.442695, %v4460_v47 }
 0x5b1   : > { %5397 = vpow2.f32 %v4711_v22 }
 0x5bb   : > { %v5398_v57 = vpop.eup %5397 }
 0x5bc   : > { %v4466_v15 = vadd.f32 1.0, %v5398_v57 }
 0x5be   : > { %5399 = vrcp.f32 %v4466_v15 }
 0x5c8   : > { %v5400_v39 = vpop.eup %5399 }
 0x5c9   : > { %4470 = vst.msk [vmem:[%s330_s18] sm:$0x1] %vm4469_vm14, %v5400_v39 }
 0x5ca PF: > { %s21_s11 = sadd.s32 1, %s5423_s11  }
 0x5cb   : > { %p18_p4 = scmp.ge.s32.totalorder %s21_s11, 4  }
 0x5cd   :  { %20 = sbr.rel (!%p18_p4) target bundleno = 3 (0x3), region = 154 }

</bundles_post_ra>
